<compile_context>
chip_gen: v6e
topology: v6e:2x2x1
jax: 0.10.0
libtpu: 0.0.40
codegen_flags: <defaults>
</compile_context>

<pallas_src>
import functools

import jax
import jax.numpy as jnp
from jax import lax
from jax.experimental import pallas as pl
from jax.experimental.pallas import tpu as pltpu

CP = 128  # lane-dense padded width for the internal (h1/h2) channel axes


def _round_up(x, m):
    return (x + m - 1) // m * m


def _row_pad(W):
    # Halo rows above/below the flattened h1: >= W+1 for the 3x3 taps and a
    # multiple of 8 so the big h1 store into the scratch stays sublane-aligned.
    return _round_up(W + 1, 8)


# ------------------------------ Fused kernel -------------------------------- #

def _bottleneck_kernel(x_ref, w1_ref, b1_ref, w2_ref, b2_ref, w3_ref, b3_ref,
                       o_ref, h1pad_ref, *, H, W):
    M = H * W
    PADR = _row_pad(W)

    # Zero the halo rows only once: the scratch persists across grid steps and
    # the halo rows are never overwritten.
    @pl.when(pl.program_id(0) == 0)
    def _():
        h1pad_ref[0:PADR, :] = jnp.zeros((PADR, CP), jnp.float32)
        h1pad_ref[PADR + M:PADR + M + PADR, :] = jnp.zeros((PADR, CP), jnp.float32)

    # ---- Stage 1: 1x1 conv (BN1 scale folded into w1) + bias + ReLU ----
    h1 = jnp.dot(x_ref[0].astype(jnp.bfloat16), w1_ref[...],
                 preferred_element_type=jnp.float32)              # (M, CP)
    h1 = jnp.maximum(h1 + b1_ref[...], 0.0)
    h1pad_ref[PADR:PADR + M, :] = h1                               # aligned store

    # ---- Stage 2: 3x3 conv (pad=1, stride=1) as 9 shifted MXU matmuls ----
    w_col = lax.broadcasted_iota(jnp.int32, (M, 1), 0) % W
    acc = None
    for kh in range(3):
        for kw in range(3):
            t = kh * 3 + kw
            off = (kh - 1) * W + (kw - 1)
            patch = h1pad_ref[PADR + off:PADR + off + M, :]
            if kw == 0:       # needs column w-1 -> invalid at w == 0
                patch = jnp.where(w_col > 0, patch, 0.0)
            elif kw == 2:     # needs column w+1 -> invalid at w == W-1
                patch = jnp.where(w_col < W - 1, patch, 0.0)
            d = jnp.dot(patch.astype(jnp.bfloat16), w2_ref[t],
                        preferred_element_type=jnp.float32)
            acc = d if acc is None else acc + d
    h2 = jnp.maximum(acc + b2_ref[...], 0.0)                       # (M, CP)

    # ---- Stage 3: 1x1 conv + bias + residual + ReLU ----
    y = jnp.dot(h2.astype(jnp.bfloat16), w3_ref[...],
                preferred_element_type=jnp.float32)                # (M, Cout)
    y = y + b3_ref[...] + x_ref[0]                                 # residual re-read at use
    o_ref[0] = jnp.maximum(y, 0.0)


# ------------------------------ Host wrapper -------------------------------- #

def _fold_bn(gamma, beta, mean, var, eps=1e-5):
    scale = gamma.astype(jnp.float32) / jnp.sqrt(var.astype(jnp.float32) + eps)
    bias = beta.astype(jnp.float32) - mean.astype(jnp.float32) * scale
    return scale, bias


def prepare_params(p):
    """Fold BN scales into the conv weights, pad internal channel axes to CP,
    cast matmul operands to bf16.  Call once, outside the jitted forward."""
    width, cin = p["w1"].shape[:2]
    cout = p["w3"].shape[0]
    assert max(width, cin, cout) <= CP

    s1, b1 = _fold_bn(p["g1"], p["b1"], p["m1"], p["v1"])
    s2, b2 = _fold_bn(p["g2"], p["b2"], p["m2"], p["v2"])
    s3, b3 = _fold_bn(p["g3"], p["b3"], p["m3"], p["v3"])

    # conv1 1x1: (width, cin, 1, 1) -> (cin, CP) with BN1 scale folded per column.
    w1 = p["w1"].reshape(width, cin).T.astype(jnp.float32) * s1[None, :]
    w1 = jnp.pad(w1, ((0, 0), (0, CP - width))).astype(jnp.bfloat16)

    # conv2 3x3: (co, ci, 3, 3) -> (9, CP, CP) per-tap matrices, BN2 folded.
    w2 = jnp.transpose(p["w2"].astype(jnp.float32), (2, 3, 1, 0)) * s2[None, None, None, :]
    w2 = jnp.pad(w2, ((0, 0), (0, 0), (0, CP - width), (0, CP - width)))
    w2 = w2.reshape(9, CP, CP).astype(jnp.bfloat16)

    # conv3 1x1: (cout, width, 1, 1) -> (CP, cout), BN3 folded.
    w3 = p["w3"].reshape(cout, width).T.astype(jnp.float32) * s3[None, :]
    w3 = jnp.pad(w3, ((0, CP - width), (0, 0))).astype(jnp.bfloat16)

    return {
        "w1": w1, "b1": jnp.pad(b1, (0, CP - width)).reshape(1, CP),
        "w2": w2, "b2": jnp.pad(b2, (0, CP - width)).reshape(1, CP),
        "w3": w3, "b3": b3.reshape(1, cout),
    }


@jax.jit
def bottleneck_forward(x_nchw, w):
    """Bottleneck forward (stride=1, no downsample, groups=1, eval-mode BN)."""
    N, Cin, H, W = x_nchw.shape
    Cout = w["w3"].shape[1]
    M = H * W
    assert Cin == Cout, "identity residual requires Cin == Cout (no downsample)"
    assert M % 8 == 0 and max(Cin, Cout) <= CP
    PADR = _row_pad(W)

    # NCHW -> (N, H*W, Cin); channels stay unpadded in HBM (pad lives in weights).
    xf = jnp.transpose(x_nchw, (0, 2, 3, 1)).astype(jnp.float32).reshape(N, M, Cin)

    kernel = functools.partial(_bottleneck_kernel, H=H, W=W)
    const = lambda shape: pl.BlockSpec(shape, lambda n, _s=shape: (0,) * len(_s))

    out = pl.pallas_call(
        kernel,
        out_shape=jax.ShapeDtypeStruct((N, M, Cout), jnp.float32),
        grid_spec=pltpu.PrefetchScalarGridSpec(
            num_scalar_prefetch=0,
            grid=(N,),
            in_specs=[
                pl.BlockSpec((1, M, Cin), lambda n: (n, 0, 0)),   # x (also residual)
                const((Cin, CP)), const((1, CP)),                 # w1, b1
                const((9, CP, CP)), const((1, CP)),               # w2 taps, b2
                const((CP, Cout)), const((1, Cout)),              # w3, b3
            ],
            out_specs=pl.BlockSpec((1, M, Cout), lambda n: (n, 0, 0)),
            scratch_shapes=[
                pltpu.VMEM((M + 2 * _row_pad(W), CP), jnp.float32),  # row-padded h1
            ]),
        compiler_params=pltpu.CompilerParams(
            dimension_semantics=("parallel",)),
    )(xf, w["w1"], w["b1"], w["w2"], w["b2"], w["w3"], w["b3"])

    return jnp.transpose(out.reshape(N, H, W, Cout), (0, 3, 1, 2))   # NCHW


# --------------------------- Pure-JAX reference ------------------------------ #

def _bn_eval(x_nchw, gamma, beta, mean, var, eps=1e-5):
    s = (gamma / jnp.sqrt(var + eps)).reshape(1, -1, 1, 1)
    b = (beta - mean * gamma / jnp.sqrt(var + eps)).reshape(1, -1, 1, 1)
    return x_nchw * s + b


def _conv_nchw(x, w, padding):
    return lax.conv_general_dilated(
        x, w, window_strides=(1, 1), padding=padding,
        dimension_numbers=("NCHW", "OIHW", "NCHW"))


def bottleneck_reference(x, p):
    out = _conv_nchw(x, p["w1"], "VALID")
    out = jnp.maximum(_bn_eval(out, p["g1"], p["b1"], p["m1"], p["v1"]), 0.0)
    out = _conv_nchw(out, p["w2"], [(1, 1), (1, 1)])
    out = jnp.maximum(_bn_eval(out, p["g2"], p["b2"], p["m2"], p["v2"]), 0.0)
    out = _conv_nchw(out, p["w3"], "VALID")
    out = _bn_eval(out, p["g3"], p["b3"], p["m3"], p["v3"])
    return jnp.maximum(out + x, 0.0)


# ---------------------------------- Main ------------------------------------- #

if __name__ == "__main__":
    # Bottleneck(inplanes=16, planes=4, stride=1, downsample=None, groups=1, base_width=64)
    inplanes, planes, groups, base_width = 16, 4, 1, 64
    width = int(planes * (base_width / 64.0)) * groups        # 4
    cout = planes * 4                                         # 16 (== inplanes -> identity residual)
    N, H, W = 2, 16, 16

    key = jax.random.PRNGKey(0)
    ks = jax.random.split(key, 16)

    params = {
        "w1": 0.1 * jax.random.normal(ks[0], (width, inplanes, 1, 1), jnp.float32),
        "g1": 1.0 + 0.1 * jax.random.normal(ks[1], (width,), jnp.float32),
        "b1": 0.1 * jax.random.normal(ks[2], (width,), jnp.float32),
        "m1": 0.05 * jax.random.normal(ks[3], (width,), jnp.float32),
        "v1": 1.0 + 0.1 * jnp.abs(jax.random.normal(ks[4], (width,), jnp.float32)),
        "w2": 0.1 * jax.random.normal(ks[5], (width, width, 3, 3), jnp.float32),
        "g2": 1.0 + 0.1 * jax.random.normal(ks[6], (width,), jnp.float32),
        "b2": 0.1 * jax.random.normal(ks[7], (width,), jnp.float32),
        "m2": 0.05 * jax.random.normal(ks[8], (width,), jnp.float32),
        "v2": 1.0 + 0.1 * jnp.abs(jax.random.normal(ks[9], (width,), jnp.float32)),
        "w3": 0.1 * jax.random.normal(ks[10], (cout, width, 1, 1), jnp.float32),
        "g3": 1.0 + 0.1 * jax.random.normal(ks[11], (cout,), jnp.float32),
        "b3": 0.1 * jax.random.normal(ks[12], (cout,), jnp.float32),
        "m3": 0.05 * jax.random.normal(ks[13], (cout,), jnp.float32),
        "v3": 1.0 + 0.1 * jnp.abs(jax.random.normal(ks[14], (cout,), jnp.float32)),
    }

    x = jax.random.normal(ks[15], (N, inplanes, H, W), jnp.float32)

    prepped = jax.tree_util.tree_map(jax.block_until_ready, prepare_params(params))

    out = jax.block_until_ready(bottleneck_forward(x, prepped))
    ref = jax.block_until_ready(bottleneck_reference(x, params))

    assert out.shape == (N, cout, H, W), out.shape
    err = float(jnp.max(jnp.abs(out - ref)))
    # bf16 matmul operands (f32 accumulation) -> bf16-level tolerance vs f32 ref.
    assert err < 2e-2, err

    print("KERNEL_OK")
</pallas_src>

<mosaic_0001>
module attributes {stable_mosaic.version = 11 : i64} {
  func.func @_bottleneck_kernel(%arg0: i32, %arg1: memref<1x256x16xf32, #tpu.memory_space<vmem>>, %arg2: memref<16x128xbf16, #tpu.memory_space<vmem>>, %arg3: memref<1x128xf32, #tpu.memory_space<vmem>>, %arg4: memref<9x128x128xbf16, #tpu.memory_space<vmem>>, %arg5: memref<1x128xf32, #tpu.memory_space<vmem>>, %arg6: memref<128x16xbf16, #tpu.memory_space<vmem>>, %arg7: memref<1x16xf32, #tpu.memory_space<vmem>>, %arg8: memref<1x256x16xf32, #tpu.memory_space<vmem>>, %arg9: memref<304x128xf32, #tpu.memory_space<vmem>>) attributes {dimension_semantics = [#tpu.dimension_semantics<parallel>], iteration_bounds = array<i64: 2>, scalar_prefetch = 0 : i64, scratch_operands = 1 : i64, tpu.core_type = #tpu.core_type<tc>, window_params = [{transform_indices = @transform_0, window_bounds = array<i64: 1, 256, 16>}, {pipeline_mode = #tpu.pipeline_mode<synchronous>, transform_indices = @transform_1, window_bounds = array<i64: 16, 128>}, {pipeline_mode = #tpu.pipeline_mode<synchronous>, transform_indices = @transform_2, window_bounds = array<i64: 1, 128>}, {pipeline_mode = #tpu.pipeline_mode<synchronous>, transform_indices = @transform_3, window_bounds = array<i64: 9, 128, 128>}, {pipeline_mode = #tpu.pipeline_mode<synchronous>, transform_indices = @transform_4, window_bounds = array<i64: 1, 128>}, {pipeline_mode = #tpu.pipeline_mode<synchronous>, transform_indices = @transform_5, window_bounds = array<i64: 128, 16>}, {pipeline_mode = #tpu.pipeline_mode<synchronous>, transform_indices = @transform_6, window_bounds = array<i64: 1, 16>}, {transform_indices = @transform_7, window_bounds = array<i64: 1, 256, 16>}]} {
    %c0_i32 = arith.constant 0 : i32
    %0 = arith.cmpi eq, %arg0, %c0_i32 : i32
    %1 = arith.extui %0 : i1 to i32
    %c0_i32_0 = arith.constant 0 : i32
    %2 = arith.cmpi ne, %1, %c0_i32_0 : i32
    scf.if %2 {
      %cst_79 = arith.constant 0.000000e+00 : f32
      %139 = vector.broadcast %cst_79 : f32 to vector<24x128xf32>
      %c0_80 = arith.constant 0 : index
      %c0_81 = arith.constant 0 : index
      %140 = vector.load %arg9[%c0_80, %c0_81] : memref<304x128xf32, #tpu.memory_space<vmem>>, vector<24x128xf32>
      tpu.vector_store %arg9[%c0_80, %c0_81], %139 {strides = array<i32>} : memref<304x128xf32, #tpu.memory_space<vmem>>, vector<24x128xf32>,
      %cst_82 = arith.constant 0.000000e+00 : f32
      %141 = vector.broadcast %cst_82 : f32 to vector<24x128xf32>
      %c280 = arith.constant 280 : index
      %c0_83 = arith.constant 0 : index
      %142 = vector.load %arg9[%c280, %c0_83] : memref<304x128xf32, #tpu.memory_space<vmem>>, vector<24x128xf32>
      tpu.vector_store %arg9[%c280, %c0_83], %141 {strides = array<i32>} : memref<304x128xf32, #tpu.memory_space<vmem>>, vector<24x128xf32>,
    } else {
    }
    %c0 = arith.constant 0 : index
    %c0_1 = arith.constant 0 : index
    %c0_2 = arith.constant 0 : index
    %3 = vector.load %arg1[%c0, %c0_1, %c0_2] : memref<1x256x16xf32, #tpu.memory_space<vmem>>, vector<1x256x16xf32>
    %4 = vector.shape_cast %3 : vector<1x256x16xf32> to vector<256x16xf32>
    %5 = arith.truncf %4 : vector<256x16xf32> to vector<256x16xbf16>
    %c0_3 = arith.constant 0 : index
    %c0_4 = arith.constant 0 : index
    %6 = vector.load %arg2[%c0_3, %c0_4] : memref<16x128xbf16, #tpu.memory_space<vmem>>, vector<16x128xbf16>
    %cst = arith.constant dense<0.000000e+00> : vector<256x128xf32>
    %7 = tpu.matmul %5, %6, %cst {dimension_numbers = #tpu.dot_dimension_numbers<[1], [0], [0], [1], [0, 0, 1, 1], [], []>} : vector<256x16xbf16>, vector<16x128xbf16>, vector<256x128xf32> -> vector<256x128xf32>
    %c0_5 = arith.constant 0 : index
    %c0_6 = arith.constant 0 : index
    %8 = vector.load %arg3[%c0_5, %c0_6] : memref<1x128xf32, #tpu.memory_space<vmem>>, vector<1x128xf32>
    %9 = vector.broadcast %8 : vector<1x128xf32> to vector<256x128xf32>
    %10 = arith.addf %7, %9 : vector<256x128xf32>
    %cst_7 = arith.constant 0.000000e+00 : f32
    %11 = vector.broadcast %cst_7 : f32 to vector<256x128xf32>
    %12 = arith.maximumf %10, %11 : vector<256x128xf32>
    %c24 = arith.constant 24 : index
    %c0_8 = arith.constant 0 : index
    %13 = vector.load %arg9[%c24, %c0_8] : memref<304x128xf32, #tpu.memory_space<vmem>>, vector<256x128xf32>
    tpu.vector_store %arg9[%c24, %c0_8], %12 {strides = array<i32>} : memref<304x128xf32, #tpu.memory_space<vmem>>, vector<256x128xf32>,
    %14 = tpu.iota {dimensions = array<i32: 0>} : vector<256x1xi32>
    %c16_i32 = arith.constant 16 : i32
    %c0_i32_9 = arith.constant 0 : i32
    %15 = arith.cmpi eq, %c16_i32, %c0_i32_9 : i32
    %c1_i32 = arith.constant 1 : i32
    %16 = arith.select %15, %c1_i32, %c16_i32 : i32
    %17 = vector.broadcast %16 : i32 to vector<256x1xi32>
    %18 = arith.remsi %14, %17 : vector<256x1xi32>
    %c0_i32_10 = arith.constant 0 : i32
    %19 = vector.broadcast %c0_i32_10 : i32 to vector<256x1xi32>
    %20 = arith.cmpi ne, %18, %19 : vector<256x1xi32>
    %c0_i32_11 = arith.constant 0 : i32
    %21 = vector.broadcast %c0_i32_11 : i32 to vector<256x1xi32>
    %22 = arith.cmpi slt, %18, %21 : vector<256x1xi32>
    %c0_i32_12 = arith.constant 0 : i32
    %23 = arith.cmpi slt, %16, %c0_i32_12 : i32
    %24 = vector.broadcast %23 : i1 to vector<256x1xi1>
    %25 = vector.broadcast %24 : vector<256x1xi1> to vector<256x1xi1>
    %26 = arith.xori %22, %25 : vector<256x1xi1>
    %27 = arith.andi %26, %20 : vector<256x1xi1>
    %28 = vector.broadcast %16 : i32 to vector<256x1xi32>
    %29 = arith.addi %18, %28 : vector<256x1xi32>
    %30 = arith.select %27, %29, %18 : vector<256x1xi1>, vector<256x1xi32>
    %c7 = arith.constant 7 : index
    %c0_13 = arith.constant 0 : index
    %31 = vector.load %arg9[%c7, %c0_13] : memref<304x128xf32, #tpu.memory_space<vmem>>, vector<256x128xf32>
    %c0_i32_14 = arith.constant 0 : i32
    %32 = vector.broadcast %c0_i32_14 : i32 to vector<256x1xi32>
    %33 = arith.cmpi sgt, %30, %32 : vector<256x1xi32>
    %cst_15 = arith.constant 0.000000e+00 : f32
    %34 = vector.shape_cast %33 : vector<256x1xi1> to vector<256x1xi1>
    %35 = vector.broadcast %34 : vector<256x1xi1> to vector<256x128xi1>
    %36 = vector.broadcast %cst_15 : f32 to vector<256x128xf32>
    %37 = arith.select %35, %31, %36 : vector<256x128xi1>, vector<256x128xf32>
    %38 = arith.truncf %37 : vector<256x128xf32> to vector<256x128xbf16>
    %c0_16 = arith.constant 0 : index
    %c0_17 = arith.constant 0 : index
    %c0_18 = arith.constant 0 : index
    %39 = vector.load %arg4[%c0_16, %c0_17, %c0_18] : memref<9x128x128xbf16, #tpu.memory_space<vmem>>, vector<1x128x128xbf16>
    %40 = vector.shape_cast %39 : vector<1x128x128xbf16> to vector<128x128xbf16>
    %cst_19 = arith.constant dense<0.000000e+00> : vector<256x128xf32>
    %41 = tpu.matmul %38, %40, %cst_19 {dimension_numbers = #tpu.dot_dimension_numbers<[1], [0], [0], [1], [0, 0, 1, 1], [], []>} : vector<256x128xbf16>, vector<128x128xbf16>, vector<256x128xf32> -> vector<256x128xf32>
    %c8 = arith.constant 8 : index
    %c0_20 = arith.constant 0 : index
    %42 = vector.load %arg9[%c8, %c0_20] : memref<304x128xf32, #tpu.memory_space<vmem>>, vector<256x128xf32>
    %43 = arith.truncf %42 : vector<256x128xf32> to vector<256x128xbf16>
    %c1 = arith.constant 1 : index
    %c0_21 = arith.constant 0 : index
    %c0_22 = arith.constant 0 : index
    %44 = vector.load %arg4[%c1, %c0_21, %c0_22] : memref<9x128x128xbf16, #tpu.memory_space<vmem>>, vector<1x128x128xbf16>
    %45 = vector.shape_cast %44 : vector<1x128x128xbf16> to vector<128x128xbf16>
    %cst_23 = arith.constant dense<0.000000e+00> : vector<256x128xf32>
    %46 = tpu.matmul %43, %45, %cst_23 {dimension_numbers = #tpu.dot_dimension_numbers<[1], [0], [0], [1], [0, 0, 1, 1], [], []>} : vector<256x128xbf16>, vector<128x128xbf16>, vector<256x128xf32> -> vector<256x128xf32>
    %47 = arith.addf %41, %46 : vector<256x128xf32>
    %c9 = arith.constant 9 : index
    %c0_24 = arith.constant 0 : index
    %48 = vector.load %arg9[%c9, %c0_24] : memref<304x128xf32, #tpu.memory_space<vmem>>, vector<256x128xf32>
    %c15_i32 = arith.constant 15 : i32
    %49 = vector.broadcast %c15_i32 : i32 to vector<256x1xi32>
    %50 = arith.cmpi slt, %30, %49 : vector<256x1xi32>
    %cst_25 = arith.constant 0.000000e+00 : f32
    %51 = vector.shape_cast %50 : vector<256x1xi1> to vector<256x1xi1>
    %52 = vector.broadcast %51 : vector<256x1xi1> to vector<256x128xi1>
    %53 = vector.broadcast %cst_25 : f32 to vector<256x128xf32>
    %54 = arith.select %52, %48, %53 : vector<256x128xi1>, vector<256x128xf32>
    %55 = arith.truncf %54 : vector<256x128xf32> to vector<256x128xbf16>
    %c2 = arith.constant 2 : index
    %c0_26 = arith.constant 0 : index
    %c0_27 = arith.constant 0 : index
    %56 = vector.load %arg4[%c2, %c0_26, %c0_27] : memref<9x128x128xbf16, #tpu.memory_space<vmem>>, vector<1x128x128xbf16>
    %57 = vector.shape_cast %56 : vector<1x128x128xbf16> to vector<128x128xbf16>
    %cst_28 = arith.constant dense<0.000000e+00> : vector<256x128xf32>
    %58 = tpu.matmul %55, %57, %cst_28 {dimension_numbers = #tpu.dot_dimension_numbers<[1], [0], [0], [1], [0, 0, 1, 1], [], []>} : vector<256x128xbf16>, vector<128x128xbf16>, vector<256x128xf32> -> vector<256x128xf32>
    %59 = arith.addf %47, %58 : vector<256x128xf32>
    %c23 = arith.constant 23 : index
    %c0_29 = arith.constant 0 : index
    %60 = vector.load %arg9[%c23, %c0_29] : memref<304x128xf32, #tpu.memory_space<vmem>>, vector<256x128xf32>
    %c0_i32_30 = arith.constant 0 : i32
    %61 = vector.broadcast %c0_i32_30 : i32 to vector<256x1xi32>
    %62 = arith.cmpi sgt, %30, %61 : vector<256x1xi32>
    %cst_31 = arith.constant 0.000000e+00 : f32
    %63 = vector.shape_cast %62 : vector<256x1xi1> to vector<256x1xi1>
    %64 = vector.broadcast %63 : vector<256x1xi1> to vector<256x128xi1>
    %65 = vector.broadcast %cst_31 : f32 to vector<256x128xf32>
    %66 = arith.select %64, %60, %65 : vector<256x128xi1>, vector<256x128xf32>
    %67 = arith.truncf %66 : vector<256x128xf32> to vector<256x128xbf16>
    %c3 = arith.constant 3 : index
    %c0_32 = arith.constant 0 : index
    %c0_33 = arith.constant 0 : index
    %68 = vector.load %arg4[%c3, %c0_32, %c0_33] : memref<9x128x128xbf16, #tpu.memory_space<vmem>>, vector<1x128x128xbf16>
    %69 = vector.shape_cast %68 : vector<1x128x128xbf16> to vector<128x128xbf16>
    %cst_34 = arith.constant dense<0.000000e+00> : vector<256x128xf32>
    %70 = tpu.matmul %67, %69, %cst_34 {dimension_numbers = #tpu.dot_dimension_numbers<[1], [0], [0], [1], [0, 0, 1, 1], [], []>} : vector<256x128xbf16>, vector<128x128xbf16>, vector<256x128xf32> -> vector<256x128xf32>
    %71 = arith.addf %59, %70 : vector<256x128xf32>
    %c24_35 = arith.constant 24 : index
    %c0_36 = arith.constant 0 : index
    %72 = vector.load %arg9[%c24_35, %c0_36] : memref<304x128xf32, #tpu.memory_space<vmem>>, vector<256x128xf32>
    %73 = arith.truncf %72 : vector<256x128xf32> to vector<256x128xbf16>
    %c4 = arith.constant 4 : index
    %c0_37 = arith.constant 0 : index
    %c0_38 = arith.constant 0 : index
    %74 = vector.load %arg4[%c4, %c0_37, %c0_38] : memref<9x128x128xbf16, #tpu.memory_space<vmem>>, vector<1x128x128xbf16>
    %75 = vector.shape_cast %74 : vector<1x128x128xbf16> to vector<128x128xbf16>
    %cst_39 = arith.constant dense<0.000000e+00> : vector<256x128xf32>
    %76 = tpu.matmul %73, %75, %cst_39 {dimension_numbers = #tpu.dot_dimension_numbers<[1], [0], [0], [1], [0, 0, 1, 1], [], []>} : vector<256x128xbf16>, vector<128x128xbf16>, vector<256x128xf32> -> vector<256x128xf32>
    %77 = arith.addf %71, %76 : vector<256x128xf32>
    %c25 = arith.constant 25 : index
    %c0_40 = arith.constant 0 : index
    %78 = vector.load %arg9[%c25, %c0_40] : memref<304x128xf32, #tpu.memory_space<vmem>>, vector<256x128xf32>
    %c15_i32_41 = arith.constant 15 : i32
    %79 = vector.broadcast %c15_i32_41 : i32 to vector<256x1xi32>
    %80 = arith.cmpi slt, %30, %79 : vector<256x1xi32>
    %cst_42 = arith.constant 0.000000e+00 : f32
    %81 = vector.shape_cast %80 : vector<256x1xi1> to vector<256x1xi1>
    %82 = vector.broadcast %81 : vector<256x1xi1> to vector<256x128xi1>
    %83 = vector.broadcast %cst_42 : f32 to vector<256x128xf32>
    %84 = arith.select %82, %78, %83 : vector<256x128xi1>, vector<256x128xf32>
    %85 = arith.truncf %84 : vector<256x128xf32> to vector<256x128xbf16>
    %c5 = arith.constant 5 : index
    %c0_43 = arith.constant 0 : index
    %c0_44 = arith.constant 0 : index
    %86 = vector.load %arg4[%c5, %c0_43, %c0_44] : memref<9x128x128xbf16, #tpu.memory_space<vmem>>, vector<1x128x128xbf16>
    %87 = vector.shape_cast %86 : vector<1x128x128xbf16> to vector<128x128xbf16>
    %cst_45 = arith.constant dense<0.000000e+00> : vector<256x128xf32>
    %88 = tpu.matmul %85, %87, %cst_45 {dimension_numbers = #tpu.dot_dimension_numbers<[1], [0], [0], [1], [0, 0, 1, 1], [], []>} : vector<256x128xbf16>, vector<128x128xbf16>, vector<256x128xf32> -> vector<256x128xf32>
    %89 = arith.addf %77, %88 : vector<256x128xf32>
    %c39 = arith.constant 39 : index
    %c0_46 = arith.constant 0 : index
    %90 = vector.load %arg9[%c39, %c0_46] : memref<304x128xf32, #tpu.memory_space<vmem>>, vector<256x128xf32>
    %c0_i32_47 = arith.constant 0 : i32
    %91 = vector.broadcast %c0_i32_47 : i32 to vector<256x1xi32>
    %92 = arith.cmpi sgt, %30, %91 : vector<256x1xi32>
    %cst_48 = arith.constant 0.000000e+00 : f32
    %93 = vector.shape_cast %92 : vector<256x1xi1> to vector<256x1xi1>
    %94 = vector.broadcast %93 : vector<256x1xi1> to vector<256x128xi1>
    %95 = vector.broadcast %cst_48 : f32 to vector<256x128xf32>
    %96 = arith.select %94, %90, %95 : vector<256x128xi1>, vector<256x128xf32>
    %97 = arith.truncf %96 : vector<256x128xf32> to vector<256x128xbf16>
    %c6 = arith.constant 6 : index
    %c0_49 = arith.constant 0 : index
    %c0_50 = arith.constant 0 : index
    %98 = vector.load %arg4[%c6, %c0_49, %c0_50] : memref<9x128x128xbf16, #tpu.memory_space<vmem>>, vector<1x128x128xbf16>
    %99 = vector.shape_cast %98 : vector<1x128x128xbf16> to vector<128x128xbf16>
    %cst_51 = arith.constant dense<0.000000e+00> : vector<256x128xf32>
    %100 = tpu.matmul %97, %99, %cst_51 {dimension_numbers = #tpu.dot_dimension_numbers<[1], [0], [0], [1], [0, 0, 1, 1], [], []>} : vector<256x128xbf16>, vector<128x128xbf16>, vector<256x128xf32> -> vector<256x128xf32>
    %101 = arith.addf %89, %100 : vector<256x128xf32>
    %c40 = arith.constant 40 : index
    %c0_52 = arith.constant 0 : index
    %102 = vector.load %arg9[%c40, %c0_52] : memref<304x128xf32, #tpu.memory_space<vmem>>, vector<256x128xf32>
    %103 = arith.truncf %102 : vector<256x128xf32> to vector<256x128xbf16>
    %c7_53 = arith.constant 7 : index
    %c0_54 = arith.constant 0 : index
    %c0_55 = arith.constant 0 : index
    %104 = vector.load %arg4[%c7_53, %c0_54, %c0_55] : memref<9x128x128xbf16, #tpu.memory_space<vmem>>, vector<1x128x128xbf16>
    %105 = vector.shape_cast %104 : vector<1x128x128xbf16> to vector<128x128xbf16>
    %cst_56 = arith.constant dense<0.000000e+00> : vector<256x128xf32>
    %106 = tpu.matmul %103, %105, %cst_56 {dimension_numbers = #tpu.dot_dimension_numbers<[1], [0], [0], [1], [0, 0, 1, 1], [], []>} : vector<256x128xbf16>, vector<128x128xbf16>, vector<256x128xf32> -> vector<256x128xf32>
    %107 = arith.addf %101, %106 : vector<256x128xf32>
    %c41 = arith.constant 41 : index
    %c0_57 = arith.constant 0 : index
    %108 = vector.load %arg9[%c41, %c0_57] : memref<304x128xf32, #tpu.memory_space<vmem>>, vector<256x128xf32>
    %c15_i32_58 = arith.constant 15 : i32
    %109 = vector.broadcast %c15_i32_58 : i32 to vector<256x1xi32>
    %110 = arith.cmpi slt, %30, %109 : vector<256x1xi32>
    %cst_59 = arith.constant 0.000000e+00 : f32
    %111 = vector.shape_cast %110 : vector<256x1xi1> to vector<256x1xi1>
    %112 = vector.broadcast %111 : vector<256x1xi1> to vector<256x128xi1>
    %113 = vector.broadcast %cst_59 : f32 to vector<256x128xf32>
    %114 = arith.select %112, %108, %113 : vector<256x128xi1>, vector<256x128xf32>
    %115 = arith.truncf %114 : vector<256x128xf32> to vector<256x128xbf16>
    %c8_60 = arith.constant 8 : index
    %c0_61 = arith.constant 0 : index
    %c0_62 = arith.constant 0 : index
    %116 = vector.load %arg4[%c8_60, %c0_61, %c0_62] : memref<9x128x128xbf16, #tpu.memory_space<vmem>>, vector<1x128x128xbf16>
    %117 = vector.shape_cast %116 : vector<1x128x128xbf16> to vector<128x128xbf16>
    %cst_63 = arith.constant dense<0.000000e+00> : vector<256x128xf32>
    %118 = tpu.matmul %115, %117, %cst_63 {dimension_numbers = #tpu.dot_dimension_numbers<[1], [0], [0], [1], [0, 0, 1, 1], [], []>} : vector<256x128xbf16>, vector<128x128xbf16>, vector<256x128xf32> -> vector<256x128xf32>
    %119 = arith.addf %107, %118 : vector<256x128xf32>
    %c0_64 = arith.constant 0 : index
    %c0_65 = arith.constant 0 : index
    %120 = vector.load %arg5[%c0_64, %c0_65] : memref<1x128xf32, #tpu.memory_space<vmem>>, vector<1x128xf32>
    %121 = vector.broadcast %120 : vector<1x128xf32> to vector<256x128xf32>
    %122 = arith.addf %119, %121 : vector<256x128xf32>
    %cst_66 = arith.constant 0.000000e+00 : f32
    %123 = vector.broadcast %cst_66 : f32 to vector<256x128xf32>
    %124 = arith.maximumf %122, %123 : vector<256x128xf32>
    %125 = arith.truncf %124 : vector<256x128xf32> to vector<256x128xbf16>
    %c0_67 = arith.constant 0 : index
    %c0_68 = arith.constant 0 : index
    %126 = vector.load %arg6[%c0_67, %c0_68] : memref<128x16xbf16, #tpu.memory_space<vmem>>, vector<128x16xbf16>
    %cst_69 = arith.constant dense<0.000000e+00> : vector<256x16xf32>
    %127 = tpu.matmul %125, %126, %cst_69 {dimension_numbers = #tpu.dot_dimension_numbers<[1], [0], [0], [1], [0, 0, 1, 1], [], []>} : vector<256x128xbf16>, vector<128x16xbf16>, vector<256x16xf32> -> vector<256x16xf32>
    %c0_70 = arith.constant 0 : index
    %c0_71 = arith.constant 0 : index
    %128 = vector.load %arg7[%c0_70, %c0_71] : memref<1x16xf32, #tpu.memory_space<vmem>>, vector<1x16xf32>
    %129 = vector.broadcast %128 : vector<1x16xf32> to vector<256x16xf32>
    %130 = arith.addf %127, %129 : vector<256x16xf32>
    %c0_72 = arith.constant 0 : index
    %c0_73 = arith.constant 0 : index
    %c0_74 = arith.constant 0 : index
    %131 = vector.load %arg1[%c0_72, %c0_73, %c0_74] : memref<1x256x16xf32, #tpu.memory_space<vmem>>, vector<1x256x16xf32>
    %132 = vector.shape_cast %131 : vector<1x256x16xf32> to vector<256x16xf32>
    %133 = arith.addf %130, %132 : vector<256x16xf32>
    %cst_75 = arith.constant 0.000000e+00 : f32
    %134 = vector.broadcast %cst_75 : f32 to vector<256x16xf32>
    %135 = arith.maximumf %133, %134 : vector<256x16xf32>
    %c0_76 = arith.constant 0 : index
    %c0_77 = arith.constant 0 : index
    %c0_78 = arith.constant 0 : index
    %136 = vector.load %arg8[%c0_76, %c0_77, %c0_78] : memref<1x256x16xf32, #tpu.memory_space<vmem>>, vector<1x256x16xf32>
    %137 = vector.shape_cast %136 : vector<1x256x16xf32> to vector<256x16xf32>
    %138 = vector.shape_cast %135 : vector<256x16xf32> to vector<1x256x16xf32>
    tpu.vector_store %arg8[%c0_76, %c0_77, %c0_78], %138 {strides = array<i32>} : memref<1x256x16xf32, #tpu.memory_space<vmem>>, vector<1x256x16xf32>,
    return
  }
  func.func @transform_0(%arg0: i32) -> (i32, i32, i32) {
    %c0_i32 = arith.constant 0 : i32
    %c0_i32_0 = arith.constant 0 : i32
    %c0_i32_1 = arith.constant 0 : i32
    return %arg0, %c0_i32, %c0_i32_0 : i32, i32, i32
  }
  func.func @transform_1(%arg0: i32) -> (i32, i32) {
    %c0_i32 = arith.constant 0 : i32
    %c0_i32_0 = arith.constant 0 : i32
    %c0_i32_1 = arith.constant 0 : i32
    return %c0_i32, %c0_i32_0 : i32, i32
  }
  func.func @transform_2(%arg0: i32) -> (i32, i32) {
    %c0_i32 = arith.constant 0 : i32
    %c0_i32_0 = arith.constant 0 : i32
    %c0_i32_1 = arith.constant 0 : i32
    return %c0_i32, %c0_i32_0 : i32, i32
  }
  func.func @transform_3(%arg0: i32) -> (i32, i32, i32) {
    %c0_i32 = arith.constant 0 : i32
    %c0_i32_0 = arith.constant 0 : i32
    %c0_i32_1 = arith.constant 0 : i32
    %c0_i32_2 = arith.constant 0 : i32
    return %c0_i32, %c0_i32_0, %c0_i32_1 : i32, i32, i32
  }
  func.func @transform_4(%arg0: i32) -> (i32, i32) {
    %c0_i32 = arith.constant 0 : i32
    %c0_i32_0 = arith.constant 0 : i32
    %c0_i32_1 = arith.constant 0 : i32
    return %c0_i32, %c0_i32_0 : i32, i32
  }
  func.func @transform_5(%arg0: i32) -> (i32, i32) {
    %c0_i32 = arith.constant 0 : i32
    %c0_i32_0 = arith.constant 0 : i32
    %c0_i32_1 = arith.constant 0 : i32
    return %c0_i32, %c0_i32_0 : i32, i32
  }
  func.func @transform_6(%arg0: i32) -> (i32, i32) {
    %c0_i32 = arith.constant 0 : i32
    %c0_i32_0 = arith.constant 0 : i32
    %c0_i32_1 = arith.constant 0 : i32
    return %c0_i32, %c0_i32_0 : i32, i32
  }
  func.func @transform_7(%arg0: i32) -> (i32, i32, i32) {
    %c0_i32 = arith.constant 0 : i32
    %c0_i32_0 = arith.constant 0 : i32
    %c0_i32_1 = arith.constant 0 : i32
    return %arg0, %c0_i32, %c0_i32_0 : i32, i32, i32
  }
}

</mosaic_0001>

<bundles_post_ra>
// kernel: bottleneck_forward.1
= control target key start
LH: loop header
LB: loop body
LE: loop exit
PB: predicated region body
PF: predicated region fallthrough
CT: control target
= control target key end

     0   :  { %s6063_s24 = smov 0   ;;  %s7863_s0 = inlined_call_operand.vmem [shape: f32[2,256,16], index: 0, kind: input, shape index: {}]   ;;  %s7864_s1 = inlined_call_operand.vmem [shape: bf16[16,128], index: 1, kind: input, shape index: {}]   ;;  %s7865_s2 = inlined_call_operand.vmem [shape: f32[1,128], index: 2, kind: input, shape index: {}]   ;;  %s7866_s3 = inlined_call_operand.vmem [shape: bf16[9,128,128], index: 3, kind: input, shape index: {}]   ;;  %s7867_s4 = inlined_call_operand.vmem [shape: f32[1,128], index: 4, kind: input, shape index: {}]   ;;  %s7868_s5 = inlined_call_operand.vmem [shape: bf16[128,16], index: 5, kind: input, shape index: {}]   ;;  %s7869_s6 = inlined_call_operand.vmem [shape: f32[1,16], index: 6, kind: input, shape index: {}]   ;;  %s7870_s7 = inlined_call_operand.vmem [shape: f32[2,256,16], index: 7, kind: output, shape index: {}]  }
   0x1 LB: > { %s4619_s25 = sadd.s32 4294967295, %s6019_s24   ;;  %p4623_p0 = scmp.ge.s32.totalorder %s6019_s24, 1  ;;  %s6019_s24 = sphi %s6063_s24, %s17_s24  }
   0x2   : > { %p237_p1 = scmp.lt.s32.totalorder %s6019_s24, 3 }
   0x4   : > { %p238_p2 = pnand %p4623_p0, %p237_p1 }
   0x6   : > { %241 = sbr.rel (%p238_p2) target bundleno = 960 (0x3c0), region = 48 }
   0xb   : > { %p269_p3 = scmp.lt.s32.totalorder %s4619_s25, 1  ;;  %p4628_p4 = scmp.ne.s32.totalorder %s4619_s25, 0 }
   0xd   : > { %s270_s26 = scalar_select %p269_p3, %s4619_s25, 1 }
   0xe   : > { %283 = sbr.rel (%p4628_p4) target bundleno = 23 (0x17), region = 52 }
   0xf   : > { %s5147_s27 = sshll.u32 %s270_s26, 8 }
  0x10   : > { %s6074_s30 = scalar_lea.vmem %s7863_s0, %s5147_s27  ;;  %s6079_s10 = scalar_lea.vmem %s7870_s7, %s5147_s27 }
  0x13   : > { %v6021_v0 = vmov 0.0  }
  0x14   : > { %284 = vst [vmem:[#allocation2] sm:$0xff] %v6021_v0  ;;  %285 = vst [vmem:[#allocation2 + $0x8] sm:$0xff] %v6021_v0 }
  0x15   : > { %286 = vst [vmem:[#allocation2 + $0x10] sm:$0xff] %v6021_v0  ;;  %287 = vst [vmem:[#allocation2 + $0x118] sm:$0xff] %v6021_v0 }
  0x16   : > { %288 = vst [vmem:[#allocation2 + $0x120] sm:$0xff] %v6021_v0  ;;  %289 = vst [vmem:[#allocation2 + $0x128] sm:$0xff] %v6021_v0 }
  0x17 PF: > { %v5932_v1 = vld [vmem:[%s7864_s1] sm:$0xff]   ;;  %v291_v3 = vld [vmem:[%s6074_s30 + $0x8] sm:$0xff]  ;;  %vm7871_vm0 = vcmask 130048   ;;  %v292_v4 = vld [vmem:[%s6074_s30 + $0x10] sm:$0xff]  ;;  %vm7872_vm2 = vmmov 1  }
  0x18   : > { %v290_v2 = vld [vmem:[%s6074_s30] sm:$0xff]  ;;  %5406 = vmatprep.subr.bf16.mxu0 %v5932_v1  ;;  %v293_v6 = vld [vmem:[%s6074_s30 + $0x18] sm:$0xff]  ;;  %v295_v8 = vld [vmem:[%s6074_s30 + $0x28] sm:$0xff]  ;;  %5920 = vmatprep.subr.bf16.mxu1 %v5932_v1 }
  0x19   : > { %v322_v5 = vpack.c.bf16 %v291_v3, %v290_v2  ;;  %v294_v7 = vld [vmem:[%s6074_s30 + $0x20] sm:$0xff]  ;;  %5407 = vmatpush3.bf16.msra.mxu0 %v5932_v1  ;;  %v323_v9 = vpack.c.bf16 %v293_v6, %v292_v4  ;;  %5921 = vmatpush3.bf16.msra.mxu1 %v5932_v1  ;;  %v307_v12 = vld [vmem:[%s6074_s30 + $0x88] sm:$0xff]  ;;  %v308_v13 = vld [vmem:[%s6074_s30 + $0x90] sm:$0xff]  ;;  %v627_v4 = vlaneseq }
  0x1a   : > { %v324_v10 = vpack.c.bf16 %v295_v8, %v294_v7  ;;  %v306_v11 = vld [vmem:[%s6074_s30 + $0x80] sm:$0xff]  ;;  %v309_v15 = vld [vmem:[%s6074_s30 + $0x98] sm:$0xff]  ;;  %v296_v16 = vld [vmem:[%s6074_s30 + $0x30] sm:$0xff] }
  0x1b   : > { %5408 = vmatprep.mubr.msk.bf16.mxu0 %vm7871_vm0, %v322_v5  ;;  %v330_v14 = vpack.c.bf16 %v307_v12, %v306_v11  ;;  %v297_v17 = vld [vmem:[%s6074_s30 + $0x38] sm:$0xff]  ;;  %v331_v18 = vpack.c.bf16 %v309_v15, %v308_v13  ;;  %v310_v19 = vld [vmem:[%s6074_s30 + $0xa0] sm:$0xff]  ;;  %v299_v21 = vld [vmem:[%s6074_s30 + $0x48] sm:$0xff]  ;;  %v6177_v5 = vshrl.u32 %v627_v4, 7  ;;  %v7908_v11 = vmov 0 }
  0x1c   : > { %5409 = vmatmul.mubr.msk.bf16.vlgmr.msra.gmra.mxu0 %vm7871_vm0, %v323_v9  ;;  %v298_v20 = vld [vmem:[%s6074_s30 + $0x40] sm:$0xff]  ;;  %v311_v22 = vld [vmem:[%s6074_s30 + $0xa8] sm:$0xff]  ;;  %v325_v24 = vpack.c.bf16 %v297_v17, %v296_v16  ;;  %v312_v25 = vld [vmem:[%s6074_s30 + $0xb0] sm:$0xff] }
  0x1d   : > { %5412 = vmatprep.mubr.msk.bf16.mxu0 %vm7871_vm0, %v324_v10  ;;  %5424 = vmatprep.mubr.msk.bf16.mxu1 %vm7871_vm0, %v330_v14  ;;  %v332_v23 = vpack.c.bf16 %v311_v22, %v310_v19  ;;  %v313_v26 = vld [vmem:[%s6074_s30 + $0xb8] sm:$0xff]  ;;  %v326_v27 = vpack.c.bf16 %v299_v21, %v298_v20  ;;  %v314_v28 = vld [vmem:[%s6074_s30 + $0xc0] sm:$0xff]  ;;  %v315_v29 = vld [vmem:[%s6074_s30 + $0xc8] sm:$0xff]  ;;  %v664_v7 = vand.u32 15, %v6177_v5 }
  0x1e   : > { %5425 = vmatmul.mubr.msk.bf16.vlgmr.msra.gmra.mxu1 %vm7871_vm0, %v331_v18  ;;  %v5933_v30 = vld [vmem:[%s7866_s3 + $0x78] sm:$0xff]   ;;  %v300_v31 = vld [vmem:[%s6074_s30 + $0x50] sm:$0xff]  ;;  %v333_v33 = vpack.c.bf16 %v313_v26, %v312_v25  ;;  %v302_v35 = vld [vmem:[%s6074_s30 + $0x60] sm:$0xff]  ;;  %v334_v37 = vpack.c.bf16 %v315_v29, %v314_v28  ;;  %v630_v29 = vadd.s32 16, %v6177_v5 }
  0x1f   : > { %5428 = vmatprep.mubr.msk.bf16.mxu1 %vm7871_vm0, %v332_v23  ;;  %v301_v32 = vld [vmem:[%s6074_s30 + $0x58] sm:$0xff]  ;;  %v303_v36 = vld [vmem:[%s6074_s30 + $0x68] sm:$0xff]  ;;  %5440 = vmatprep.subr.bf16.mxu1 %v5933_v30  ;;  %v5935_v38 = vld [vmem:[%s7866_s3 + $0x70] sm:$0xff]   ;;  %vm1076_vm1 = vcmp.gt.s32.totalorder %v664_v7, 0  ;;  %v636_v7 = vadd.s32 64, %v6177_v5 }
  0x20   : > { %v5934_v34 = vld [vmem:[%s7866_s3 + $0x38] sm:$0xff]   ;;  %5441 = vmatpush3.bf16.msra.mxu1 %v5933_v30  ;;  %v5936_v39 = vld [vmem:[%s7866_s3 + $0x30] sm:$0xff]   ;;  %v5937_v42 = vld [vmem:[%s7866_s3 + $0x68] sm:$0xff]   ;;  %v327_v46 = vpack.c.bf16 %v301_v32, %v300_v31  ;;  %v328_v47 = vpack.c.bf16 %v303_v36, %v302_v35  ;;  %v632_v36 = vadd.s32 32, %v6177_v5 }
  0x21   : > { %v316_v40 = vld [vmem:[%s6074_s30 + $0xd0] sm:$0xff]  ;;  %v317_v41 = vld [vmem:[%s6074_s30 + $0xd8] sm:$0xff]  ;;  %5488 = vmatprep.subr.bf16.mxu0 %v5934_v34  ;;  %5442 = vmatprep.subr.bf16.mxu1 %v5935_v38  ;;  %v318_v43 = vld [vmem:[%s6074_s30 + $0xe0] sm:$0xff] }
  0x22   : > { %v319_v44 = vld [vmem:[%s6074_s30 + $0xe8] sm:$0xff]  ;;  %5489 = vmatpush3.bf16.msra.mxu0 %v5934_v34  ;;  %v304_v48 = vld [vmem:[%s6074_s30 + $0x70] sm:$0xff]  ;;  %v305_v49 = vld [vmem:[%s6074_s30 + $0x78] sm:$0xff]  ;;  %v335_v50 = vpack.c.bf16 %v317_v41, %v316_v40  ;;  %v678_v41 = vand.u32 15, %v630_v29  ;;  %v7916_v29 = vmov 0 }
  0x23   : > { %v5938_v45 = vld [vmem:[%s7866_s3 + $0x28] sm:$0xff]   ;;  %5490 = vmatprep.subr.bf16.mxu0 %v5936_v39  ;;  %v336_v51 = vpack.c.bf16 %v319_v44, %v318_v43  ;;  %v320_v52 = vld [vmem:[%s6074_s30 + $0xf0] sm:$0xff]  ;;  %v321_v53 = vld [vmem:[%s6074_s30 + $0xf8] sm:$0xff]  ;;  %v329_v54 = vpack.c.bf16 %v305_v49, %v304_v48 }
  0x24   : > { %5413 = vmatmul.mubr.msk.bf16.gmra.mxu0 %vm7871_vm0, %v325_v24  ;;  %5443 = vmatpush3.bf16.msra.mxu1 %v5935_v38  ;;  %v337_v55 = vpack.c.bf16 %v321_v53, %v320_v52  ;;  %v5939_v56 = vld [vmem:[%s7866_s3 + $0x60] sm:$0xff]   ;;  %v5941_v57 = vld [vmem:[%s7866_s3 + $0x58] sm:$0xff]   ;;  %v5943_v59 = vld [vmem:[%s7866_s3 + $0x50] sm:$0xff]   ;;  %vm6246_vm4 = vcmp.gt.s32.totalorder %v678_v41, 0 }
  0x25   : > { %5416 = vmatprep.mubr.msk.bf16.mxu0 %vm7871_vm0, %v326_v27  ;;  %5444 = vmatprep.subr.bf16.mxu1 %v5937_v42  ;;  %v5940_v58 = vld [vmem:[%s7866_s3 + $0x20] sm:$0xff]   ;;  %v5942_v60 = vld [vmem:[%s7866_s3 + $0x18] sm:$0xff]   ;;  %v5945_v61 = vld [vmem:[%s7866_s3 + $0x48] sm:$0xff]  }
  0x26   : > { %5429 = vmatmul.mubr.msk.bf16.gmra.mxu1 %vm7871_vm0, %v333_v33  ;;  %5491 = vmatpush3.bf16.msra.mxu0 %v5936_v39  ;;  %v5944_v62 = vld [vmem:[%s7866_s3 + $0x10] sm:$0xff]   ;;  %v5947_v63 = vld [vmem:[%s7866_s3 + $0x40] sm:$0xff]   ;;  %v1236_v0 = vld [vmem:[#allocation2 + $0x8] sm:$0xff] }
  0x27   : > { %5432 = vmatprep.mubr.msk.bf16.mxu1 %vm7871_vm0, %v334_v37  ;;  %5492 = vmatprep.subr.bf16.mxu0 %v5938_v45  ;;  %v1237_v1 = vld [vmem:[#allocation2 + $0x10] sm:$0xff]  ;;  %v5946_v3 = vld [vmem:[%s7866_s3 + $0x8] sm:$0xff]   ;;  %v5948_v6 = vld [vmem:[%s7866_s3] sm:$0xff]  }
  0x28   : > { %5445 = vmatpush3.bf16.msra.mxu1 %v5937_v42  ;;  %v1268_v2 = vpack.c.bf16 %v1237_v1, %v1236_v0  ;;  %v1044_v8 = vld [vmem:[#allocation2 + $0x7] sm:$0xff]  ;;  %v1045_v9 = vld [vmem:[#allocation2 + $0xf] sm:$0xff]  ;;  %vm6184_vm3 = vmpackc.low %vm7872_vm2, %vm1076_vm1 }
  0x29   : > { %5446 = vmatprep.subr.bf16.mxu1 %v5939_v56  ;;  %v4680_v10 = vpack.c.bf16 %v1045_v9, %v1044_v8  ;;  %v7909_v11 = vsel %vm6184_vm3, 4294967295, %v7908_v11  ;;  %v5949_v12 = vld [vmem:[%s7866_s3 + $0xb8] sm:$0xff]   ;;  %v6202_v14 = vld [vmem:[%s7865_s2] ss:$0 sm:$0xff]  ;;  %v5950_v48 = vld [vmem:[%s7866_s3 + $0xb0] sm:$0xff]  }
  0x2a   : > { %5493 = vmatpush3.bf16.msra.mxu0 %v5938_v45  ;;  %v6196_v13 = vld [vmem:[%s7866_s3 + $0xf8] sm:$0xff]   ;;  %v5951_v1 = vld [vmem:[%s7866_s3 + $0xa8] sm:$0xff]   ;;  %vm6278_vm6 = vmpackc.low %vm7872_vm2, %vm6246_vm4 }
  0x2b   : > { %5494 = vmatprep.subr.bf16.mxu0 %v5940_v58 }
  0x2c   : > { %5417 = vmatmul.mubr.msk.bf16.gmra.mxu0 %vm7871_vm0, %v327_v46  ;;  %5447 = vmatpush3.bf16.msra.mxu1 %v5939_v56 }
  0x2d   : > { %5420 = vmatprep.mubr.msk.bf16.mxu0 %vm7871_vm0, %v328_v47  ;;  %5448 = vmatprep.subr.bf16.mxu1 %v5941_v57 }
  0x2e   : > { %5433 = vmatmul.mubr.msk.bf16.gmra.mxu1 %vm7871_vm0, %v335_v50  ;;  %5495 = vmatpush3.bf16.msra.mxu0 %v5940_v58 }
  0x2f   : > { %5436 = vmatprep.mubr.msk.bf16.mxu1 %vm7871_vm0, %v336_v51  ;;  %5496 = vmatprep.subr.bf16.mxu0 %v5942_v60  ;;  %v692_v51 = vand.u32 15, %v632_v36  ;;  %v720_v36 = vand.u32 15, %v636_v7  ;;  %v7922_v7 = vmov 0 }
  0x30   : > { %5449 = vmatpush3.bf16.msra.mxu1 %v5941_v57 }
  0x31   : > { %5450 = vmatprep.subr.bf16.mxu1 %v5943_v59  ;;  %vm6261_vm5 = vcmp.gt.s32.totalorder %v692_v51, 0  ;;  %v638_v51 = vadd.s32 80, %v6177_v5  ;;  %vm6342_vm9 = vcmp.gt.s32.totalorder %v720_v36, 0 }
  0x32   : > { %5497 = vmatpush3.bf16.msra.mxu0 %v5942_v60  ;;  %vm6297_vm7 = vmpackc.low %vm7872_vm2, %vm6261_vm5 }
  0x33   : > { %5498 = vmatprep.subr.bf16.mxu0 %v5944_v62  ;;  %v7917_v29 = vsel %vm6297_vm7, 4294967295, %v7916_v29  ;;  %vm6385_vm11 = vmpackc.low %vm7872_vm2, %vm6342_vm9 }
  0x34   : > { %5421 = vmatmul.mubr.msk.bf16.gmra.mxu0 %vm7871_vm0, %v329_v54  ;;  %5451 = vmatpush3.bf16.msra.mxu1 %v5943_v59 }
  0x35   : > { %5452 = vmatprep.subr.bf16.mxu1 %v5945_v61  ;;  %5504 = vmatprep.mubr.msk.bf16.mxu0 %vm6184_vm3, %v4680_v10 }
  0x36   : > { %5437 = vmatmul.mubr.msk.bf16.gmra.mxu1 %vm7871_vm0, %v337_v55  ;;  %5499 = vmatpush3.bf16.msra.mxu0 %v5944_v62 }
  0x37   : > { %5456 = vmatprep.mubr.bf16.mxu1 %v1268_v2  ;;  %5500 = vmatprep.subr.bf16.mxu0 %v5946_v3 }
  0x38   : > { %5453 = vmatpush3.bf16.msra.mxu1 %v5945_v61  ;;  %v634_v61 = vadd.s32 48, %v6177_v5 }
  0x39   : > { %5454 = vmatprep.subr.bf16.mxu1 %v5947_v63 }
  0x3a   : > { %5501 = vmatpush3.bf16.msra.mxu0 %v5946_v3 }
  0x3b   : > { %5502 = vmatprep.subr.bf16.mxu0 %v5948_v6 }
  0x3c   : > { %5455 = vmatpush3.bf16.msra.mxu1 %v5947_v63 }
  0x3d   : > { %5536 = vmatprep.subr.bf16.mxu1 %v5949_v12 }
  0x3e   : > { %5503 = vmatpush3.bf16.msra.mxu0 %v5948_v6 }
  0x3f   : > { %5584 = vmatprep.subr.bf16.mxu0 %v6196_v13 }
  0xdc   : > { %v5410_v15 = vpop.f32.mrf.mxu0 }
  0xdd   : > { %v445_v16 = vadd.f32 %v5410_v15, %v6202_v14 }
  0xde   : > { %v436_v17 = vpop.f32.mrf.mxu0  ;;  %v5426_v20 = vpop.f32.mrf.mxu1 }
  0xdf   : > { %v565_v18 = vmax.f32 %v445_v16, 0.0  ;;  %v437_v19 = vadd.f32 %v6202_v14, %v436_v17  ;;  %v6207_v22 = vadd.f32 %v5426_v20, %v6202_v14  ;;  %v706_v20 = vand.u32 15, %v634_v61 }
  0xe0   : > { %v5411_v21 = vpop.f32.mrf.mxu0  ;;  %v500_v25 = vpop.f32.mrf.mxu1 }
  0xe1   : > { %597 = vst [vmem:[#allocation2 + $0x28] sm:$0xff] %v565_v18  ;;  %v563_v23 = vmax.f32 %v437_v19, 0.0  ;;  %v448_v24 = vadd.f32 %v5411_v21, %v6202_v14  ;;  %v581_v27 = vmax.f32 %v6207_v22, 0.0  ;;  %v6212_v28 = vadd.f32 %v6202_v14, %v500_v25 }
  0xe2   : > { %v439_v26 = vpop.f32.mrf.mxu0  ;;  %v5427_v32 = vpop.f32.mrf.mxu1  ;;  %vm6329_vm8 = vcmp.gt.s32.totalorder %v706_v20, 0  ;;  %v652_v22 = vadd.s32 192, %v6177_v5 }
  0xe3   : > { %595 = vst [vmem:[#allocation2 + $0x18] sm:$0xff] %v563_v23  ;;  %v566_v30 = vmax.f32 %v448_v24, 0.0  ;;  %v440_v31 = vadd.f32 %v6202_v14, %v439_v26  ;;  %613 = vst [vmem:[#allocation2 + $0xa8] sm:$0xff] %v581_v27  ;;  %v579_v34 = vmax.f32 %v6212_v28, 0.0  ;;  %v6220_v35 = vadd.f32 %v5427_v32, %v6202_v14  ;;  %v5964_v28 = vld [vmem:[%s7866_s3 + $0xc0] sm:$0xff]  }
  0xe4   : > { %v5414_v33 = vpop.f32.mrf.mxu0  ;;  %v503_v39 = vpop.f32.mrf.mxu1  ;;  %vm6363_vm10 = vmpackc.low %vm7872_vm2, %vm6329_vm8 }
  0xe5   : > { %598 = vst [vmem:[#allocation2 + $0x30] sm:$0xff] %v566_v30  ;;  %v564_v37 = vmax.f32 %v440_v31, 0.0  ;;  %v6224_v38 = vadd.f32 %v5414_v33, %v6202_v14  ;;  %611 = vst [vmem:[#allocation2 + $0x98] sm:$0xff] %v579_v34  ;;  %v582_v42 = vmax.f32 %v6220_v35, 0.0  ;;  %v6230_v43 = vadd.f32 %v6202_v14, %v503_v39 }
  0xe6   : > { %v452_v40 = vpop.f32.mrf.mxu0  ;;  %v5430_v47 = vpop.f32.mrf.mxu1  ;;  %v1270_v50 = vpack.c.bf16 %v566_v30, %v565_v18  ;;  %v7923_v7 = vsel %vm6363_vm10, 4294967295, %v7922_v7 }
  0xe7   : > { %596 = vst [vmem:[#allocation2 + $0x20] sm:$0xff] %v564_v37  ;;  %v569_v44 = vmax.f32 %v6224_v38, 0.0  ;;  %v453_v45 = vadd.f32 %v6202_v14, %v452_v40  ;;  %v1269_v46 = vpack.c.bf16 %v564_v37, %v563_v23  ;;  %614 = vst [vmem:[#allocation2 + $0xb0] sm:$0xff] %v582_v42  ;;  %v580_v52 = vmax.f32 %v6230_v43, 0.0  ;;  %v5952_v40 = vld [vmem:[%s7866_s3 + $0xa0] sm:$0xff]  }
  0xe8   : > { %v5415_v49 = vpop.f32.mrf.mxu0  ;;  %v6241_v53 = vadd.f32 %v5430_v47, %v6202_v14  ;;  %v516_v56 = vpop.f32.mrf.mxu1 }
  0xe9   : > { %601 = vst [vmem:[#allocation2 + $0x48] sm:$0xff] %v569_v44  ;;  %v567_v54 = vmax.f32 %v453_v45, 0.0  ;;  %v464_v55 = vadd.f32 %v5415_v49, %v6202_v14  ;;  %5457 = vmatmul.mubr.bf16.vlgmr.msra.gmra.mxu1 %v1269_v46  ;;  %612 = vst [vmem:[#allocation2 + $0xa0] sm:$0xff] %v580_v52  ;;  %v6254_v60 = vadd.f32 %v6202_v14, %v516_v56 }
  0xea   : > { %v455_v57 = vpop.f32.mrf.mxu0  ;;  %5537 = vmatpush3.bf16.msra.mxu1 %v5949_v12  ;;  %5460 = vmatprep.mubr.bf16.mxu1 %v1270_v50  ;;  %v585_v59 = vmax.f32 %v6241_v53, 0.0  ;;  %v5431_v0 = vpop.f32.mrf.mxu1  ;;  %v1046_v10 = vld [vmem:[#allocation2 + $0x17] sm:$0xff]  ;;  %v7914_v12 = vmov 0 }
  0xeb   : > { %599 = vst [vmem:[#allocation2 + $0x38] sm:$0xff] %v567_v54  ;;  %v570_v62 = vmax.f32 %v464_v55, 0.0  ;;  %v456_v63 = vadd.f32 %v6202_v14, %v455_v57  ;;  %5538 = vmatprep.subr.bf16.mxu1 %v5950_v48  ;;  %v583_v4 = vmax.f32 %v6254_v60, 0.0  ;;  %v6269_v6 = vadd.f32 %v5431_v0, %v6202_v14  ;;  %v5953_v0 = vld [vmem:[%s7866_s3 + $0x98] sm:$0xff]  }
  0xec   : > { %v5418_v2 = vpop.f32.mrf.mxu0  ;;  %617 = vst [vmem:[#allocation2 + $0xc8] sm:$0xff] %v585_v59  ;;  %v7915_v12 = vsel %vm6278_vm6, 4294967295, %v7914_v12  ;;  %v519_v15 = vpop.f32.mrf.mxu1  ;;  %v1049_v19 = vld [vmem:[#allocation2 + $0x2f] sm:$0xff]  ;;  %v654_v60 = vadd.s32 208, %v6177_v5 }
  0xed   : > { %602 = vst [vmem:[#allocation2 + $0x50] sm:$0xff] %v570_v62  ;;  %v568_v8 = vmax.f32 %v456_v63, 0.0  ;;  %v6273_v9 = vadd.f32 %v5418_v2, %v6202_v14  ;;  %615 = vst [vmem:[#allocation2 + $0xb8] sm:$0xff] %v583_v4  ;;  %v586_v21 = vmax.f32 %v6269_v6, 0.0  ;;  %v6286_v23 = vadd.f32 %v6202_v14, %v519_v15 }
  0xee   : > { %v468_v16 = vpop.f32.mrf.mxu0  ;;  %v1047_v17 = vld [vmem:[#allocation2 + $0x1f] sm:$0xff]  ;;  %v1048_v18 = vld [vmem:[#allocation2 + $0x27] sm:$0xff]  ;;  %5539 = vmatpush3.bf16.msra.mxu1 %v5950_v48  ;;  %v5434_v31 = vpop.f32.mrf.mxu1  ;;  %v1272_v46 = vpack.c.bf16 %v570_v62, %v569_v44  ;;  %v5955_v48 = vld [vmem:[%s7866_s3 + $0xf0] sm:$0xff]   ;;  %v640_v63 = vadd.s32 96, %v6177_v5  ;;  %v7942_v6 = vmov 0 }
  0xef   : > { %600 = vst [vmem:[#allocation2 + $0x40] sm:$0xff] %v568_v8  ;;  %v573_v24 = vmax.f32 %v6273_v9, 0.0  ;;  %v6290_v25 = vadd.f32 %v6202_v14, %v468_v16  ;;  %v6292_v26 = vpack.c.bf16 %v1047_v17, %v1046_v10  ;;  %v6301_v30 = vpack.c.bf16 %v1049_v19, %v1048_v18  ;;  %5540 = vmatprep.subr.bf16.mxu1 %v5951_v1  ;;  %v5957_v10 = vld [vmem:[%s7866_s3 + $0xe8] sm:$0xff]  }
  0xf0   : > { %v5419_v32 = vpop.f32.mrf.mxu0  ;;  %v1271_v33 = vpack.c.bf16 %v568_v8, %v567_v54  ;;  %618 = vst [vmem:[#allocation2 + $0xd0] sm:$0xff] %v586_v21  ;;  %v584_v37 = vmax.f32 %v6286_v23, 0.0  ;;  %v6307_v39 = vadd.f32 %v5434_v31, %v6202_v14  ;;  %v532_v47 = vpop.f32.mrf.mxu1  ;;  %v734_v18 = vand.u32 15, %v638_v51  ;;  %v1065_v35 = vld [vmem:[#allocation2 + $0xaf] sm:$0xff] }
  0xf1   : > { %605 = vst [vmem:[#allocation2 + $0x68] sm:$0xff] %v573_v24  ;;  %v571_v41 = vmax.f32 %v6290_v25, 0.0  ;;  %v6316_v45 = vadd.f32 %v5419_v32, %v6202_v14  ;;  %5505 = vmatmul.mubr.msk.bf16.vlgmr.msra.gmra.mxu0 %vm6278_vm6, %v6292_v26  ;;  %v6337_v44 = vadd.f32 %v6202_v14, %v532_v47 }
  0xf2   : > { %v471_v49 = vpop.f32.mrf.mxu0  ;;  %5508 = vmatprep.mubr.msk.bf16.mxu0 %vm6297_vm7, %v6301_v30  ;;  %5461 = vmatmul.mubr.bf16.gmra.mxu1 %v1271_v33  ;;  %616 = vst [vmem:[#allocation2 + $0xc0] sm:$0xff] %v584_v37  ;;  %v589_v38 = vmax.f32 %v6307_v39, 0.0  ;;  %v5435_v56 = vpop.f32.mrf.mxu1  ;;  %v1050_v3 = vld [vmem:[#allocation2 + $0x37] sm:$0xff]  ;;  %v7924_v33 = vmov 0  ;;  %vm6413_vm12 = vcmp.gt.s32.totalorder %v734_v18, 0  ;;  %v5959_v18 = vld [vmem:[%s7866_s3 + $0x88] sm:$0xff]  }
  0xf3   : > { %603 = vst [vmem:[#allocation2 + $0x58] sm:$0xff] %v571_v41  ;;  %v574_v54 = vmax.f32 %v6316_v45, 0.0  ;;  %v472_v55 = vadd.f32 %v6202_v14, %v471_v49  ;;  %5464 = vmatprep.mubr.bf16.mxu1 %v1272_v46  ;;  %5541 = vmatpush3.bf16.msra.mxu1 %v5951_v1  ;;  %v587_v61 = vmax.f32 %v6337_v44, 0.0  ;;  %v6350_v62 = vadd.f32 %v5435_v56, %v6202_v14  ;;  %vm6437_vm14 = vmpackc.low %vm7872_vm2, %vm6413_vm12 }
  0xf4   : > { %v5422_v57 = vpop.f32.mrf.mxu0  ;;  %621 = vst [vmem:[#allocation2 + $0xe8] sm:$0xff] %v589_v38  ;;  %5542 = vmatprep.subr.bf16.mxu1 %v5952_v40  ;;  %5585 = vmatpush3.bf16.msra.mxu0 %v6196_v13  ;;  %v535_v8 = vpop.f32.mrf.mxu1  ;;  %v1053_v17 = vld [vmem:[#allocation2 + $0x4f] sm:$0xff]  ;;  %v7925_v33 = vsel %vm6385_vm11, 4294967295, %v7924_v33  ;;  %v748_v49 = vand.u32 15, %v640_v63  ;;  %v7932_v63 = vmov 0  ;;  %v658_v44 = vadd.s32 240, %v6177_v5 }
  0xf5   : > { %606 = vst [vmem:[#allocation2 + $0x70] sm:$0xff] %v574_v54  ;;  %v572_v1 = vmax.f32 %v472_v55, 0.0  ;;  %v6358_v2 = vadd.f32 %v5422_v57, %v6202_v14  ;;  %5586 = vmatprep.subr.bf16.mxu0 %v5955_v48  ;;  %619 = vst [vmem:[#allocation2 + $0xd8] sm:$0xff] %v587_v61  ;;  %v590_v19 = vmax.f32 %v6350_v62, 0.0  ;;  %v6374_v20 = vadd.f32 %v6202_v14, %v535_v8  ;;  %v5956_v55 = vld [vmem:[%s7866_s3 + $0x90] sm:$0xff]  }
  0xf6   : > { %v484_v13 = vpop.f32.mrf.mxu0  ;;  %v1051_v15 = vld [vmem:[#allocation2 + $0x3f] sm:$0xff]  ;;  %v1052_v16 = vld [vmem:[#allocation2 + $0x47] sm:$0xff]  ;;  %v5438_v45 = vpop.f32.mrf.mxu1  ;;  %v1274_v56 = vpack.c.bf16 %v574_v54, %v573_v24  ;;  %v642_v54 = vadd.s32 112, %v6177_v5  ;;  %vm6424_vm13 = vcmp.gt.s32.totalorder %v748_v49, 0  ;;  %v7947_v62 = vmov 0 }
  0xf7   : > { %604 = vst [vmem:[#allocation2 + $0x60] sm:$0xff] %v572_v1  ;;  %v577_v25 = vmax.f32 %v6358_v2, 0.0  ;;  %v6378_v31 = vadd.f32 %v6202_v14, %v484_v13  ;;  %v6380_v32 = vpack.c.bf16 %v1051_v15, %v1050_v3  ;;  %v6389_v36 = vpack.c.bf16 %v1053_v17, %v1052_v16  ;;  %5543 = vmatpush3.bf16.msra.mxu1 %v5952_v40  ;;  %vm6454_vm15 = vmpackc.low %vm7872_vm2, %vm6424_vm13 }
  0xf8   : > { %v5423_v46 = vpop.f32.mrf.mxu0  ;;  %v1273_v47 = vpack.c.bf16 %v572_v1, %v571_v41  ;;  %622 = vst [vmem:[#allocation2 + $0xf0] sm:$0xff] %v590_v19  ;;  %v588_v50 = vmax.f32 %v6374_v20, 0.0  ;;  %v557_v51 = vadd.f32 %v5438_v45, %v6202_v14  ;;  %5544 = vmatprep.subr.bf16.mxu1 %v5953_v0  ;;  %5587 = vmatpush3.bf16.msra.mxu0 %v5955_v48  ;;  %v548_v57 = vpop.f32.mrf.mxu1  ;;  %v5958_v48 = vld [vmem:[%s7866_s3 + $0xe0] sm:$0xff]   ;;  %v644_v17 = vadd.s32 128, %v6177_v5 }
  0xf9   : > { %609 = vst [vmem:[#allocation2 + $0x88] sm:$0xff] %v577_v25  ;;  %v575_v40 = vmax.f32 %v6378_v31, 0.0  ;;  %v496_v41 = vadd.f32 %v5423_v46, %v6202_v14  ;;  %5509 = vmatmul.mubr.msk.bf16.gmra.mxu0 %vm6363_vm10, %v6380_v32  ;;  %5588 = vmatprep.subr.bf16.mxu0 %v5957_v10  ;;  %v6420_v24 = vadd.f32 %v6202_v14, %v548_v57  ;;  %v7930_v45 = vmov 0  ;;  %v1067_v23 = vld [vmem:[#allocation2 + $0xbf] sm:$0xff]  ;;  %v1068_v53 = vld [vmem:[#allocation2 + $0xc7] sm:$0xff] }
  0xfa   : > { %v487_v58 = vpop.f32.mrf.mxu0  ;;  %5512 = vmatprep.mubr.msk.bf16.mxu0 %vm6385_vm11, %v6389_v36  ;;  %5465 = vmatmul.mubr.bf16.gmra.mxu1 %v1273_v47  ;;  %620 = vst [vmem:[#allocation2 + $0xe0] sm:$0xff] %v588_v50  ;;  %v593_v9 = vmax.f32 %v557_v51, 0.0  ;;  %v5439_v8 = vpop.f32.mrf.mxu1  ;;  %v7931_v45 = vsel %vm6437_vm14, 4294967295, %v7930_v45  ;;  %v7933_v63 = vsel %vm6454_vm15, 4294967295, %v7932_v63  ;;  %v648_v2 = vadd.s32 160, %v6177_v5 }
  0xfb   : > { %607 = vst [vmem:[#allocation2 + $0x78] sm:$0xff] %v575_v40  ;;  %v578_v1 = vmax.f32 %v496_v41, 0.0  ;;  %v488_v3 = vadd.f32 %v6202_v14, %v487_v58  ;;  %5468 = vmatprep.mubr.bf16.mxu1 %v1274_v56  ;;  %5545 = vmatpush3.bf16.msra.mxu1 %v5953_v0  ;;  %v591_v15 = vmax.f32 %v6420_v24, 0.0  ;;  %v560_v16 = vadd.f32 %v5439_v8, %v6202_v14  ;;  %v1054_v0 = vld [vmem:[#allocation2 + $0x57] sm:$0xff] }
  0xfc   : > { %625 = vst [vmem:[#allocation2 + $0x108] sm:$0xff] %v593_v9  ;;  %5546 = vmatprep.subr.bf16.mxu1 %v5956_v55  ;;  %5589 = vmatpush3.bf16.msra.mxu0 %v5957_v10  ;;  %v551_v46 = vpop.f32.mrf.mxu1  ;;  %v5960_v10 = vld [vmem:[%s7866_s3 + $0xd8] sm:$0xff]   ;;  %v1057_v51 = vld [vmem:[#allocation2 + $0x6f] sm:$0xff]  ;;  %v762_v41 = vand.u32 15, %v642_v54  ;;  %v776_v54 = vand.u32 15, %v644_v17 }
  0xfd   : > { %610 = vst [vmem:[#allocation2 + $0x90] sm:$0xff] %v578_v1  ;;  %v576_v31 = vmax.f32 %v488_v3, 0.0  ;;  %5590 = vmatprep.subr.bf16.mxu0 %v5958_v48  ;;  %623 = vst [vmem:[#allocation2 + $0xf8] sm:$0xff] %v591_v15  ;;  %v594_v56 = vmax.f32 %v560_v16, 0.0  ;;  %v6447_v57 = vadd.f32 %v6202_v14, %v551_v46  ;;  %v5962_v14 = vld [vmem:[%s7866_s3 + $0x80] sm:$0xff]   ;;  %v1276_v13 = vpack.c.bf16 %v578_v1, %v577_v25  ;;  %v6482_v25 = vld [vmem:[%s7866_s3 + $0x138] sm:$0xff]  }
  0xfe   : > { %v1055_v47 = vld [vmem:[#allocation2 + $0x5f] sm:$0xff]  ;;  %v1056_v49 = vld [vmem:[#allocation2 + $0x67] sm:$0xff]  ;;  %vm1090_vm1 = vcmp.gt.s32.totalorder %v762_v41, 0  ;;  %vm1092_vm4 = vcmp.gt.s32.totalorder %v776_v54, 0  ;;  %v7934_v1 = vmov 0  ;;  %v7936_v46 = vmov 0 }
  0xff   : > { %608 = vst [vmem:[#allocation2 + $0x80] sm:$0xff] %v576_v31  ;;  %v6449_v58 = vpack.c.bf16 %v1055_v47, %v1054_v0  ;;  %v6458_v9 = vpack.c.bf16 %v1057_v51, %v1056_v49  ;;  %v1275_v3 = vpack.c.bf16 %v576_v31, %v575_v40  ;;  %5547 = vmatpush3.bf16.msra.mxu1 %v5956_v55  ;;  %626 = vst [vmem:[#allocation2 + $0x110] sm:$0xff] %v594_v56  ;;  %v5961_v55 = vld [vmem:[%s7866_s3 + $0xd0] sm:$0xff]   ;;  %v5963_v16 = vld [vmem:[%s7866_s3 + $0xc8] sm:$0xff]   ;;  %v7938_v56 = vmov 0 }
 0x100   : > { %v592_v8 = vmax.f32 %v6447_v57, 0.0  ;;  %5591 = vmatpush3.bf16.msra.mxu0 %v5958_v48  ;;  %5548 = vmatprep.subr.bf16.mxu1 %v5959_v18  ;;  %v646_v40 = vadd.s32 144, %v6177_v5  ;;  %vm6485_vm5 = vmpackc.low %vm7872_vm2, %vm1090_vm1  ;;  %v1277_v49 = vpack.c.bf16 %v580_v52, %v579_v34  ;;  %v804_v51 = vand.u32 15, %v648_v2  ;;  %v1063_v52 = vld [vmem:[#allocation2 + $0x9f] sm:$0xff]  ;;  %v1073_v39 = vld [vmem:[#allocation2 + $0xef] sm:$0xff] }
 0x101   : > { %5513 = vmatmul.mubr.msk.bf16.gmra.mxu0 %vm6437_vm14, %v6449_v58  ;;  %5592 = vmatprep.subr.bf16.mxu0 %v5960_v10  ;;  %v7935_v1 = vsel %vm6485_vm5, 4294967295, %v7934_v1  ;;  %vm6495_vm8 = vmpackc.low %vm7872_vm2, %vm1092_vm4  ;;  %v1278_v41 = vpack.c.bf16 %v582_v42, %v581_v27  ;;  %v650_v34 = vadd.s32 176, %v6177_v5  ;;  %v1064_v27 = vld [vmem:[#allocation2 + $0xa7] sm:$0xff]  ;;  %v6524_v42 = vld [vmem:[%s7866_s3 + $0x178] sm:$0xff]   ;;  %v7940_v54 = vmov 0 }
 0x102   : > { %5516 = vmatprep.mubr.msk.bf16.mxu0 %vm6454_vm15, %v6458_v9  ;;  %5469 = vmatmul.mubr.bf16.gmra.mxu1 %v1275_v3  ;;  %624 = vst [vmem:[#allocation2 + $0x100] sm:$0xff] %v592_v8  ;;  %v1058_v48 = vld [vmem:[#allocation2 + $0x77] sm:$0xff]  ;;  %v7937_v46 = vsel %vm6495_vm8, 4294967295, %v7936_v46  ;;  %v790_v47 = vand.u32 15, %v646_v40  ;;  %vm1096_vm12 = vcmp.gt.s32.totalorder %v804_v51, 0  ;;  %v832_v40 = vand.u32 15, %v652_v22 }
 0x103   : > { %5472 = vmatprep.mubr.bf16.mxu1 %v1276_v13  ;;  %5549 = vmatpush3.bf16.msra.mxu1 %v5959_v18  ;;  %vm6534_vm1 = vmpackc.low %vm7872_vm2, %vm1096_vm12  ;;  %v6538_v13 = vpack.c.bf16 %v1065_v35, %v1064_v27  ;;  %v1280_v2 = vpack.c.bf16 %v586_v21, %v585_v59  ;;  %v629_v59 = vadd.s32 8, %v6177_v5  ;;  %v1071_v20 = vld [vmem:[#allocation2 + $0xdf] sm:$0xff]  ;;  %v1283_v27 = vpack.c.bf16 %v592_v8, %v591_v15 }
 0x104   : > { %5593 = vmatpush3.bf16.msra.mxu0 %v5960_v10  ;;  %5550 = vmatprep.subr.bf16.mxu1 %v5962_v14  ;;  %v1061_v31 = vld [vmem:[#allocation2 + $0x8f] sm:$0xff]  ;;  %vm1094_vm9 = vcmp.gt.s32.totalorder %v790_v47, 0  ;;  %v1062_v43 = vld [vmem:[#allocation2 + $0x97] sm:$0xff]  ;;  %v7941_v54 = vsel %vm6534_vm1, 4294967295, %v7940_v54  ;;  %v7951_v35 = vmov 0  ;;  %v635_v57 = vadd.s32 56, %v6177_v5 }
 0x105   : > { %5594 = vmatprep.subr.bf16.mxu0 %v5961_v55  ;;  %vm6527_vm13 = vmpackc.low %vm7872_vm2, %vm1094_vm9  ;;  %v6531_v3 = vpack.c.bf16 %v1063_v52, %v1062_v43  ;;  %vm1100_vm9 = vcmp.gt.s32.totalorder %v832_v40, 0  ;;  %v671_v51 = vand.u32 15, %v629_v59  ;;  %v7949_v43 = vmov 0  ;;  %v1074_v24 = vld [vmem:[#allocation2 + $0xf7] sm:$0xff]  ;;  %v1723_v59 = vld [vmem:[#allocation2 + $0x29] sm:$0xff] }
 0x106   : > { %v1059_v17 = vld [vmem:[#allocation2 + $0x7f] sm:$0xff]  ;;  %v1060_v18 = vld [vmem:[#allocation2 + $0x87] sm:$0xff]  ;;  %v7939_v56 = vsel %vm6527_vm13, 4294967295, %v7938_v56  ;;  %vm6566_vm0 = vmpackc.low %vm7872_vm2, %vm1100_vm9  ;;  %v874_v52 = vand.u32 15, %v658_v44 }
 0x107   : > { %v6492_v0 = vpack.c.bf16 %v1059_v17, %v1058_v48  ;;  %v6499_v10 = vpack.c.bf16 %v1061_v31, %v1060_v18  ;;  %5551 = vmatpush3.bf16.msra.mxu1 %v5962_v14  ;;  %v818_v14 = vand.u32 15, %v650_v34  ;;  %v1069_v48 = vld [vmem:[#allocation2 + $0xcf] sm:$0xff]  ;;  %v846_v17 = vand.u32 15, %v654_v60  ;;  %v1721_v8 = vld [vmem:[#allocation2 + $0x19] sm:$0xff] }
 0x108   : > { %5595 = vmatpush3.bf16.msra.mxu0 %v5961_v55  ;;  %5632 = vmatprep.subr.bf16.mxu1 %v6482_v25  ;;  %v1279_v55 = vpack.c.bf16 %v584_v37, %v583_v4  ;;  %v1066_v4 = vld [vmem:[#allocation2 + $0xb7] sm:$0xff]  ;;  %v656_v37 = vadd.s32 224, %v6177_v5  ;;  %v6570_v18 = vpack.c.bf16 %v1069_v48, %v1068_v53  ;;  %v1281_v31 = vpack.c.bf16 %v588_v50, %v587_v61  ;;  %v5967_v44 = vld [vmem:[%s7866_s3 + $0x128] sm:$0xff]  }
 0x109   : > { %5517 = vmatmul.mubr.msk.bf16.gmra.mxu0 %vm6485_vm5, %v6492_v0  ;;  %5596 = vmatprep.subr.bf16.mxu0 %v5963_v16  ;;  %vm1098_vm4 = vcmp.gt.s32.totalorder %v818_v14, 0  ;;  %v6563_v21 = vpack.c.bf16 %v1067_v23, %v1066_v4  ;;  %v1070_v61 = vld [vmem:[#allocation2 + $0xd7] sm:$0xff]  ;;  %v631_v50 = vadd.s32 24, %v6177_v5  ;;  %v1075_v15 = vld [vmem:[#allocation2 + $0xff] sm:$0xff]  ;;  %v637_v60 = vadd.s32 72, %v6177_v5 }
 0x10a   : > { %5520 = vmatprep.mubr.msk.bf16.mxu0 %vm6495_vm8, %v6499_v10  ;;  %5473 = vmatmul.mubr.bf16.gmra.mxu1 %v1277_v49  ;;  %vm6559_vm12 = vmpackc.low %vm7872_vm2, %vm1098_vm4  ;;  %v860_v47 = vand.u32 15, %v656_v37  ;;  %v1282_v49 = vpack.c.bf16 %v590_v19, %v589_v38  ;;  %vm1102_vm4 = vcmp.gt.s32.totalorder %v846_v17, 0  ;;  %vm1752_vm2 = vcmp.lt.s32.totalorder %v671_v51, 15  ;;  %v1719_v19 = vld [vmem:[#allocation2 + $0x9] sm:$0xff]  ;;  %v1724_v23 = vld [vmem:[#allocation2 + $0x31] sm:$0xff] }
 0x10b   : > { %5476 = vmatprep.mubr.bf16.mxu1 %v1278_v41  ;;  %v7943_v6 = vsel %vm6559_vm12, 4294967295, %v7942_v6  ;;  %v1072_v41 = vld [vmem:[#allocation2 + $0xe7] sm:$0xff]  ;;  %v633_v38 = vadd.s32 40, %v6177_v5  ;;  %v6594_v34 = vpack.c.bf16 %v1071_v20, %v1070_v61  ;;  %v685_v14 = vand.u32 15, %v631_v50  ;;  %v1725_v20 = vld [vmem:[#allocation2 + $0x39] sm:$0xff] }
 0x10c   : > { %5597 = vmatpush3.bf16.msra.mxu0 %v5963_v16  ;;  %v7944_v16 = vmov 0  ;;  %vm1104_vm9 = vcmp.gt.s32.totalorder %v860_v47, 0  ;;  %v6601_v22 = vpack.c.bf16 %v1073_v39, %v1072_v41  ;;  %v6627_v37 = vpack.c.bf16 %v1075_v15, %v1074_v24  ;;  %v1728_v41 = vld [vmem:[#allocation2 + $0x51] sm:$0xff]  ;;  %v1730_v24 = vld [vmem:[#allocation2 + $0x61] sm:$0xff]  ;;  %v3787_v17 = vld [vmem:[#allocation2 + $0x69] sm:$0xff] }
 0x10d   : > { %5598 = vmatprep.subr.bf16.mxu0 %v5964_v28  ;;  %v7945_v16 = vsel %vm6566_vm0, 4294967295, %v7944_v16  ;;  %v699_v40 = vand.u32 15, %v633_v38  ;;  %v713_v47 = vand.u32 15, %v635_v57  ;;  %v727_v51 = vand.u32 15, %v637_v60  ;;  %v1727_v38 = vld [vmem:[#allocation2 + $0x49] sm:$0xff] }
 0x10e   : > { %v639_v61 = vadd.s32 88, %v6177_v5  ;;  %v641_v50 = vadd.s32 104, %v6177_v5  ;;  %v645_v15 = vadd.s32 136, %v6177_v5  ;;  %v5973_v57 = vld [vmem:[%s7866_s3 + $0x168] sm:$0xff]  }
 0x110   : > { %5599 = vmatpush3.bf16.msra.mxu0 %v5964_v28  ;;  %v1720_v28 = vld [vmem:[#allocation2 + $0x11] sm:$0xff] }
 0x111   : > { %5521 = vmatmul.mubr.msk.bf16.gmra.mxu0 %vm6527_vm13, %v6531_v3  ;;  %5680 = vmatprep.subr.bf16.mxu0 %v6524_v42  ;;  %vm1756_vm13 = vcmp.lt.s32.totalorder %v699_v40, 15  ;;  %v5969_v40 = vld [vmem:[%s7866_s3 + $0x118] sm:$0xff]  }
 0x112   : > { %5524 = vmatprep.mubr.msk.bf16.mxu0 %vm6534_vm1, %v6538_v13  ;;  %5477 = vmatmul.mubr.bf16.gmra.mxu1 %v1279_v55  ;;  %v4752_v55 = vpack.c.bf16 %v1720_v28, %v1719_v19  ;;  %v741_v28 = vand.u32 15, %v639_v61  ;;  %v5975_v61 = vld [vmem:[%s7866_s3 + $0x108] sm:$0xff]  }
 0x113   : > { %5480 = vmatprep.mubr.bf16.mxu1 %v1280_v2  ;;  %v1722_v2 = vld [vmem:[#allocation2 + $0x21] sm:$0xff] }
 0x114   : > { %v6634_v48 = vpack.c.bf16 %v1722_v2, %v1721_v8  ;;  %v1732_v8 = vld [vmem:[#allocation2 + $0x71] sm:$0xff] }
 0x115   : > { %v3796_v2 = vld [vmem:[#allocation2 + $0xb1] sm:$0xff] }
 0x119   : > { %5525 = vmatmul.mubr.msk.bf16.gmra.mxu0 %vm6559_vm12, %v6563_v21  ;;  %vm7946_vm12 = vmmov 1  }
 0x11a   : > { %5528 = vmatprep.mubr.msk.bf16.mxu0 %vm6566_vm0, %v6570_v18  ;;  %5481 = vmatmul.mubr.bf16.gmra.mxu1 %v1281_v31  ;;  %vm6590_vm1 = vmpackc.low %vm7946_vm12, %vm1102_vm4  ;;  %v5966_v31 = vld [vmem:[%s7866_s3 + $0x130] sm:$0xff]  }
 0x11b   : > { %5484 = vmatprep.mubr.bf16.mxu1 %v1282_v49  ;;  %v7948_v62 = vsel %vm6590_vm1, 4294967295, %v7947_v62  ;;  %vm6597_vm0 = vmpackc.low %vm7946_vm12, %vm1104_vm9  ;;  %vm1106_vm9 = vcmp.gt.s32.totalorder %v874_v52, 0  ;;  %v6647_v49 = vpack.c.bf16 %v1724_v23, %v1723_v59  ;;  %v5968_v52 = vld [vmem:[%s7866_s3 + $0x120] sm:$0xff]  }
 0x11c   : > { %v7950_v43 = vsel %vm6597_vm0, 4294967295, %v7949_v43  ;;  %vm6608_vm4 = vmpackc.low %vm1752_vm2, %vm7946_vm12  ;;  %vm1754_vm2 = vcmp.lt.s32.totalorder %v685_v14, 15  ;;  %v755_v14 = vand.u32 15, %v641_v50  ;;  %v5976_v50 = vld [vmem:[%s7866_s3 + $0x158] sm:$0xff]  }
 0x11d   : > { %v7952_v35 = vsel %vm6608_vm4, 4294967295, %v7951_v35 }
 0x121   : > { %5529 = vmatmul.mubr.msk.bf16.gmra.mxu0 %vm6590_vm1, %v6594_v34  ;;  %vm6623_vm1 = vmpackc.low %vm7946_vm12, %vm1106_vm9  ;;  %vm1760_vm9 = vcmp.lt.s32.totalorder %v727_v51, 15  ;;  %v783_v51 = vand.u32 15, %v645_v15  ;;  %v6781_v15 = vld [vmem:[%s7866_s3 + $0x1b8] sm:$0xff]  }
 0x122   : > { %5532 = vmatprep.mubr.msk.bf16.mxu0 %vm6597_vm0, %v6601_v22  ;;  %5485 = vmatmul.mubr.bf16.gmra.mxu1 %v1283_v27  ;;  %vm6637_vm0 = vmpackc.low %vm1756_vm13, %vm7946_vm12  ;;  %vm1758_vm13 = vcmp.lt.s32.totalorder %v713_v47, 15  ;;  %v6682_v27 = vpack.c.bf16 %v1728_v41, %v1727_v38  ;;  %v1735_v41 = vld [vmem:[#allocation2 + $0x89] sm:$0xff]  ;;  %v1736_v38 = vld [vmem:[#allocation2 + $0x91] sm:$0xff] }
 0x123   : > { %5552 = vmatprep.mubr.msk.bf16.mxu1 %vm6608_vm4, %v4752_v55  ;;  %vm6630_vm4 = vmpackc.low %vm1754_vm2, %vm7946_vm12  ;;  %v5971_v55 = vld [vmem:[%s7866_s3 + $0x170] sm:$0xff]  }
 0x124   : > { %vm6665_vm2 = vmpackc.low %vm1758_vm13, %vm7946_vm12  ;;  %vm1762_vm13 = vcmp.lt.s32.totalorder %v741_v28, 15 }
 0x129   : > { %5533 = vmatmul.mubr.msk.bf16.gmra.mxu0 %vm6623_vm1, %v6627_v37 }
 0x12a   : > { %5600 = vmatprep.mubr.msk.bf16.mxu0 %vm6184_vm3, %v6292_v26  ;;  %5553 = vmatmul.mubr.msk.bf16.vlgmr.msra.gmra.mxu1 %vm6630_vm4, %v6634_v48  ;;  %v1726_v26 = vld [vmem:[#allocation2 + $0x41] sm:$0xff]  ;;  %vm6672_vm3 = vmpackc.low %vm1760_vm9, %vm7946_vm12  ;;  %vm1764_vm9 = vcmp.lt.s32.totalorder %v755_v14, 15  ;;  %v7969_v14 = vmov 0 }
 0x12b   : > { %5633 = vmatpush3.bf16.msra.mxu1 %v6482_v25  ;;  %5556 = vmatprep.mubr.msk.bf16.mxu1 %vm6637_vm0, %v6647_v49  ;;  %v6669_v39 = vpack.c.bf16 %v1726_v26, %v1725_v20  ;;  %v1733_v20 = vld [vmem:[#allocation2 + $0x79] sm:$0xff]  ;;  %v649_v26 = vadd.s32 168, %v6177_v5  ;;  %v3792_v25 = vld [vmem:[#allocation2 + $0x91] sm:$0xff] }
 0x12c   : > { %5634 = vmatprep.subr.bf16.mxu1 %v5966_v31 }
 0x12f   : > { %5635 = vmatpush3.bf16.msra.mxu1 %v5966_v31  ;;  %v5972_v31 = vld [vmem:[%s7866_s3 + $0x110] sm:$0xff]  }
 0x130   : > { %5636 = vmatprep.subr.bf16.mxu1 %v5967_v44 }
 0x131   : > { %5601 = vmatmul.mubr.msk.bf16.vlgmr.msra.gmra.mxu0 %vm6278_vm6, %v6301_v30  ;;  %v643_v30 = vadd.s32 120, %v6177_v5  ;;  %vm6713_vm6 = vmpackc.low %vm1764_vm9, %vm7946_vm12  ;;  %vm1768_vm9 = vcmp.lt.s32.totalorder %v783_v51, 15  ;;  %v7971_v51 = vmov 0 }
 0x132   : > { %5604 = vmatprep.mubr.msk.bf16.mxu0 %vm6297_vm7, %v6380_v32  ;;  %5557 = vmatmul.mubr.msk.bf16.gmra.mxu1 %vm6665_vm2, %v6669_v39  ;;  %v1729_v32 = vld [vmem:[#allocation2 + $0x59] sm:$0xff]  ;;  %vm6706_vm7 = vmpackc.low %vm1762_vm13, %vm7946_vm12 }
 0x133   : > { %5560 = vmatprep.mubr.msk.bf16.mxu1 %vm6672_vm3, %v6682_v27  ;;  %5637 = vmatpush3.bf16.msra.mxu1 %v5967_v44  ;;  %v6710_v60 = vpack.c.bf16 %v1730_v24, %v1729_v32  ;;  %v769_v59 = vand.u32 15, %v643_v30  ;;  %v5974_v44 = vld [vmem:[%s7866_s3 + $0x160] sm:$0xff]   ;;  %v811_v32 = vand.u32 15, %v649_v26  ;;  %v5977_v24 = vld [vmem:[%s7866_s3 + $0x150] sm:$0xff]  }
 0x134   : > { %5638 = vmatprep.subr.bf16.mxu1 %v5968_v52  ;;  %5681 = vmatpush3.bf16.msra.mxu0 %v6524_v42  ;;  %v1731_v42 = vld [vmem:[#allocation2 + $0x69] sm:$0xff]  ;;  %v5978_v30 = vld [vmem:[%s7866_s3 + $0x100] sm:$0xff]  }
 0x135   : > { %5682 = vmatprep.subr.bf16.mxu0 %v5971_v55  ;;  %v6723_v47 = vpack.c.bf16 %v1732_v8, %v1731_v42  ;;  %vm1766_vm13 = vcmp.lt.s32.totalorder %v769_v59, 15  ;;  %v653_v8 = vadd.s32 200, %v6177_v5  ;;  %v5979_v42 = vld [vmem:[%s7866_s3 + $0x148] sm:$0xff]   ;;  %v5980_v26 = vld [vmem:[%s7866_s3 + $0x140] sm:$0xff]  }
 0x136   : > { %v1739_v59 = vld [vmem:[#allocation2 + $0xa9] sm:$0xff] }
 0x137   : > { %5639 = vmatpush3.bf16.msra.mxu1 %v5968_v52 }
 0x138   : > { %5640 = vmatprep.subr.bf16.mxu1 %v5969_v40  ;;  %5683 = vmatpush3.bf16.msra.mxu0 %v5971_v55 }
 0x139   : > { %5605 = vmatmul.mubr.msk.bf16.gmra.mxu0 %vm6363_vm10, %v6389_v36  ;;  %5684 = vmatprep.subr.bf16.mxu0 %v5973_v57  ;;  %v647_v36 = vadd.s32 152, %v6177_v5  ;;  %vm6753_vm10 = vmpackc.low %vm1768_vm9, %vm7946_vm12  ;;  %vm1772_vm9 = vcmp.lt.s32.totalorder %v811_v32, 15  ;;  %v7975_v32 = vmov 0 }
 0x13a   : > { %5608 = vmatprep.mubr.msk.bf16.mxu0 %vm6385_vm11, %v6449_v58  ;;  %5561 = vmatmul.mubr.msk.bf16.gmra.mxu1 %vm6706_vm7, %v6710_v60  ;;  %v1734_v58 = vld [vmem:[#allocation2 + $0x81] sm:$0xff]  ;;  %vm6746_vm11 = vmpackc.low %vm1766_vm13, %vm7946_vm12  ;;  %v7970_v14 = vsel %vm6753_vm10, 4294967295, %v7969_v14 }
 0x13b   : > { %5564 = vmatprep.mubr.msk.bf16.mxu1 %vm6713_vm6, %v6723_v47  ;;  %5641 = vmatpush3.bf16.msra.mxu1 %v5969_v40  ;;  %v6750_v52 = vpack.c.bf16 %v1734_v58, %v1733_v20  ;;  %v797_v55 = vand.u32 15, %v647_v36  ;;  %v6763_v40 = vpack.c.bf16 %v1736_v38, %v1735_v41  ;;  %v7973_v36 = vmov 0  ;;  %v1742_v41 = vld [vmem:[#allocation2 + $0xc1] sm:$0xff] }
 0x13c   : > { %5642 = vmatprep.subr.bf16.mxu1 %v5972_v31  ;;  %5685 = vmatpush3.bf16.msra.mxu0 %v5973_v57  ;;  %v1738_v57 = vld [vmem:[#allocation2 + $0xa1] sm:$0xff]  ;;  %v839_v58 = vand.u32 15, %v653_v8  ;;  %v657_v38 = vadd.s32 232, %v6177_v5 }
 0x13d   : > { %5686 = vmatprep.subr.bf16.mxu0 %v5974_v44  ;;  %vm1770_vm13 = vcmp.lt.s32.totalorder %v797_v55, 15  ;;  %v1743_v55 = vld [vmem:[#allocation2 + $0xc9] sm:$0xff] }
 0x13e   : > { %v867_v8 = vand.u32 15, %v657_v38  ;;  %v2492_v38 = vld [vmem:[#allocation2 + $0x20] sm:$0xff] }
 0x13f   : > { %5643 = vmatpush3.bf16.msra.mxu1 %v5972_v31  ;;  %v1740_v31 = vld [vmem:[#allocation2 + $0xb1] sm:$0xff] }
 0x140   : > { %5687 = vmatpush3.bf16.msra.mxu0 %v5974_v44  ;;  %5644 = vmatprep.subr.bf16.mxu1 %v5975_v61  ;;  %v6803_v20 = vpack.c.bf16 %v1740_v31, %v1739_v59  ;;  %v1746_v59 = vld [vmem:[#allocation2 + $0xe1] sm:$0xff]  ;;  %v1747_v31 = vld [vmem:[#allocation2 + $0xe9] sm:$0xff] }
 0x141   : > { %5609 = vmatmul.mubr.msk.bf16.gmra.mxu0 %vm6437_vm14, %v6458_v9  ;;  %5688 = vmatprep.subr.bf16.mxu0 %v5976_v50  ;;  %v651_v9 = vadd.s32 184, %v6177_v5  ;;  %vm6795_vm14 = vmpackc.low %vm1772_vm9, %vm7946_vm12  ;;  %vm1776_vm9 = vcmp.lt.s32.totalorder %v839_v58, 15 }
 0x142   : > { %5612 = vmatprep.mubr.msk.bf16.mxu0 %vm6454_vm15, %v6492_v0  ;;  %5565 = vmatmul.mubr.msk.bf16.gmra.mxu1 %vm6746_vm11, %v6750_v52  ;;  %v1737_v0 = vld [vmem:[#allocation2 + $0x99] sm:$0xff]  ;;  %vm6788_vm15 = vmpackc.low %vm1770_vm13, %vm7946_vm12  ;;  %v7974_v36 = vsel %vm6795_vm14, 4294967295, %v7973_v36 }
 0x143   : > { %5568 = vmatprep.mubr.msk.bf16.mxu1 %vm6753_vm10, %v6763_v40  ;;  %5645 = vmatpush3.bf16.msra.mxu1 %v5975_v61  ;;  %v7972_v51 = vsel %vm6788_vm15, 4294967295, %v7971_v51  ;;  %v6792_v44 = vpack.c.bf16 %v1738_v57, %v1737_v0  ;;  %v825_v61 = vand.u32 15, %v651_v9  ;;  %v7977_v9 = vmov 0 }
 0x144   : > { %5689 = vmatpush3.bf16.msra.mxu0 %v5976_v50  ;;  %5646 = vmatprep.subr.bf16.mxu1 %v5978_v30  ;;  %v1741_v50 = vld [vmem:[#allocation2 + $0xb9] sm:$0xff] }
 0x145   : > { %5690 = vmatprep.subr.bf16.mxu0 %v5977_v24  ;;  %vm1774_vm13 = vcmp.lt.s32.totalorder %v825_v61, 15  ;;  %v1748_v61 = vld [vmem:[#allocation2 + $0xf1] sm:$0xff] }
 0x147   : > { %5647 = vmatpush3.bf16.msra.mxu1 %v5978_v30  ;;  %v1744_v30 = vld [vmem:[#allocation2 + $0xd1] sm:$0xff] }
 0x148   : > { %5691 = vmatpush3.bf16.msra.mxu0 %v5977_v24  ;;  %5728 = vmatprep.subr.bf16.mxu1 %v6781_v15  ;;  %v6829_v24 = vpack.c.bf16 %v1742_v41, %v1741_v50  ;;  %v6839_v57 = vpack.c.bf16 %v1744_v30, %v1743_v55  ;;  %v1749_v50 = vld [vmem:[#allocation2 + $0xf9] sm:$0xff]  ;;  %v1750_v41 = vld [vmem:[#allocation2 + $0x101] sm:$0xff] }
 0x149   : > { %5613 = vmatmul.mubr.msk.bf16.gmra.mxu0 %vm6485_vm5, %v6499_v10  ;;  %5692 = vmatprep.subr.bf16.mxu0 %v5979_v42  ;;  %v655_v10 = vadd.s32 216, %v6177_v5  ;;  %vm6832_vm5 = vmpackc.low %vm1776_vm9, %vm7946_vm12  ;;  %v6883_v55 = vpack.c.bf16 %v1750_v41, %v1749_v50  ;;  %v5983_v50 = vld [vmem:[%s7866_s3 + $0x1a8] sm:$0xff]   ;;  %v2498_v41 = vld [vmem:[#allocation2 + $0x50] sm:$0xff] }
 0x14a   : > { %5616 = vmatprep.mubr.msk.bf16.mxu0 %vm6495_vm8, %v6531_v3  ;;  %5569 = vmatmul.mubr.msk.bf16.gmra.mxu1 %vm6788_vm15, %v6792_v44  ;;  %v6822_v3 = vld [vmem:[%s7866_s3 + $0x1f8] sm:$0xff]   ;;  %vm6825_vm8 = vmpackc.low %vm1774_vm13, %vm7946_vm12  ;;  %v7978_v9 = vsel %vm6832_vm5, 4294967295, %v7977_v9  ;;  %vm7980_vm13 = vnez %v7941_v54 }
 0x14b   : > { %5572 = vmatprep.mubr.msk.bf16.mxu1 %vm6795_vm14, %v6803_v20  ;;  %v7976_v32 = vsel %vm6825_vm8, 4294967295, %v7975_v32  ;;  %v853_v0 = vand.u32 15, %v655_v10  ;;  %vm7979_vm14 = vnez %v7939_v56 }
 0x14c   : > { %5693 = vmatpush3.bf16.msra.mxu0 %v5979_v42  ;;  %v1745_v42 = vld [vmem:[#allocation2 + $0xd9] sm:$0xff] }
 0x14d   : > { %5694 = vmatprep.subr.bf16.mxu0 %v5980_v26  ;;  %vm1778_vm9 = vcmp.lt.s32.totalorder %v853_v0, 15  ;;  %v2183_v0 = vld [vmem:[#allocation2 + $0x107] sm:$0xff] }
 0x14e   : > { %vm6853_vm15 = vmpackc.low %vm1778_vm9, %vm7946_vm12  ;;  %vm7986_vm9 = vnez %v7945_v16 }
 0x150   : > { %5695 = vmatpush3.bf16.msra.mxu0 %v5980_v26  ;;  %v7983_v26 = vmov 0 }
 0x151   : > { %5617 = vmatmul.mubr.msk.bf16.gmra.mxu0 %vm7979_vm14, %v6538_v13  ;;  %5776 = vmatprep.subr.bf16.mxu0 %v6822_v3  ;;  %v659_v13 = vadd.s32 248, %v6177_v5  ;;  %vm1780_vm14 = vcmp.lt.s32.totalorder %v867_v8, 15  ;;  %v6867_v5 = vpack.c.bf16 %v1748_v61, %v1747_v31  ;;  %v2184_v8 = vld [vmem:[#allocation2 + $0x10f] sm:$0xff] }
 0x152   : > { %5620 = vmatprep.mubr.msk.bf16.mxu0 %vm7980_vm13, %v6563_v21  ;;  %5573 = vmatmul.mubr.msk.bf16.gmra.mxu1 %vm6825_vm8, %v6829_v24  ;;  %v6857_v21 = vpack.c.bf16 %v1746_v59, %v1745_v42  ;;  %vm6860_vm13 = vmpackc.low %vm1780_vm14, %vm7946_vm12  ;;  %v2496_v42 = vld [vmem:[#allocation2 + $0x40] sm:$0xff]  ;;  %v6894_v59 = vpack.c.bf16 %v2184_v8, %v2183_v0  ;;  %v2493_v31 = vld [vmem:[#allocation2 + $0x28] sm:$0xff] }
 0x153   : > { %5576 = vmatprep.mubr.msk.bf16.mxu1 %vm6832_vm5, %v6839_v57  ;;  %v7984_v26 = vsel %vm6860_vm13, 4294967295, %v7983_v26  ;;  %v881_v10 = vand.u32 15, %v659_v13  ;;  %vm7985_vm5 = vnez %v7943_v6  ;;  %v2494_v13 = vld [vmem:[#allocation2 + $0x30] sm:$0xff]  ;;  %v2499_v0 = vld [vmem:[#allocation2 + $0x58] sm:$0xff] }
 0x154   : > { %v6896_v61 = vpack.c.bf16 %v2494_v13, %v2493_v31  ;;  %v5987_v8 = vld [vmem:[%s7866_s3 + $0x1f0] sm:$0xff]   ;;  %v2504_v31 = vld [vmem:[#allocation2 + $0x80] sm:$0xff] }
 0x155   : > { %vm1782_vm14 = vcmp.lt.s32.totalorder %v881_v10, 15  ;;  %v5982_v10 = vld [vmem:[%s7866_s3 + $0x1b0] sm:$0xff]  }
 0x156   : > { %v2502_v13 = vld [vmem:[#allocation2 + $0x70] sm:$0xff] }
 0x159   : > { %5621 = vmatmul.mubr.msk.bf16.gmra.mxu0 %vm7985_vm5, %v6570_v18  ;;  %vm6879_vm5 = vmpackc.low %vm1782_vm14, %vm7946_vm12  ;;  %v7987_v18 = vmov 0  ;;  %vm7992_vm12 = vnez %v7952_v35  ;;  %vm7993_vm14 = vnez %v7972_v51 }
 0x15a   : > { %5624 = vmatprep.mubr.msk.bf16.mxu0 %vm7986_vm9, %v6594_v34  ;;  %5577 = vmatmul.mubr.msk.bf16.gmra.mxu1 %vm6853_vm15, %v6857_v21  ;;  %v7988_v18 = vsel %vm6879_vm5, 4294967295, %v7987_v18  ;;  %v2491_v34 = vld [vmem:[#allocation2 + $0x18] sm:$0xff]  ;;  %vm7990_vm9 = vnez %v7948_v62 }
 0x15b   : > { %5580 = vmatprep.mubr.msk.bf16.mxu1 %vm6860_vm13, %v6867_v5  ;;  %7989 = vst [vmem:[#allocation3_spill] sm:$0xff] %v7988_v18  ;;  %v2523_v30 = vpack.c.bf16 %v2492_v38, %v2491_v34  ;;  %vm7991_vm13 = vnez %v7950_v43  ;;  %v2500_v38 = vld [vmem:[#allocation2 + $0x60] sm:$0xff]  ;;  %v2497_v34 = vld [vmem:[#allocation2 + $0x48] sm:$0xff] }
 0x15c   : > { %v3783_v18 = vld [vmem:[#allocation2 + $0x49] sm:$0xff] }
 0x161   : > { %5625 = vmatmul.mubr.msk.bf16.gmra.mxu0 %vm7990_vm9, %v6601_v22  ;;  %v2495_v22 = vld [vmem:[#allocation2 + $0x38] sm:$0xff] }
 0x162   : > { %5628 = vmatprep.mubr.msk.bf16.mxu0 %vm7991_vm13, %v6627_v37  ;;  %5581 = vmatmul.mubr.msk.bf16.gmra.mxu1 %vm6879_vm5, %v6883_v55  ;;  %v6904_v37 = vpack.c.bf16 %v2496_v42, %v2495_v22  ;;  %v5989_v42 = vld [vmem:[%s7866_s3 + $0x1e8] sm:$0xff]  }
 0x163   : > { %5648 = vmatprep.mubr.bf16.mxu1 %v2523_v30  ;;  %v6915_v30 = vpack.c.bf16 %v2498_v41, %v2497_v34  ;;  %v5990_v41 = vld [vmem:[%s7866_s3 + $0x1e0] sm:$0xff]   ;;  %v5992_v34 = vld [vmem:[%s7866_s3 + $0x1d8] sm:$0xff]  }
 0x169   : > { %5629 = vmatmul.mubr.msk.bf16.gmra.mxu0 %vm6623_vm1, %v6894_v59 }
 0x16a   : > { %5696 = vmatprep.mubr.msk.bf16.mxu0 %vm7992_vm12, %v6634_v48  ;;  %5649 = vmatmul.mubr.bf16.vlgmr.msra.gmra.mxu1 %v6896_v61  ;;  %v5984_v48 = vld [vmem:[%s7866_s3 + $0x1a0] sm:$0xff]  }
 0x16b   : > { %5729 = vmatpush3.bf16.msra.mxu1 %v6781_v15  ;;  %5652 = vmatprep.mubr.bf16.mxu1 %v6904_v37  ;;  %v6923_v15 = vpack.c.bf16 %v2500_v38, %v2499_v0  ;;  %v2506_v38 = vld [vmem:[#allocation2 + $0x90] sm:$0xff]  ;;  %v2507_v0 = vld [vmem:[#allocation2 + $0x98] sm:$0xff] }
 0x16c   : > { %5730 = vmatprep.subr.bf16.mxu1 %v5982_v10 }
 0x16f   : > { %5731 = vmatpush3.bf16.msra.mxu1 %v5982_v10  ;;  %v2503_v10 = vld [vmem:[#allocation2 + $0x78] sm:$0xff] }
 0x170   : > { %5732 = vmatprep.subr.bf16.mxu1 %v5983_v50 }
 0x171   : > { %5697 = vmatmul.mubr.msk.bf16.vlgmr.msra.gmra.mxu0 %vm6630_vm4, %v6647_v49  ;;  %v5985_v49 = vld [vmem:[%s7866_s3 + $0x198] sm:$0xff]  }
 0x172   : > { %5700 = vmatprep.mubr.msk.bf16.mxu0 %vm6637_vm0, %v6669_v39  ;;  %5653 = vmatmul.mubr.bf16.gmra.mxu1 %v6915_v30  ;;  %v2501_v39 = vld [vmem:[#allocation2 + $0x68] sm:$0xff] }
 0x173   : > { %5656 = vmatprep.mubr.bf16.mxu1 %v6923_v15  ;;  %5733 = vmatpush3.bf16.msra.mxu1 %v5983_v50  ;;  %v6940_v22 = vpack.c.bf16 %v2502_v13, %v2501_v39  ;;  %v5988_v50 = vld [vmem:[%s7866_s3 + $0x190] sm:$0xff]  }
 0x174   : > { %5734 = vmatprep.subr.bf16.mxu1 %v5984_v48  ;;  %5777 = vmatpush3.bf16.msra.mxu0 %v6822_v3  ;;  %v6948_v3 = vpack.c.bf16 %v2504_v31, %v2503_v10  ;;  %v2509_v31 = vld [vmem:[#allocation2 + $0xa8] sm:$0xff]  ;;  %v2510_v39 = vld [vmem:[#allocation2 + $0xb0] sm:$0xff] }
 0x175   : > { %5778 = vmatprep.subr.bf16.mxu0 %v5987_v8  ;;  %v5995_v10 = vld [vmem:[%s7866_s3 + $0x1c8] sm:$0xff]  }
 0x177   : > { %5735 = vmatpush3.bf16.msra.mxu1 %v5984_v48  ;;  %v2508_v48 = vld [vmem:[#allocation2 + $0xa0] sm:$0xff] }
 0x178   : > { %5736 = vmatprep.subr.bf16.mxu1 %v5985_v49  ;;  %5779 = vmatpush3.bf16.msra.mxu0 %v5987_v8  ;;  %v6972_v13 = vpack.c.bf16 %v2508_v48, %v2507_v0  ;;  %v2514_v0 = vld [vmem:[#allocation2 + $0xd0] sm:$0xff]  ;;  %v2516_v48 = vld [vmem:[#allocation2 + $0xe0] sm:$0xff] }
 0x179   : > { %5701 = vmatmul.mubr.msk.bf16.gmra.mxu0 %vm6665_vm2, %v6682_v27  ;;  %5780 = vmatprep.subr.bf16.mxu0 %v5989_v42  ;;  %v5991_v27 = vld [vmem:[%s7866_s3 + $0x188] sm:$0xff]  }
 0x17a   : > { %5704 = vmatprep.mubr.msk.bf16.mxu0 %vm6672_vm3, %v6710_v60  ;;  %5657 = vmatmul.mubr.bf16.gmra.mxu1 %v6940_v22  ;;  %v2505_v60 = vld [vmem:[#allocation2 + $0x88] sm:$0xff] }
 0x17b   : > { %5660 = vmatprep.mubr.bf16.mxu1 %v6948_v3  ;;  %5737 = vmatpush3.bf16.msra.mxu1 %v5985_v49  ;;  %v6964_v8 = vpack.c.bf16 %v2506_v38, %v2505_v60  ;;  %v5994_v49 = vld [vmem:[%s7866_s3 + $0x180] sm:$0xff]  }
 0x17c   : > { %5738 = vmatprep.subr.bf16.mxu1 %v5988_v50  ;;  %5781 = vmatpush3.bf16.msra.mxu0 %v5989_v42  ;;  %v5993_v42 = vld [vmem:[%s7866_s3 + $0x1d0] sm:$0xff]   ;;  %v5996_v38 = vld [vmem:[%s7866_s3 + $0x1c0] sm:$0xff]  }
 0x17d   : > { %5782 = vmatprep.subr.bf16.mxu0 %v5990_v41 }
 0x17f   : > { %5739 = vmatpush3.bf16.msra.mxu1 %v5988_v50  ;;  %v2512_v50 = vld [vmem:[#allocation2 + $0xc0] sm:$0xff] }
 0x180   : > { %5783 = vmatpush3.bf16.msra.mxu0 %v5990_v41  ;;  %5740 = vmatprep.subr.bf16.mxu1 %v5991_v27  ;;  %v6990_v41 = vpack.c.bf16 %v2510_v39, %v2509_v31  ;;  %v2519_v31 = vld [vmem:[#allocation2 + $0xf8] sm:$0xff]  ;;  %v2520_v39 = vld [vmem:[#allocation2 + $0x100] sm:$0xff] }
 0x181   : > { %5705 = vmatmul.mubr.msk.bf16.gmra.mxu0 %vm6706_vm7, %v6723_v47  ;;  %5784 = vmatprep.subr.bf16.mxu0 %v5992_v34  ;;  %v6985_v47 = vld [vmem:[%s7866_s3 + $0x238] sm:$0xff]  }
 0x182   : > { %5708 = vmatprep.mubr.msk.bf16.mxu0 %vm6713_vm6, %v6750_v52  ;;  %5661 = vmatmul.mubr.bf16.gmra.mxu1 %v6964_v8  ;;  %v2511_v52 = vld [vmem:[#allocation2 + $0xb8] sm:$0xff] }
 0x183   : > { %5664 = vmatprep.mubr.bf16.mxu1 %v6972_v13  ;;  %5741 = vmatpush3.bf16.msra.mxu1 %v5991_v27  ;;  %v6996_v27 = vpack.c.bf16 %v2512_v50, %v2511_v52  ;;  %v2522_v52 = vld [vmem:[#allocation2 + $0x110] sm:$0xff]  ;;  %v3135_v50 = vld [vmem:[#allocation2 + $0x27] sm:$0xff] }
 0x184   : > { %5785 = vmatpush3.bf16.msra.mxu0 %v5992_v34  ;;  %5742 = vmatprep.subr.bf16.mxu1 %v5994_v49  ;;  %v2513_v34 = vld [vmem:[#allocation2 + $0xc8] sm:$0xff] }
 0x185   : > { %5786 = vmatprep.subr.bf16.mxu0 %v5993_v42  ;;  %v7006_v60 = vpack.c.bf16 %v2514_v0, %v2513_v34  ;;  %v3136_v34 = vld [vmem:[#allocation2 + $0x2f] sm:$0xff] }
 0x186   : > { %v2828_v0 = vld [vmem:[#allocation2 + $0x111] sm:$0xff] }
 0x187   : > { %5743 = vmatpush3.bf16.msra.mxu1 %v5994_v49 }
 0x188   : > { %5787 = vmatpush3.bf16.msra.mxu0 %v5993_v42  ;;  %5824 = vmatprep.subr.bf16.mxu1 %v6985_v47  ;;  %v2518_v42 = vld [vmem:[#allocation2 + $0xf0] sm:$0xff] }
 0x189   : > { %5709 = vmatmul.mubr.msk.bf16.gmra.mxu0 %vm6746_vm11, %v6763_v40  ;;  %5788 = vmatprep.subr.bf16.mxu0 %v5995_v10  ;;  %v2515_v40 = vld [vmem:[#allocation2 + $0xd8] sm:$0xff] }
 0x18a   : > { %5712 = vmatprep.mubr.msk.bf16.mxu0 %vm6753_vm10, %v6792_v44  ;;  %5665 = vmatmul.mubr.bf16.gmra.mxu1 %v6990_v41  ;;  %v7011_v49 = vpack.c.bf16 %v2516_v48, %v2515_v40  ;;  %vm7994_vm10 = vnez %v7974_v36  ;;  %v2517_v44 = vld [vmem:[#allocation2 + $0xe8] sm:$0xff]  ;;  %v3138_v40 = vld [vmem:[#allocation2 + $0x3f] sm:$0xff] }
 0x18b   : > { %5668 = vmatprep.mubr.bf16.mxu1 %v6996_v27  ;;  %v3139_v48 = vld [vmem:[#allocation2 + $0x47] sm:$0xff] }
 0x18c   : > { %5789 = vmatpush3.bf16.msra.mxu0 %v5995_v10  ;;  %v7018_v10 = vpack.c.bf16 %v2518_v42, %v2517_v44  ;;  %v3137_v42 = vld [vmem:[#allocation2 + $0x37] sm:$0xff] }
 0x18d   : > { %5790 = vmatprep.subr.bf16.mxu0 %v5996_v38 }
 0x190   : > { %5791 = vmatpush3.bf16.msra.mxu0 %v5996_v38 }
 0x191   : > { %5713 = vmatmul.mubr.msk.bf16.gmra.mxu0 %vm7993_vm14, %v6803_v20  ;;  %v7023_v20 = vpack.c.bf16 %v2520_v39, %v2519_v31  ;;  %vm7995_vm14 = vnez %v7978_v9  ;;  %v4995_v31 = vpack.c.bf16 %v3138_v40, %v3137_v42  ;;  %v3140_v39 = vld [vmem:[#allocation2 + $0x4f] sm:$0xff] }
 0x192   : > { %5716 = vmatprep.mubr.msk.bf16.mxu0 %vm7994_vm10, %v6829_v24  ;;  %5669 = vmatmul.mubr.bf16.gmra.mxu1 %v7006_v60  ;;  %v2521_v24 = vld [vmem:[#allocation2 + $0x108] sm:$0xff] }
 0x193   : > { %5672 = vmatprep.mubr.bf16.mxu1 %v7011_v49  ;;  %v7030_v38 = vpack.c.bf16 %v2522_v52, %v2521_v24  ;;  %v5999_v52 = vld [vmem:[%s7866_s3 + $0x228] sm:$0xff]  }
 0x199   : > { %5717 = vmatmul.mubr.msk.bf16.gmra.mxu0 %vm6825_vm8, %v6839_v57  ;;  %v4992_v57 = vpack.c.bf16 %v3136_v34, %v3135_v50  ;;  %vm7996_vm8 = vnez %v7984_v26  ;;  %v3142_v34 = vld [vmem:[#allocation2 + $0x5f] sm:$0xff] }
 0x19a   : > { %5720 = vmatprep.mubr.msk.bf16.mxu0 %vm7995_vm14, %v6857_v21  ;;  %5673 = vmatmul.mubr.bf16.gmra.mxu1 %v7018_v10  ;;  %vm7997_vm14 = vnez %v7909_v11  ;;  %v2827_v21 = vld [vmem:[#allocation2 + $0x109] sm:$0xff]  ;;  %v4998_v11 = vpack.c.bf16 %v3140_v39, %v3139_v48 }
 0x19b   : > { %5676 = vmatprep.mubr.bf16.mxu1 %v7023_v20  ;;  %v7041_v44 = vpack.c.bf16 %v2828_v0, %v2827_v21  ;;  %v3141_v0 = vld [vmem:[#allocation2 + $0x57] sm:$0xff] }
 0x1a1   : > { %5721 = vmatmul.mubr.msk.bf16.gmra.mxu0 %vm6853_vm15, %v6867_v5  ;;  %v5998_v5 = vld [vmem:[%s7866_s3 + $0x230] sm:$0xff]  }
 0x1a2   : > { %5724 = vmatprep.mubr.msk.bf16.mxu0 %vm7996_vm8, %v6883_v55  ;;  %5677 = vmatmul.mubr.bf16.gmra.mxu1 %v7030_v38  ;;  %vm7999_vm8 = vnez %v7917_v29  ;;  %v6000_v29 = vld [vmem:[%s7866_s3 + $0x220] sm:$0xff]  }
 0x1a3   : > { %5744 = vmatprep.mubr.msk.bf16.mxu1 %vm7997_vm14, %v4992_v57  ;;  %vm7998_vm14 = vnez %v7915_v12  ;;  %v3143_v57 = vld [vmem:[#allocation2 + $0x67] sm:$0xff]  ;;  %v3144_v12 = vld [vmem:[#allocation2 + $0x6f] sm:$0xff] }
 0x1a4   : > { %v5004_v40 = vpack.c.bf16 %v3144_v12, %v3143_v57  ;;  %v6002_v12 = vld [vmem:[%s7866_s3 + $0x210] sm:$0xff]  }
 0x1a9   : > { %5725 = vmatmul.mubr.msk.bf16.gmra.mxu0 %vm6879_vm5, %v7041_v44  ;;  %v5458_v55 = vpop.f32.mrf.mxu1 }
 0x1aa   : > { %5792 = vmatprep.mubr.bf16.mxu0 %v6896_v61  ;;  %5745 = vmatmul.mubr.msk.bf16.vlgmr.msra.gmra.mxu1 %vm7998_vm14, %v4995_v31  ;;  %v5001_v61 = vpack.c.bf16 %v3142_v34, %v3141_v0  ;;  %vm8001_vm14 = vnez %v7925_v33  ;;  %v3145_v0 = vld [vmem:[#allocation2 + $0x77] sm:$0xff] }
 0x1ab   : > { %5825 = vmatpush3.bf16.msra.mxu1 %v6985_v47  ;;  %5748 = vmatprep.mubr.msk.bf16.mxu1 %vm7999_vm8, %v4998_v11  ;;  %v1383_v24 = vpop.f32.mrf.mxu1  ;;  %vm8000_vm8 = vnez %v7923_v7  ;;  %v3146_v11 = vld [vmem:[#allocation2 + $0x7f] sm:$0xff]  ;;  %v3147_v7 = vld [vmem:[#allocation2 + $0x87] sm:$0xff] }
 0x1ac   : > { %5826 = vmatprep.subr.bf16.mxu1 %v5998_v5 }
 0x1ad   : > { %v5459_v50 = vpop.f32.mrf.mxu1 }
 0x1af   : > { %v1386_v21 = vpop.f32.mrf.mxu1  ;;  %5827 = vmatpush3.bf16.msra.mxu1 %v5998_v5 }
 0x1b0   : > { %5828 = vmatprep.subr.bf16.mxu1 %v5999_v52 }
 0x1b1   : > { %v5506_v47 = vpop.f32.mrf.mxu0  ;;  %5793 = vmatmul.mubr.bf16.vlgmr.msra.gmra.mxu0 %v6904_v37  ;;  %v6001_v37 = vld [vmem:[%s7866_s3 + $0x218] sm:$0xff]  }
 0x1b2   : > { %v7062_v48 = vadd.f32 %v5506_v47, %v5458_v55  ;;  %5796 = vmatprep.mubr.bf16.mxu0 %v6915_v30  ;;  %v5462_v42 = vpop.f32.mrf.mxu1  ;;  %5749 = vmatmul.mubr.msk.bf16.gmra.mxu1 %vm8000_vm8, %v5001_v61  ;;  %v3148_v61 = vld [vmem:[#allocation2 + $0x8f] sm:$0xff]  ;;  %vm8002_vm8 = vnez %v7931_v45 }
 0x1b3   : > { %v1592_v31 = vpop.f32.mrf.mxu0  ;;  %5752 = vmatprep.mubr.msk.bf16.mxu1 %vm8001_vm14, %v5004_v40  ;;  %5829 = vmatpush3.bf16.msra.mxu1 %v5999_v52  ;;  %vm8003_vm14 = vnez %v7933_v63 }
 0x1b4   : > { %v7069_v39 = vadd.f32 %v1592_v31, %v1383_v24  ;;  %v1399_v5 = vpop.f32.mrf.mxu1  ;;  %5830 = vmatprep.subr.bf16.mxu1 %v6000_v29  ;;  %v5007_v24 = vpack.c.bf16 %v3146_v11, %v3145_v0  ;;  %v3149_v11 = vld [vmem:[#allocation2 + $0x97] sm:$0xff]  ;;  %v3152_v0 = vld [vmem:[#allocation2 + $0xaf] sm:$0xff] }
 0x1b5   : > { %v5507_v55 = vpop.f32.mrf.mxu0 }
 0x1b6   : > { %v7074_v30 = vadd.f32 %v5507_v55, %v5459_v50  ;;  %v5463_v34 = vpop.f32.mrf.mxu1  ;;  %v5010_v50 = vpack.c.bf16 %v3148_v61, %v3147_v7  ;;  %v6004_v61 = vld [vmem:[%s7866_s3 + $0x200] sm:$0xff]  }
 0x1b7   : > { %v1595_v57 = vpop.f32.mrf.mxu0  ;;  %5831 = vmatpush3.bf16.msra.mxu1 %v6000_v29 }
 0x1b8   : > { %v7076_v33 = vadd.f32 %v1595_v57, %v1386_v21  ;;  %v1402_v52 = vpop.f32.mrf.mxu1  ;;  %5832 = vmatprep.subr.bf16.mxu1 %v6001_v37  ;;  %v3151_v57 = vld [vmem:[#allocation2 + $0xa7] sm:$0xff] }
 0x1b9   : > { %v5510_v47 = vpop.f32.mrf.mxu0  ;;  %5797 = vmatmul.mubr.bf16.gmra.mxu0 %v6923_v15  ;;  %v6003_v15 = vld [vmem:[%s7866_s3 + $0x208] sm:$0xff]  }
 0x1ba   : > { %v7082_v40 = vadd.f32 %v5510_v47, %v5462_v42  ;;  %5800 = vmatprep.mubr.bf16.mxu0 %v6940_v22  ;;  %v5466_v31 = vpop.f32.mrf.mxu1  ;;  %5753 = vmatmul.mubr.msk.bf16.gmra.mxu1 %vm8002_vm8, %v5007_v24  ;;  %v3150_v22 = vld [vmem:[#allocation2 + $0x9f] sm:$0xff]  ;;  %vm8004_vm8 = vnez %v7935_v1 }
 0x1bb   : > { %v1608_v21 = vpop.f32.mrf.mxu0  ;;  %5756 = vmatprep.mubr.msk.bf16.mxu1 %vm8003_vm14, %v5010_v50  ;;  %5833 = vmatpush3.bf16.msra.mxu1 %v6001_v37  ;;  %v5013_v37 = vpack.c.bf16 %v3150_v22, %v3149_v11  ;;  %v5016_v50 = vpack.c.bf16 %v3152_v0, %v3151_v57  ;;  %vm8005_vm14 = vnez %v7937_v46  ;;  %v3154_v22 = vld [vmem:[#allocation2 + $0xbf] sm:$0xff]  ;;  %v3156_v0 = vld [vmem:[#allocation2 + $0xcf] sm:$0xff] }
 0x1bc   : > { %v7089_v29 = vadd.f32 %v1608_v21, %v1399_v5  ;;  %v1415_v55 = vpop.f32.mrf.mxu1  ;;  %5834 = vmatprep.subr.bf16.mxu1 %v6002_v12 }
 0x1bd   : > { %v5511_v42 = vpop.f32.mrf.mxu0 }
 0x1be   : > { %v7094_v7 = vadd.f32 %v5511_v42, %v5463_v34  ;;  %v5467_v45 = vpop.f32.mrf.mxu1 }
 0x1bf   : > { %v1611_v24 = vpop.f32.mrf.mxu0  ;;  %5835 = vmatpush3.bf16.msra.mxu1 %v6002_v12 }
 0x1c0   : > { %v7096_v63 = vadd.f32 %v1611_v24, %v1402_v52  ;;  %v1418_v5 = vpop.f32.mrf.mxu1  ;;  %5836 = vmatprep.subr.bf16.mxu1 %v6003_v15 }
 0x1c1   : > { %v5514_v47 = vpop.f32.mrf.mxu0  ;;  %5801 = vmatmul.mubr.bf16.gmra.mxu0 %v6948_v3  ;;  %v3153_v3 = vld [vmem:[#allocation2 + $0xb7] sm:$0xff] }
 0x1c2   : > { %v7102_v34 = vadd.f32 %v5514_v47, %v5466_v31  ;;  %5804 = vmatprep.mubr.bf16.mxu0 %v6964_v8  ;;  %v5470_v21 = vpop.f32.mrf.mxu1  ;;  %5757 = vmatmul.mubr.msk.bf16.gmra.mxu1 %vm8004_vm8, %v5013_v37  ;;  %v3155_v8 = vld [vmem:[#allocation2 + $0xc7] sm:$0xff]  ;;  %v5019_v46 = vpack.c.bf16 %v3154_v22, %v3153_v3  ;;  %vm8006_vm8 = vnez %v7939_v56  ;;  %v3158_v3 = vld [vmem:[#allocation2 + $0xdf] sm:$0xff] }
 0x1c3   : > { %v1624_v52 = vpop.f32.mrf.mxu0  ;;  %5760 = vmatprep.mubr.msk.bf16.mxu1 %vm8005_vm14, %v5016_v50  ;;  %5837 = vmatpush3.bf16.msra.mxu1 %v6003_v15  ;;  %vm8007_vm14 = vnez %v7941_v54  ;;  %v3159_v22 = vld [vmem:[#allocation2 + $0xe7] sm:$0xff] }
 0x1c4   : > { %v7109_v12 = vadd.f32 %v1624_v52, %v1415_v55  ;;  %v1431_v42 = vpop.f32.mrf.mxu1  ;;  %5838 = vmatprep.subr.bf16.mxu1 %v6004_v61  ;;  %v5022_v55 = vpack.c.bf16 %v3156_v0, %v3155_v8  ;;  %v3160_v8 = vld [vmem:[#allocation2 + $0xef] sm:$0xff] }
 0x1c5   : > { %v5515_v11 = vpop.f32.mrf.mxu0  ;;  %v5028_v54 = vpack.c.bf16 %v3160_v8, %v3159_v22 }
 0x1c6   : > { %v7111_v31 = vadd.f32 %v5515_v11, %v5467_v45  ;;  %v5471_v57 = vpop.f32.mrf.mxu1  ;;  %v3157_v11 = vld [vmem:[#allocation2 + $0xd7] sm:$0xff] }
 0x1c7   : > { %v1627_v24 = vpop.f32.mrf.mxu0  ;;  %5839 = vmatpush3.bf16.msra.mxu1 %v6004_v61 }
 0x1c8   : > { %v7113_v1 = vadd.f32 %v1627_v24, %v1418_v5  ;;  %v1434_v37 = vpop.f32.mrf.mxu1  ;;  %v5025_v24 = vpack.c.bf16 %v3158_v3, %v3157_v11  ;;  %v3162_v11 = vld [vmem:[#allocation2 + $0xff] sm:$0xff] }
 0x1c9   : > { %v5518_v47 = vpop.f32.mrf.mxu0  ;;  %5805 = vmatmul.mubr.bf16.gmra.mxu0 %v6972_v13 }
 0x1ca   : > { %v7116_v15 = vadd.f32 %v5518_v47, %v5470_v21  ;;  %5808 = vmatprep.mubr.bf16.mxu0 %v6990_v41  ;;  %v5474_v50 = vpop.f32.mrf.mxu1  ;;  %5761 = vmatmul.mubr.msk.bf16.gmra.mxu1 %vm8006_vm8, %v5019_v46  ;;  %vm8008_vm8 = vnez %v7943_v6 }
 0x1cb   : > { %v1640_v45 = vpop.f32.mrf.mxu0  ;;  %5764 = vmatprep.mubr.msk.bf16.mxu1 %vm8007_vm14, %v5022_v55  ;;  %vm8009_vm14 = vnez %v7945_v16 }
 0x1cc   : > { %v7123_v5 = vadd.f32 %v1640_v45, %v1431_v42  ;;  %v1447_v61 = vpop.f32.mrf.mxu1 }
 0x1cd   : > { %v5519_v52 = vpop.f32.mrf.mxu0 }
 0x1ce   : > { %v7125_v13 = vadd.f32 %v5519_v52, %v5471_v57  ;;  %v5475_v21 = vpop.f32.mrf.mxu1  ;;  %v3161_v52 = vld [vmem:[#allocation2 + $0xf7] sm:$0xff] }
 0x1cf   : > { %v1643_v41 = vpop.f32.mrf.mxu0  ;;  %v5031_v22 = vpack.c.bf16 %v3162_v11, %v3161_v52  ;;  %v3779_v52 = vld [vmem:[#allocation2 + $0x29] sm:$0xff] }
 0x1d0   : > { %v7127_v0 = vadd.f32 %v1643_v41, %v1434_v37  ;;  %v7129_v56 = vpop.f32.mrf.mxu1 }
 0x1d1   : > { %v5522_v46 = vpop.f32.mrf.mxu0  ;;  %5809 = vmatmul.mubr.bf16.gmra.mxu0 %v6996_v27 }
 0x1d2   : > { %v7132_v42 = vadd.f32 %v5522_v46, %v5474_v50  ;;  %5812 = vmatprep.mubr.bf16.mxu0 %v7006_v60  ;;  %v5478_v47 = vpop.f32.mrf.mxu1  ;;  %5765 = vmatmul.mubr.msk.bf16.gmra.mxu1 %vm8008_vm8, %v5025_v24  ;;  %v3165_v46 = vld [vmem:[#allocation2 + $0x117] sm:$0xff] }
 0x1d3   : > { %v1656_v57 = vpop.f32.mrf.mxu0  ;;  %5768 = vmatprep.mubr.msk.bf16.mxu1 %vm8009_vm14, %v5028_v54  ;;  %v3166_v54 = vld [vmem:[#allocation2 + $0x11f] sm:$0xff] }
 0x1d4   : > { %v7139_v37 = vadd.f32 %v1656_v57, %v1447_v61  ;;  %v1463_v55 = vpop.f32.mrf.mxu1  ;;  %v3780_v57 = vld [vmem:[#allocation2 + $0x31] sm:$0xff]  ;;  %v5037_v62 = vpack.c.bf16 %v3166_v54, %v3165_v46  ;;  %v3781_v54 = vld [vmem:[#allocation2 + $0x39] sm:$0xff] }
 0x1d5   : > { %v5523_v45 = vpop.f32.mrf.mxu0  ;;  %v5088_v43 = vpack.c.bf16 %v3780_v57, %v3779_v52  ;;  %v3784_v52 = vld [vmem:[#allocation2 + $0x51] sm:$0xff] }
 0x1d6   : > { %v7141_v27 = vadd.f32 %v5523_v45, %v5475_v21  ;;  %v5479_v50 = vpop.f32.mrf.mxu1  ;;  %v5094_v35 = vpack.c.bf16 %v3784_v52, %v3783_v18  ;;  %v3786_v18 = vld [vmem:[#allocation2 + $0x61] sm:$0xff] }
 0x1d7   : > { %v7143_v3 = vpop.f32.mrf.mxu0 }
 0x1d8   : > { %v7145_v60 = vpop.f32.mrf.mxu1 }
 0x1d9   : > { %v5526_v6 = vpop.f32.mrf.mxu0  ;;  %5813 = vmatmul.mubr.bf16.gmra.mxu0 %v7011_v49 }
 0x1da   : > { %v7148_v8 = vadd.f32 %v5526_v6, %v5478_v47  ;;  %5816 = vmatprep.mubr.bf16.mxu0 %v7018_v10  ;;  %v5482_v16 = vpop.f32.mrf.mxu1  ;;  %5769 = vmatmul.mubr.msk.bf16.gmra.mxu1 %vm7990_vm9, %v5031_v22  ;;  %v3504_v22 = vld [vmem:[#allocation2 + $0x120] sm:$0xff] }
 0x1db   : > { %v1672_v61 = vpop.f32.mrf.mxu0  ;;  %5772 = vmatprep.mubr.msk.bf16.mxu1 %vm7991_vm13, %v6894_v59 }
 0x1dc   : > { %v7156_v21 = vadd.f32 %v1672_v61, %v1463_v55  ;;  %v1479_v41 = vpop.f32.mrf.mxu1 }
 0x1dd   : > { %v5527_v24 = vpop.f32.mrf.mxu0 }
 0x1de   : > { %v7158_v49 = vadd.f32 %v5527_v24, %v5479_v50  ;;  %v5483_v47 = vpop.f32.mrf.mxu1  ;;  %v3503_v50 = vld [vmem:[#allocation2 + $0x118] sm:$0xff] }
 0x1df   : > { %v7160_v10 = vpop.f32.mrf.mxu0 }
 0x1e0   : > { %v7162_v45 = vpop.f32.mrf.mxu1 }
 0x1e1   : > { %8010 = vst [vmem:[#allocation4_spill] sm:$0xff] %v7162_v45  ;;  %v5530_v11 = vpop.f32.mrf.mxu0  ;;  %5817 = vmatmul.mubr.bf16.gmra.mxu0 %v7023_v20  ;;  %v3520_v20 = vpack.c.bf16 %v3504_v22, %v3503_v50 }
 0x1e2   : > { %v7165_v59 = vadd.f32 %v5530_v11, %v5482_v16  ;;  %5820 = vmatprep.mubr.bf16.mxu0 %v7030_v38  ;;  %v5486_v55 = vpop.f32.mrf.mxu1  ;;  %5773 = vmatmul.mubr.msk.bf16.gmra.mxu1 %vm6623_vm1, %v5037_v62  ;;  %v3782_v16 = vld [vmem:[#allocation2 + $0x41] sm:$0xff] }
 0x1e3   : > { %v1688_v6 = vpop.f32.mrf.mxu0  ;;  %5840 = vmatprep.mubr.msk.bf16.mxu1 %vm7992_vm12, %v5088_v43  ;;  %v5091_v62 = vpack.c.bf16 %v3782_v16, %v3781_v54  ;;  %v3788_v16 = vld [vmem:[#allocation2 + $0x71] sm:$0xff] }
 0x1e4   : > { %v7172_v61 = vadd.f32 %v1688_v6, %v1479_v41  ;;  %v1495_v24 = vpop.f32.mrf.mxu1 }
 0x1e5   : > { %v5531_v46 = vpop.f32.mrf.mxu0 }
 0x1e6   : > { %v7174_v57 = vadd.f32 %v5531_v46, %v5483_v47  ;;  %v5487_v38 = vpop.f32.mrf.mxu1 }
 0x1e7   : > { %v7176_v11 = vpop.f32.mrf.mxu0 }
 0x1e8   : > { %v7178_v4 = vpop.f32.mrf.mxu1 }
 0x1e9   : > { %v5534_v45 = vpop.f32.mrf.mxu0  ;;  %5821 = vmatmul.mubr.bf16.gmra.mxu0 %v3520_v20  ;;  %v3785_v20 = vld [vmem:[#allocation2 + $0x59] sm:$0xff] }
 0x1ea   : > { %v7180_v41 = vadd.f32 %v5534_v45, %v5486_v55  ;;  %v5554_v43 = vpop.f32.mrf.mxu1  ;;  %5841 = vmatmul.mubr.msk.bf16.vlgmr.msra.gmra.mxu1 %vm6630_vm4, %v5091_v62  ;;  %v5097_v62 = vpack.c.bf16 %v3786_v18, %v3785_v20  ;;  %v3789_v18 = vld [vmem:[#allocation2 + $0x79] sm:$0xff] }
 0x1eb   : > { %v1704_v50 = vpop.f32.mrf.mxu0  ;;  %v2123_v47 = vadd.f32 %v5554_v43, %v7062_v48  ;;  %5844 = vmatprep.mubr.msk.bf16.mxu1 %vm6637_vm0, %v5094_v35  ;;  %v5100_v43 = vpack.c.bf16 %v3788_v16, %v3787_v17  ;;  %vm8011_vm0 = vnez %v7970_v14 }
 0x1ec   : > { %v7187_v22 = vadd.f32 %v1704_v50, %v1495_v24  ;;  %v1994_v6 = vpop.f32.mrf.mxu1 }
 0x1ed   : > { %v5535_v46 = vpop.f32.mrf.mxu0  ;;  %v2121_v54 = vadd.f32 %v1994_v6, %v7069_v39 }
 0x1ee   : > { %v7190_v45 = vadd.f32 %v5535_v46, %v5487_v38  ;;  %v5555_v55 = vpop.f32.mrf.mxu1 }
 0x1ef   : > { %v7192_v53 = vpop.f32.mrf.mxu0  ;;  %v2124_v52 = vadd.f32 %v5555_v55, %v7074_v30  ;;  %v3790_v55 = vld [vmem:[#allocation2 + $0x81] sm:$0xff] }
 0x1f0   : > { %v1997_v48 = vpop.f32.mrf.mxu1  ;;  %v5103_v19 = vpack.c.bf16 %v3790_v55, %v3789_v18  ;;  %v3793_v18 = vld [vmem:[#allocation2 + $0x99] sm:$0xff]  ;;  %v3794_v55 = vld [vmem:[#allocation2 + $0xa1] sm:$0xff] }
 0x1f1   : > { %v5602_v35 = vpop.f32.mrf.mxu0  ;;  %v7196_v24 = vadd.f32 %v1997_v48, %v7076_v33  ;;  %v3791_v48 = vld [vmem:[#allocation2 + $0x89] sm:$0xff]  ;;  %v5109_v23 = vpack.c.bf16 %v3794_v55, %v3793_v18  ;;  %v3798_v18 = vld [vmem:[#allocation2 + $0xc1] sm:$0xff] }
 0x1f2   : > { %v7198_v50 = vadd.f32 %v5602_v35, %v2123_v47  ;;  %v5558_v39 = vpop.f32.mrf.mxu1  ;;  %5845 = vmatmul.mubr.msk.bf16.gmra.mxu1 %vm6665_vm2, %v5097_v62 }
 0x1f3   : > { %v2332_v38 = vpop.f32.mrf.mxu0  ;;  %v2127_v6 = vadd.f32 %v5558_v39, %v7082_v40  ;;  %5848 = vmatprep.mubr.msk.bf16.mxu1 %vm6672_vm3, %v5100_v43  ;;  %v5106_v43 = vpack.c.bf16 %v3792_v25, %v3791_v48  ;;  %v3795_v48 = vld [vmem:[#allocation2 + $0xa9] sm:$0xff]  ;;  %vm8012_vm3 = vnez %v7972_v51 }
 0x1f4   : > { %v7205_v30 = vadd.f32 %v2332_v38, %v2121_v54  ;;  %v2010_v46 = vpop.f32.mrf.mxu1 }
 0x1f5   : > { %v5603_v20 = vpop.f32.mrf.mxu0  ;;  %v2125_v33 = vadd.f32 %v2010_v46, %v7089_v29 }
 0x1f6   : > { %v7208_v47 = vadd.f32 %v5603_v20, %v2124_v52  ;;  %v5559_v16 = vpop.f32.mrf.mxu1 }
 0x1f7   : > { %v7210_v62 = vpop.f32.mrf.mxu0  ;;  %v2128_v40 = vadd.f32 %v5559_v16, %v7094_v7 }
 0x1f8   : > { %v2013_v17 = vpop.f32.mrf.mxu1 }
 0x1f9   : > { %v5606_v35 = vpop.f32.mrf.mxu0  ;;  %v7214_v54 = vadd.f32 %v2013_v17, %v7096_v63 }
 0x1fa   : > { %v7216_v39 = vadd.f32 %v5606_v35, %v2127_v6  ;;  %v5562_v29 = vpop.f32.mrf.mxu1  ;;  %5849 = vmatmul.mubr.msk.bf16.gmra.mxu1 %vm6706_vm7, %v5103_v19  ;;  %v5112_v35 = vpack.c.bf16 %v3796_v2, %v3795_v48  ;;  %v3800_v48 = vld [vmem:[#allocation2 + $0xd1] sm:$0xff]  ;;  %vm8014_vm7 = vnez %v7978_v9 }
 0x1fb   : > { %v2348_v52 = vpop.f32.mrf.mxu0  ;;  %v2131_v38 = vadd.f32 %v5562_v29, %v7102_v34  ;;  %5852 = vmatprep.mubr.msk.bf16.mxu1 %vm6713_vm6, %v5106_v43  ;;  %vm8013_vm6 = vnez %v7976_v32 }
 0x1fc   : > { %v7223_v7 = vadd.f32 %v2348_v52, %v2125_v33  ;;  %v2026_v46 = vpop.f32.mrf.mxu1  ;;  %v6005_v33 = vld [vmem:[%s7868_s5 + $0x38] sm:$0xff]  }
 0x1fd   : > { %v5607_v20 = vpop.f32.mrf.mxu0  ;;  %v2129_v63 = vadd.f32 %v2026_v46, %v7109_v12  ;;  %5872 = vmatprep.subr.bf16.mxu0 %v6005_v33 }
 0x1fe   : > { %v7226_v6 = vadd.f32 %v5607_v20, %v2128_v40  ;;  %v5563_v16 = vpop.f32.mrf.mxu1  ;;  %5873 = vmatpush3.bf16.msra.mxu0 %v6005_v33 }
 0x1ff   : > { %v7228_v25 = vpop.f32.mrf.mxu0  ;;  %v2132_v34 = vadd.f32 %v5563_v16, %v7111_v31  ;;  %v3799_v16 = vld [vmem:[#allocation2 + $0xc9] sm:$0xff] }
 0x200   : > { %v2029_v17 = vpop.f32.mrf.mxu1  ;;  %v5118_v33 = vpack.c.bf16 %v3800_v48, %v3799_v16 }
 0x201   : > { %v5610_v19 = vpop.f32.mrf.mxu0  ;;  %v7235_v12 = vadd.f32 %v2029_v17, %v7113_v1 }
 0x202   : > { %v7237_v40 = vadd.f32 %v5610_v19, %v2131_v38  ;;  %v5566_v43 = vpop.f32.mrf.mxu1  ;;  %5853 = vmatmul.mubr.msk.bf16.gmra.mxu1 %vm6746_vm11, %v5109_v23  ;;  %v3797_v38 = vld [vmem:[#allocation2 + $0xb9] sm:$0xff]  ;;  %vm8072_vm11 = vcmask 130048  }
 0x203   : > { %v2364_v29 = vpop.f32.mrf.mxu0  ;;  %v2135_v31 = vadd.f32 %v5566_v43, %v7116_v15  ;;  %5856 = vmatprep.mubr.msk.bf16.mxu1 %vm8011_vm0, %v5112_v35  ;;  %v5115_v17 = vpack.c.bf16 %v3798_v18, %v3797_v38  ;;  %v3803_v18 = vld [vmem:[#allocation2 + $0xe9] sm:$0xff] }
 0x204   : > { %v7244_v52 = vadd.f32 %v2364_v29, %v2129_v63  ;;  %v2042_v46 = vpop.f32.mrf.mxu1  ;;  %v6006_v63 = vld [vmem:[%s7868_s5 + $0x30] sm:$0xff]  }
 0x205   : > { %v5611_v1 = vpop.f32.mrf.mxu0  ;;  %v2133_v20 = vadd.f32 %v2042_v46, %v7123_v5  ;;  %5874 = vmatprep.subr.bf16.mxu0 %v6006_v63 }
 0x206   : > { %v7247_v55 = vadd.f32 %v5611_v1, %v2132_v34  ;;  %v5567_v28 = vpop.f32.mrf.mxu1  ;;  %5875 = vmatpush3.bf16.msra.mxu0 %v6006_v63  ;;  %v3802_v1 = vld [vmem:[#allocation2 + $0xe1] sm:$0xff] }
 0x207   : > { %v7249_v2 = vpop.f32.mrf.mxu0  ;;  %v2136_v15 = vadd.f32 %v5567_v28, %v7125_v13  ;;  %v3804_v28 = vld [vmem:[#allocation2 + $0xf1] sm:$0xff] }
 0x208   : > { %v2045_v14 = vpop.f32.mrf.mxu1 }
 0x209   : > { %v5614_v23 = vpop.f32.mrf.mxu0  ;;  %v7256_v5 = vadd.f32 %v2045_v14, %v7127_v0 }
 0x20a   : > { %v7258_v34 = vadd.f32 %v5614_v23, %v2135_v31  ;;  %v5570_v19 = vpop.f32.mrf.mxu1  ;;  %5857 = vmatmul.mubr.msk.bf16.gmra.mxu1 %vm8012_vm3, %v5115_v17  ;;  %v3801_v31 = vld [vmem:[#allocation2 + $0xd9] sm:$0xff] }
 0x20b   : > { %v2380_v35 = vpop.f32.mrf.mxu0  ;;  %v2139_v13 = vadd.f32 %v5570_v19, %v7132_v42  ;;  %5860 = vmatprep.mubr.msk.bf16.mxu1 %vm7994_vm10, %v5118_v33  ;;  %v1660_v42 = vadd.f32 %v7143_v3, %v7129_v56  ;;  %v5121_v48 = vpack.c.bf16 %v3802_v1, %v3801_v31  ;;  %v1676_v31 = vadd.f32 %v7160_v10, %v7145_v60  ;;  %v3809_v10 = vld [vmem:[#allocation2 + $0x119] sm:$0xff] }
 0x20c   : > { %v7265_v43 = vadd.f32 %v2380_v35, %v2133_v20  ;;  %v2058_v29 = vpop.f32.mrf.mxu1  ;;  %vm8015_vm10 = vnez %v7984_v26 }
 0x20d   : > { %v5615_v0 = vpop.f32.mrf.mxu0  ;;  %v2137_v46 = vadd.f32 %v2058_v29, %v7139_v37  ;;  %v6007_v37 = vld [vmem:[%s7868_s5 + $0x28] sm:$0xff]  }
 0x20e   : > { %v7268_v38 = vadd.f32 %v5615_v0, %v2136_v15  ;;  %v5571_v51 = vpop.f32.mrf.mxu1  ;;  %v5124_v15 = vpack.c.bf16 %v3804_v28, %v3803_v18  ;;  %5876 = vmatprep.subr.bf16.mxu0 %v6007_v37  ;;  %v3806_v29 = vld [vmem:[#allocation2 + $0x101] sm:$0xff] }
 0x20f   : > { %v7272_v16 = vpop.f32.mrf.mxu0  ;;  %v2140_v36 = vadd.f32 %v5571_v51, %v7141_v27  ;;  %5877 = vmatpush3.bf16.msra.mxu0 %v6007_v37  ;;  %v6008_v18 = vld [vmem:[%s7868_s5 + $0x20] sm:$0xff]  }
 0x210   : > { %v2061_v20 = vpop.f32.mrf.mxu1  ;;  %5878 = vmatprep.subr.bf16.mxu0 %v6008_v18 }
 0x211   : > { %v5618_v14 = vpop.f32.mrf.mxu0  ;;  %v2138_v17 = vadd.f32 %v2061_v20, %v1660_v42  ;;  %v3810_v20 = vld [vmem:[#allocation2 + $0x121] sm:$0xff] }
 0x212   : > { %v7278_v63 = vadd.f32 %v5618_v14, %v2139_v13  ;;  %v5574_v23 = vpop.f32.mrf.mxu1  ;;  %5861 = vmatmul.mubr.msk.bf16.gmra.mxu1 %vm8013_vm6, %v5121_v48  ;;  %v3805_v13 = vld [vmem:[#allocation2 + $0xf9] sm:$0xff] }
 0x213   : > { %v2396_v56 = vpop.f32.mrf.mxu0  ;;  %v2143_v3 = vadd.f32 %v5574_v23, %v7148_v8  ;;  %5864 = vmatprep.mubr.msk.bf16.mxu1 %vm8014_vm7, %v5124_v15  ;;  %5879 = vmatpush3.bf16.msra.mxu0 %v6008_v18  ;;  %v5133_v23 = vpack.c.bf16 %v3810_v20, %v3809_v10 }
 0x214   : > { %v7285_v27 = vadd.f32 %v2396_v56, %v2137_v46  ;;  %v2074_v33 = vpop.f32.mrf.mxu1  ;;  %v5127_v46 = vpack.c.bf16 %v3806_v29, %v3805_v13  ;;  %v8016_v56 = vld [vmem:[#allocation4_spill] sm:$0xff] }
 0x215   : > { %v5619_v19 = vpop.f32.mrf.mxu0  ;;  %v2141_v35 = vadd.f32 %v2074_v33, %v7156_v21 }
 0x216   : > { %v7288_v0 = vadd.f32 %v5619_v19, %v2140_v36  ;;  %v5575_v32 = vpop.f32.mrf.mxu1  ;;  %v6009_v19 = vld [vmem:[%s7868_s5 + $0x18] sm:$0xff]  }
 0x217   : > { %v2399_v1 = vpop.f32.mrf.mxu0  ;;  %v2144_v8 = vadd.f32 %v5575_v32, %v7158_v49  ;;  %5880 = vmatprep.subr.bf16.mxu0 %v6009_v19 }
 0x218   : > { %v7293_v9 = vadd.f32 %v2399_v1, %v2138_v17  ;;  %v2077_v51 = vpop.f32.mrf.mxu1  ;;  %5881 = vmatpush3.bf16.msra.mxu0 %v6009_v19 }
 0x219   : > { %v5622_v21 = vpop.f32.mrf.mxu0  ;;  %v2142_v28 = vadd.f32 %v2077_v51, %v1676_v31 }
 0x21a   : > { %v7298_v42 = vadd.f32 %v5622_v21, %v2143_v3  ;;  %v5578_v36 = vpop.f32.mrf.mxu1  ;;  %5865 = vmatmul.mubr.msk.bf16.gmra.mxu1 %vm6853_vm15, %v5127_v46  ;;  %v1708_v21 = vadd.f32 %v7192_v53, %v7178_v4  ;;  %vm8073_vm15 = vmmov %vm8072_vm11 }
 0x21b   : > { %v2412_v60 = vpop.f32.mrf.mxu0  ;;  %v2147_v49 = vadd.f32 %v5578_v36, %v7165_v59  ;;  %5868 = vmatprep.mubr.msk.bf16.mxu1 %vm8015_vm10, %v7041_v44  ;;  %v1692_v59 = vadd.f32 %v7176_v11, %v8016_v56 }
 0x21c   : > { %v7306_v48 = vadd.f32 %v2412_v60, %v2141_v35  ;;  %v2090_v37 = vpop.f32.mrf.mxu1 }
 0x21d   : > { %v5623_v14 = vpop.f32.mrf.mxu0  ;;  %v2145_v17 = vadd.f32 %v2090_v37, %v7172_v61 }
 0x21e   : > { %v7309_v15 = vadd.f32 %v5623_v14, %v2144_v8  ;;  %v5579_v58 = vpop.f32.mrf.mxu1 }
 0x21f   : > { %v2415_v3 = vpop.f32.mrf.mxu0  ;;  %v2148_v26 = vadd.f32 %v5579_v58, %v7174_v57 }
 0x220   : > { %v7314_v44 = vadd.f32 %v2415_v3, %v2142_v28  ;;  %v2093_v33 = vpop.f32.mrf.mxu1  ;;  %v2460_v3 = vadd.f32 %v7210_v62, %v7196_v24 }
 0x221   : > { %v5626_v35 = vpop.f32.mrf.mxu0  ;;  %v2146_v13 = vadd.f32 %v2093_v33, %v1692_v59  ;;  %v6011_v59 = vld [vmem:[%s7868_s5 + $0x8] sm:$0xff]  }
 0x222   : > { %v7319_v61 = vadd.f32 %v5626_v35, %v2147_v49  ;;  %v5582_v29 = vpop.f32.mrf.mxu1  ;;  %5869 = vmatmul.mubr.msk.bf16.gmra.mxu1 %vm6879_vm5, %v5133_v23  ;;  %vm8074_vm5 = vmmov %vm8072_vm11 }
 0x223   : > { %v2428_v11 = vpop.f32.mrf.mxu0  ;;  %v2151_v31 = vadd.f32 %v5582_v29, %v7180_v41  ;;  %v6010_v41 = vld [vmem:[%s7868_s5 + $0x10] sm:$0xff]   ;;  %vm8075_vm1 = vmmov %vm8074_vm5 }
 0x224   : > { %v7324_v57 = vadd.f32 %v2428_v11, %v2145_v17  ;;  %v2106_v1 = vpop.f32.mrf.mxu1  ;;  %5882 = vmatprep.subr.bf16.mxu0 %v6010_v41  ;;  %vm8076_vm4 = vmmov %vm8075_vm1 }
 0x225   : > { %v5627_v8 = vpop.f32.mrf.mxu0  ;;  %v2149_v51 = vadd.f32 %v2106_v1, %v7187_v22  ;;  %5883 = vmatpush3.bf16.msra.mxu0 %v6010_v41  ;;  %v6012_v1 = vld [vmem:[%s7868_s5] sm:$0xff]   ;;  %vm8077_vm2 = vmmov %vm8075_vm1 }
 0x226   : > { %v7327_v46 = vadd.f32 %v5627_v8, %v2148_v26  ;;  %v5583_v18 = vpop.f32.mrf.mxu1  ;;  %5884 = vmatprep.subr.bf16.mxu0 %v6011_v59  ;;  %vm8078_vm13 = vmmov %vm8075_vm1 }
 0x227   : > { %v2431_v28 = vpop.f32.mrf.mxu0  ;;  %v2152_v36 = vadd.f32 %v5583_v18, %v7190_v45  ;;  %vm8079_vm9 = vmmov %vm8075_vm1 }
 0x228   : > { %v7332_v60 = vadd.f32 %v2431_v28, %v2146_v13  ;;  %v2109_v49 = vpop.f32.mrf.mxu1  ;;  %vm8080_vm12 = vmmov %vm8075_vm1 }
 0x229   : > { %v5630_v10 = vpop.f32.mrf.mxu0  ;;  %v2150_v20 = vadd.f32 %v2109_v49, %v1708_v21  ;;  %5885 = vmatpush3.bf16.msra.mxu0 %v6011_v59  ;;  %vm8081_vm8 = vmmov %vm8075_vm1 }
 0x22a   : > { %v7337_v37 = vadd.f32 %v5630_v10, %v2151_v31  ;;  %v5650_v22 = vpop.f32.mrf.mxu1  ;;  %5886 = vmatprep.subr.bf16.mxu0 %v6012_v1  ;;  %vm8082_vm14 = vmmov %vm8075_vm1 }
 0x22b   : > { %v2444_v14 = vpop.f32.mrf.mxu0  ;;  %v2767_v17 = vadd.f32 %v5650_v22, %v7198_v50  ;;  %vm8083_vm0 = vmmov %vm8075_vm1 }
 0x22c   : > { %v7340_v4 = vadd.f32 %v2444_v14, %v2149_v51  ;;  %v2638_v45 = vpop.f32.mrf.mxu1  ;;  %v2464_v51 = vadd.f32 %v7228_v25, %v7214_v54  ;;  %v2468_v14 = vadd.f32 %v7249_v2, %v7235_v12  ;;  %vm8084_vm3 = vmmov %vm8083_vm0 }
 0x22d   : > { %v5631_v53 = vpop.f32.mrf.mxu0  ;;  %v2765_v58 = vadd.f32 %v2638_v45, %v7205_v30  ;;  %5887 = vmatpush3.bf16.msra.mxu0 %v6012_v1  ;;  %vm8085_vm6 = vmmov %vm8083_vm0 }
 0x22e   : > { %v7343_v23 = vadd.f32 %v5631_v53, %v2152_v36  ;;  %v5651_v56 = vpop.f32.mrf.mxu1  ;;  %vm8086_vm7 = vmmov %vm8083_vm0 }
 0x22f   : > { %v2447_v26 = vpop.f32.mrf.mxu0  ;;  %v7351_v50 = vadd.f32 %v5651_v56, %v7208_v47  ;;  %vm8087_vm10 = vmmov %vm8083_vm0 }
 0x230   : > { %v7353_v33 = vadd.f32 %v2447_v26, %v2150_v20  ;;  %v2641_v19 = vpop.f32.mrf.mxu1 }
 0x231   : > { %v5698_v35 = vpop.f32.mrf.mxu0  ;;  %v7355_v30 = vadd.f32 %v2641_v19, %v2460_v3 }
 0x232   : > { %v7357_v13 = vadd.f32 %v5698_v35, %v2767_v17  ;;  %v5654_v29 = vpop.f32.mrf.mxu1 }
 0x233   : > { %v2976_v32 = vpop.f32.mrf.mxu0  ;;  %v2771_v11 = vadd.f32 %v5654_v29, %v7216_v39 }
 0x234   : > { %v7360_v31 = vadd.f32 %v2976_v32, %v2765_v58  ;;  %v2654_v24 = vpop.f32.mrf.mxu1 }
 0x235   : > { %v7362_v62 = vpop.f32.mrf.mxu0  ;;  %v2769_v47 = vadd.f32 %v2654_v24, %v7223_v7 }
 0x236   : > { %v5655_v8 = vpop.f32.mrf.mxu1 }
 0x237   : > { %v7370_v18 = vpop.f32.mrf.mxu0  ;;  %v7373_v21 = vadd.f32 %v5655_v8, %v7226_v6 }
 0x238   : > { %v2657_v39 = vpop.f32.mrf.mxu1 }
 0x239   : > { %v5702_v28 = vpop.f32.mrf.mxu0  ;;  %v7375_v36 = vadd.f32 %v2657_v39, %v2464_v51 }
 0x23a   : > { %v7377_v7 = vadd.f32 %v5702_v28, %v2771_v11  ;;  %v5658_v49 = vpop.f32.mrf.mxu1 }
 0x23b   : > { %v2992_v41 = vpop.f32.mrf.mxu0  ;;  %v2775_v10 = vadd.f32 %v5658_v49, %v7237_v40 }
 0x23c   : > { %v7380_v20 = vadd.f32 %v2992_v41, %v2769_v47  ;;  %v2670_v54 = vpop.f32.mrf.mxu1 }
 0x23d   : > { %v7382_v25 = vpop.f32.mrf.mxu0  ;;  %v2773_v6 = vadd.f32 %v2670_v54, %v7244_v52 }
 0x23e   : > { %v5659_v22 = vpop.f32.mrf.mxu1 }
 0x23f   : > { %v7387_v17 = vpop.f32.mrf.mxu0  ;;  %v7390_v45 = vadd.f32 %v5659_v22, %v7247_v55  ;;  %v2472_v55 = vadd.f32 %v7272_v16, %v7256_v5 }
 0x240   : > { %v2673_v53 = vpop.f32.mrf.mxu1 }
 0x241   : > { %v5706_v58 = vpop.f32.mrf.mxu0  ;;  %v7392_v56 = vadd.f32 %v2673_v53, %v2468_v14 }
 0x242   : > { %v7394_v40 = vadd.f32 %v5706_v58, %v2775_v10  ;;  %v5662_v59 = vpop.f32.mrf.mxu1 }
 0x243   : > { %v3008_v3 = vpop.f32.mrf.mxu0  ;;  %v2779_v26 = vadd.f32 %v5662_v59, %v7258_v34 }
 0x244   : > { %v7397_v52 = vadd.f32 %v3008_v3, %v2773_v6  ;;  %v2686_v19 = vpop.f32.mrf.mxu1 }
 0x245   : > { %v7399_v35 = vpop.f32.mrf.mxu0  ;;  %v2777_v12 = vadd.f32 %v2686_v19, %v7265_v43 }
 0x246   : > { %v5663_v2 = vpop.f32.mrf.mxu1 }
 0x247   : > { %v7404_v29 = vpop.f32.mrf.mxu0  ;;  %v7407_v32 = vadd.f32 %v5663_v2, %v7268_v38 }
 0x248   : > { %v2689_v11 = vpop.f32.mrf.mxu1 }
 0x249   : > { %v5710_v24 = vpop.f32.mrf.mxu0  ;;  %v7409_v47 = vadd.f32 %v2689_v11, %v2472_v55 }
 0x24a   : > { %v7411_v34 = vadd.f32 %v5710_v24, %v2779_v26  ;;  %v5666_v1 = vpop.f32.mrf.mxu1 }
 0x24b   : > { %v3024_v8 = vpop.f32.mrf.mxu0  ;;  %v2783_v51 = vadd.f32 %v5666_v1, %v7278_v63 }
 0x24c   : > { %v7414_v43 = vadd.f32 %v3024_v8, %v2777_v12  ;;  %v2702_v39 = vpop.f32.mrf.mxu1 }
 0x24d   : > { %v7416_v28 = vpop.f32.mrf.mxu0  ;;  %v2781_v5 = vadd.f32 %v2702_v39, %v7285_v27 }
 0x24e   : > { %v5667_v16 = vpop.f32.mrf.mxu1 }
 0x24f   : > { %v7419_v38 = vpop.f32.mrf.mxu0  ;;  %v7422_v49 = vadd.f32 %v5667_v16, %v7288_v0 }
 0x250   : > { %v2705_v41 = vpop.f32.mrf.mxu1 }
 0x251   : > { %v5714_v10 = vpop.f32.mrf.mxu0  ;;  %v7425_v54 = vadd.f32 %v2705_v41, %v7293_v9 }
 0x252   : > { %v7427_v6 = vadd.f32 %v5714_v10, %v2783_v51  ;;  %v5670_v63 = vpop.f32.mrf.mxu1 }
 0x253   : > { %8018 = vst [vmem:[#allocation4_spill] sm:$0xff] %v7425_v54  ;;  %v3040_v22 = vpop.f32.mrf.mxu0  ;;  %v2787_v14 = vadd.f32 %v5670_v63, %v7298_v42 }
 0x254   : > { %v7430_v53 = vadd.f32 %v3040_v22, %v2781_v5  ;;  %v2718_v27 = vpop.f32.mrf.mxu1 }
 0x255   : > { %v7432_v58 = vpop.f32.mrf.mxu0  ;;  %v2785_v59 = vadd.f32 %v2718_v27, %v7306_v48 }
 0x256   : > { %v5671_v0 = vpop.f32.mrf.mxu1 }
 0x257   : > { %v7435_v3 = vpop.f32.mrf.mxu0  ;;  %v7438_v26 = vadd.f32 %v5671_v0, %v7309_v15 }
 0x258   : > { %8019 = vst [vmem:[#allocation3_spill] sm:$0xff] %v7435_v3  ;;  %v2721_v9 = vpop.f32.mrf.mxu1 }
 0x259   : > { %8020 = vst [vmem:[#allocation5_spill] sm:$0xff] %v7438_v26  ;;  %v5718_v19 = vpop.f32.mrf.mxu0  ;;  %v7441_v12 = vadd.f32 %v2721_v9, %v7314_v44 }
 0x25a   : > { %v7443_v2 = vadd.f32 %v5718_v19, %v2787_v14  ;;  %v5674_v42 = vpop.f32.mrf.mxu1 }
 0x25b   : > { %8021 = vst [vmem:[#allocation6_spill] sm:$0xff] %v7441_v12  ;;  %v3056_v55 = vpop.f32.mrf.mxu0  ;;  %v2791_v11 = vadd.f32 %v5674_v42, %v7319_v61 }
 0x25c   : > { %v7446_v24 = vadd.f32 %v3056_v55, %v2785_v59  ;;  %v2734_v48 = vpop.f32.mrf.mxu1 }
 0x25d   : > { %v7448_v1 = vpop.f32.mrf.mxu0  ;;  %v2789_v8 = vadd.f32 %v2734_v48, %v7324_v57 }
 0x25e   : > { %8022 = vst [vmem:[#allocation7_spill] sm:$0xff] %v7448_v1  ;;  %v5675_v15 = vpop.f32.mrf.mxu1 }
 0x25f   : > { %v7451_v51 = vpop.f32.mrf.mxu0  ;;  %v7454_v39 = vadd.f32 %v5675_v15, %v7327_v46 }
 0x260   : > { %8023 = vst [vmem:[#allocation8_spill] sm:$0xff] %v7451_v51  ;;  %v2737_v44 = vpop.f32.mrf.mxu1 }
 0x261   : > { %8024 = vst [vmem:[#allocation9_spill] sm:$0xff] %v7454_v39  ;;  %v5722_v5 = vpop.f32.mrf.mxu0  ;;  %v7457_v16 = vadd.f32 %v2737_v44, %v7332_v60 }
 0x262   : > { %v7459_v41 = vadd.f32 %v5722_v5, %v2791_v11  ;;  %v5678_v61 = vpop.f32.mrf.mxu1 }
 0x263   : > { %8025 = vst [vmem:[#allocation10_spill] sm:$0xff] %v7457_v16  ;;  %v3072_v10 = vpop.f32.mrf.mxu0  ;;  %v2795_v63 = vadd.f32 %v5678_v61, %v7337_v37 }
 0x264   : > { %v7462_v22 = vadd.f32 %v3072_v10, %v2789_v8  ;;  %v2750_v57 = vpop.f32.mrf.mxu1 }
 0x265   : > { %v7464_v14 = vpop.f32.mrf.mxu0  ;;  %v2793_v27 = vadd.f32 %v2750_v57, %v7340_v4 }
 0x266   : > { %8026 = vst [vmem:[#allocation11_spill] sm:$0xff] %v7464_v14  ;;  %v5679_v46 = vpop.f32.mrf.mxu1 }
 0x267   : > { %v7467_v59 = vpop.f32.mrf.mxu0  ;;  %v7470_v0 = vadd.f32 %v5679_v46, %v7343_v23 }
 0x268   : > { %8027 = vst [vmem:[#allocation12_spill] sm:$0xff] %v7467_v59  ;;  %v2753_v60 = vpop.f32.mrf.mxu1 }
 0x269   : > { %8028 = vst [vmem:[#allocation13_spill] sm:$0xff] %v7470_v0  ;;  %v5726_v9 = vpop.f32.mrf.mxu0  ;;  %v7473_v19 = vadd.f32 %v2753_v60, %v7353_v33 }
 0x26a   : > { %v7475_v42 = vadd.f32 %v5726_v9, %v2795_v63  ;;  %v5746_v37 = vpop.f32.mrf.mxu1 }
 0x26b   : > { %8029 = vst [vmem:[#allocation14_spill] sm:$0xff] %v7473_v19  ;;  %v3088_v55 = vpop.f32.mrf.mxu0  ;;  %v7478_v11 = vadd.f32 %v5746_v37, %v7357_v13 }
 0x26c   : > { %v3131_v48 = vadd.f32 %v3088_v55, %v2793_v27  ;;  %v3314_v4 = vpop.f32.mrf.mxu1 }
 0x26d   : > { %v7480_v8 = vpop.f32.mrf.mxu0  ;;  %v7483_v15 = vadd.f32 %v3314_v4, %v7360_v31 }
 0x26e   : > { %8030 = vst [vmem:[#allocation15_spill] sm:$0xff] %v7480_v8  ;;  %v7485_v23 = vpop.f32.mrf.mxu1 }
 0x26f   : > { %v7487_v44 = vpop.f32.mrf.mxu0 }
 0x270   : > { %8031 = vst [vmem:[#allocation16_spill] sm:$0xff] %v7487_v44  ;;  %v7489_v33 = vpop.f32.mrf.mxu1 }
 0x271   : > { %v5794_v5 = vpop.f32.mrf.mxu0 }
 0x272   : > { %v5750_v61 = vpop.f32.mrf.mxu1 }
 0x273   : > { %v3620_v10 = vpop.f32.mrf.mxu0  ;;  %v7492_v63 = vadd.f32 %v5750_v61, %v7377_v7 }
 0x274   : > { %v3330_v13 = vpop.f32.mrf.mxu1 }
 0x275   : > { %v7494_v57 = vpop.f32.mrf.mxu0  ;;  %v7497_v27 = vadd.f32 %v3330_v13, %v7380_v20 }
 0x276   : > { %v7499_v31 = vpop.f32.mrf.mxu1 }
 0x277   : > { %v7501_v46 = vpop.f32.mrf.mxu0 }
 0x278   : > { %v7503_v60 = vpop.f32.mrf.mxu1 }
 0x279   : > { %v7505_v9 = vpop.f32.mrf.mxu0 }
 0x27a   : > { %v5754_v37 = vpop.f32.mrf.mxu1 }
 0x27b   : > { %v7508_v55 = vadd.f32 %v5754_v37, %v7394_v40  ;;  %v7510_v7 = vpop.f32.mrf.mxu0 }
 0x27c   : > { %v3346_v4 = vpop.f32.mrf.mxu1 }
 0x27d   : > { %v7513_v61 = vadd.f32 %v3346_v4, %v7397_v52  ;;  %v7517_v13 = vpop.f32.mrf.mxu0 }
 0x27e   : > { %v7515_v20 = vpop.f32.mrf.mxu1 }
 0x27f   : > { %v7524_v0 = vpop.f32.mrf.mxu0 }
 0x280   : > { %v7519_v44 = vpop.f32.mrf.mxu1 }
 0x281   : > { %v7531_v52 = vpop.f32.mrf.mxu0 }
 0x282   : > { %v5758_v19 = vpop.f32.mrf.mxu1 }
 0x283   : > { %v7522_v8 = vadd.f32 %v5758_v19, %v7411_v34  ;;  %v7538_v39 = vpop.f32.mrf.mxu0 }
 0x284   : > { %v3362_v40 = vpop.f32.mrf.mxu1 }
 0x285   : > { %v7527_v37 = vadd.f32 %v3362_v40, %v7414_v43  ;;  %v7545_v43 = vpop.f32.mrf.mxu0 }
 0x286   : > { %v7529_v59 = vpop.f32.mrf.mxu1 }
 0x287   : > { %v7552_v26 = vpop.f32.mrf.mxu0 }
 0x288   : > { %v7533_v4 = vpop.f32.mrf.mxu1 }
 0x28a   : > { %v5762_v16 = vpop.f32.mrf.mxu1 }
 0x28b   : > { %v7536_v14 = vadd.f32 %v5762_v16, %v7427_v6 }
 0x28c   : > { %v3378_v34 = vpop.f32.mrf.mxu1 }
 0x28d   : > { %v7541_v19 = vadd.f32 %v3378_v34, %v7430_v53  ;;  %v7559_v53 = vpop.f32.mrf.mxu0 }
 0x28e   : > { %v7543_v51 = vpop.f32.mrf.mxu1 }
 0x28f   : > { %8032 = vst [vmem:[#allocation17_spill] sm:$0xff] %v7541_v19  ;;  %8033 = vst [vmem:[#allocation18_spill] sm:$0xff] %v7543_v51 }
 0x290   : > { %v7547_v40 = vpop.f32.mrf.mxu1 }
 0x291   : > { %8034 = vst [vmem:[#allocation19_spill] sm:$0xff] %v7547_v40  ;;  %v7566_v40 = vpop.f32.mrf.mxu0 }
 0x292   : > { %v5766_v12 = vpop.f32.mrf.mxu1 }
 0x293   : > { %v7550_v1 = vadd.f32 %v5766_v12, %v7443_v2 }
 0x294   : > { %v3394_v6 = vpop.f32.mrf.mxu1 }
 0x295   : > { %8035 = vst [vmem:[#allocation20_spill] sm:$0xff] %v7550_v1  ;;  %v7555_v16 = vadd.f32 %v3394_v6, %v7446_v24  ;;  %v7573_v24 = vpop.f32.mrf.mxu0 }
 0x296   : > { %v7557_v3 = vpop.f32.mrf.mxu1 }
 0x297   : > { %8036 = vst [vmem:[#allocation21_spill] sm:$0xff] %v7555_v16  ;;  %8037 = vst [vmem:[#allocation22_spill] sm:$0xff] %v7557_v3 }
 0x298   : > { %v7561_v34 = vpop.f32.mrf.mxu1 }
 0x299   : > { %8038 = vst [vmem:[#allocation23_spill] sm:$0xff] %v7561_v34  ;;  %v7580_v34 = vpop.f32.mrf.mxu0 }
 0x29a   : > { %v5770_v51 = vpop.f32.mrf.mxu1 }
 0x29b   : > { %v7564_v19 = vadd.f32 %v5770_v51, %v7459_v41  ;;  %v7586_v54 = vpop.f32.mrf.mxu0 }
 0x29c   : > { %v3410_v12 = vpop.f32.mrf.mxu1 }
 0x29d   : > { %8039 = vst [vmem:[#allocation24_spill] sm:$0xff] %v7564_v19  ;;  %v7569_v2 = vadd.f32 %v3410_v12, %v7462_v22  ;;  %v3106_v12 = vadd.f32 %v7362_v62, %v7351_v50 }
 0x29e   : > { %v7571_v1 = vpop.f32.mrf.mxu1 }
 0x29f   : > { %8040 = vst [vmem:[#allocation25_spill] sm:$0xff] %v7571_v1 }
 0x2a0   : > { %v7575_v6 = vpop.f32.mrf.mxu1 }
 0x2a1   : > { %8041 = vst [vmem:[#allocation26_spill] sm:$0xff] %v7575_v6  ;;  %v3749_v6 = vadd.f32 %v5794_v5, %v7478_v11 }
 0x2a2   : > { %v5774_v3 = vpop.f32.mrf.mxu1 }
 0x2a3   : > { %v7578_v16 = vadd.f32 %v5774_v3, %v7475_v42  ;;  %v3104_v3 = vadd.f32 %v7370_v18, %v7355_v30  ;;  %v3747_v42 = vadd.f32 %v3620_v10, %v7483_v15 }
 0x2a4   : > { %v3426_v51 = vpop.f32.mrf.mxu1 }
 0x2a5   : > { %v7582_v41 = vadd.f32 %v3426_v51, %v3131_v48  ;;  %v3444_v48 = vadd.f32 %v7485_v23, %v3106_v12  ;;  %v3442_v62 = vadd.f32 %v7489_v33, %v3104_v3  ;;  %v3751_v12 = vadd.f32 %v7510_v7, %v7497_v27 }
 0x2a6   : > { %v7584_v19 = vpop.f32.mrf.mxu1 }
 0x2a7   : > { %8042 = vst [vmem:[#allocation27_spill] sm:$0xff] %v7582_v41  ;;  %8043 = vst [vmem:[#allocation28_spill] sm:$0xff] %v7584_v19  ;;  %v7597_v41 = vpop.f32.mrf.mxu0  ;;  %v3750_v50 = vadd.f32 %v7494_v57, %v3444_v48  ;;  %v3748_v30 = vadd.f32 %v7501_v46, %v3442_v62  ;;  %v3108_v46 = vadd.f32 %v7387_v17, %v7375_v36 }
 0x2a8   : > { %v7588_v22 = vpop.f32.mrf.mxu1 }
 0x2a9   : > { %8044 = vst [vmem:[#allocation29_spill] sm:$0xff] %v7588_v22  ;;  %v7602_v22 = vld [vmem:[%s7867_s4] ss:$0 sm:$0xff]  ;;  %v7610_v23 = vpop.f32.mrf.mxu0 }
 0x2aa   : > { %v5842_v1 = vpop.f32.mrf.mxu1 }
 0x2ab   : > { %v4087_v51 = vadd.f32 %v5842_v1, %v3749_v6  ;;  %v3110_v1 = vadd.f32 %v7382_v25, %v7373_v21  ;;  %v3753_v6 = vadd.f32 %v7505_v9, %v7492_v63  ;;  %v3446_v9 = vadd.f32 %v7503_v60, %v3108_v46 }
 0x2ac   : > { %v3958_v19 = vpop.f32.mrf.mxu1 }
 0x2ad   : > { %v4085_v11 = vadd.f32 %v3958_v19, %v3747_v42  ;;  %v4126_v18 = vadd.f32 %v7602_v22, %v4087_v51  ;;  %v3448_v3 = vadd.f32 %v7499_v31, %v3110_v1  ;;  %v3752_v31 = vadd.f32 %v7524_v0, %v3446_v9 }
 0x2ae   : > { %v5843_v5 = vpop.f32.mrf.mxu1  ;;  %v3757_v1 = vadd.f32 %v7531_v52, %v7508_v55  ;;  %v3112_v0 = vadd.f32 %v7404_v29, %v7392_v56  ;;  %v3118_v9 = vadd.f32 %v7416_v28, %v7407_v32 }
 0x2af   : > { %v4088_v15 = vadd.f32 %v5843_v5, %v3750_v50  ;;  %v4124_v57 = vadd.f32 %v7602_v22, %v4085_v11  ;;  %v4158_v25 = vmax.f32 %v4126_v18, 0.0  ;;  %v3754_v63 = vadd.f32 %v7517_v13, %v3448_v3  ;;  %v7624_v50 = vpop.f32.mrf.mxu0 }
 0x2b0   : > { %v3961_v10 = vpop.f32.mrf.mxu1  ;;  %v3450_v3 = vadd.f32 %v7519_v44, %v3112_v0  ;;  %v3456_v32 = vadd.f32 %v7529_v59, %v3118_v9 }
 0x2b1   : > { %v4127_v33 = vadd.f32 %v7602_v22, %v4088_v15  ;;  %v4086_v19 = vadd.f32 %v3961_v10, %v3748_v30  ;;  %v4156_v11 = vmax.f32 %v4124_v57, 0.0  ;;  %v3114_v15 = vadd.f32 %v7399_v35, %v7390_v45  ;;  %v7630_v13 = vpop.f32.mrf.mxu0 }
 0x2b2   : > { %v5846_v21 = vpop.f32.mrf.mxu1 }
 0x2b3   : > { %v4159_v42 = vmax.f32 %v4127_v33, 0.0  ;;  %v4125_v48 = vadd.f32 %v7602_v22, %v4086_v19  ;;  %v4091_v51 = vadd.f32 %v5846_v21, %v3753_v6  ;;  %v3755_v33 = vadd.f32 %v7538_v39, %v7513_v61  ;;  %v7644_v21 = vpop.f32.mrf.mxu0 }
 0x2b4   : > { %v3974_v62 = vpop.f32.mrf.mxu1  ;;  %v3452_v45 = vadd.f32 %v7515_v20, %v3114_v15  ;;  %v3756_v20 = vadd.f32 %v7552_v26, %v3450_v3  ;;  %v3116_v26 = vadd.f32 %v7419_v38, %v7409_v47 }
 0x2b5   : > { %v4189_v36 = vpack.c.bf16 %v4159_v42, %v4158_v25  ;;  %v4157_v17 = vmax.f32 %v4125_v48, 0.0  ;;  %v4089_v5 = vadd.f32 %v3974_v62, %v3751_v12  ;;  %v4130_v7 = vadd.f32 %v7602_v22, %v4091_v51 }
 0x2b6   : > { %v5847_v27 = vpop.f32.mrf.mxu1  ;;  %v3758_v12 = vadd.f32 %v7545_v43, %v3452_v45  ;;  %v7650_v43 = vpop.f32.mrf.mxu0  ;;  %v3761_v62 = vadd.f32 %v7559_v53, %v7522_v8 }
 0x2b7   : > { %v4092_v30 = vadd.f32 %v5847_v27, %v3754_v63  ;;  %v4188_v18 = vpack.c.bf16 %v4157_v17, %v4156_v11  ;;  %v4128_v10 = vadd.f32 %v7602_v22, %v4089_v5  ;;  %v4162_v19 = vmax.f32 %v4130_v7, 0.0 }
 0x2b8   : > { %v3977_v60 = vpop.f32.mrf.mxu1  ;;  %v3759_v5 = vadd.f32 %v7566_v40, %v7527_v37  ;;  %v3762_v7 = vadd.f32 %v7573_v24, %v3456_v32  ;;  %v8052_v32 = vld [vmem:[#allocation20_spill] sm:$0xff] }
 0x2b9   : > { %v4131_v6 = vadd.f32 %v7602_v22, %v4092_v30  ;;  %v4090_v57 = vadd.f32 %v3977_v60, %v3752_v31  ;;  %5888 = vmatprep.mubr.bf16.mxu0 %v4188_v18  ;;  %v4160_v56 = vmax.f32 %v4128_v10, 0.0  ;;  %v3454_v30 = vadd.f32 %v7533_v4, %v3116_v26  ;;  %v7664_v18 = vpop.f32.mrf.mxu0 }
 0x2ba   : > { %v5850_v35 = vpop.f32.mrf.mxu1  ;;  %5889 = vmatmul.mubr.bf16.vlgmr.msra.gmra.mxu0 %v4189_v36  ;;  %v3765_v4 = vadd.f32 %v7586_v54, %v7536_v14 }
 0x2bb   : > { %v4163_v46 = vmax.f32 %v4131_v6, 0.0  ;;  %v4129_v55 = vadd.f32 %v7602_v22, %v4090_v57  ;;  %v4095_v52 = vadd.f32 %v5850_v35, %v3757_v1  ;;  %v3760_v59 = vadd.f32 %v7580_v34, %v3454_v30  ;;  %v5818_v24 = vpop.f32.mrf.mxu0  ;;  %v8046_v34 = vld [vmem:[#allocation3_spill] sm:$0xff]  ;;  %v8055_v30 = vld [vmem:[#allocation21_spill] sm:$0xff] }
 0x2bc   : > { %v3990_v25 = vpop.f32.mrf.mxu1  ;;  %v3122_v57 = vadd.f32 %v7432_v58, %v7422_v49 }
 0x2bd   : > { %v4191_v29 = vpack.c.bf16 %v4163_v46, %v4162_v19  ;;  %v4161_v42 = vmax.f32 %v4129_v55, 0.0  ;;  %v4093_v39 = vadd.f32 %v3990_v25, %v3755_v33  ;;  %v4134_v48 = vadd.f32 %v7602_v22, %v4095_v52  ;;  %v8045_v19 = vld [vmem:[#allocation4_spill] sm:$0xff]  ;;  %v8047_v55 = vld [vmem:[#allocation17_spill] sm:$0xff] }
 0x2be   : > { %v5851_v61 = vpop.f32.mrf.mxu1  ;;  %v3120_v46 = vadd.f32 %v8046_v34, %v8045_v19  ;;  %v3763_v52 = vadd.f32 %v7597_v41, %v8047_v55 }
 0x2bf   : > { %v4096_v51 = vadd.f32 %v5851_v61, %v3758_v12  ;;  %v4190_v63 = vpack.c.bf16 %v4161_v42, %v4160_v56  ;;  %v4132_v11 = vadd.f32 %v7602_v22, %v4093_v39  ;;  %v4166_v27 = vmax.f32 %v4134_v48, 0.0  ;;  %v8048_v12 = vld [vmem:[#allocation18_spill] sm:$0xff]  ;;  %v3716_v39 = vpop.f32.mrf.mxu0 }
 0x2c0   : > { %v3993_v44 = vpop.f32.mrf.mxu1  ;;  %v3460_v3 = vadd.f32 %v8048_v12, %v3122_v57  ;;  %v8059_v12 = vld [vmem:[#allocation11_spill] sm:$0xff] }
 0x2c1   : > { %v4135_v36 = vadd.f32 %v7602_v22, %v4096_v51  ;;  %v4094_v17 = vadd.f32 %v3993_v44, %v3756_v20  ;;  %5892 = vmatprep.mubr.bf16.mxu0 %v4190_v63  ;;  %v4164_v47 = vmax.f32 %v4132_v11, 0.0 }
 0x2c2   : > { %v5854_v28 = vpop.f32.mrf.mxu1  ;;  %5893 = vmatmul.mubr.bf16.gmra.mxu0 %v4191_v29  ;;  %v3766_v56 = vadd.f32 %v7610_v23, %v3460_v3  ;;  %v8049_v29 = vld [vmem:[#allocation19_spill] sm:$0xff] }
 0x2c3   : > { %v4167_v31 = vmax.f32 %v4135_v36, 0.0  ;;  %v4133_v8 = vadd.f32 %v7602_v22, %v4094_v17  ;;  %v4099_v53 = vadd.f32 %v5854_v28, %v3761_v62  ;;  %v3458_v42 = vadd.f32 %v8049_v29, %v3120_v46  ;;  %v8050_v36 = vld [vmem:[#allocation5_spill] sm:$0xff]  ;;  %v8051_v17 = vld [vmem:[#allocation7_spill] sm:$0xff]  ;;  %v8061_v29 = vld [vmem:[#allocation10_spill] sm:$0xff] }
 0x2c4   : > { %v4006_v15 = vpop.f32.mrf.mxu1  ;;  %v3126_v26 = vadd.f32 %v8051_v17, %v8050_v36  ;;  %v3769_v28 = vadd.f32 %v7630_v13, %v8052_v32 }
 0x2c5   : > { %v4193_v38 = vpack.c.bf16 %v4167_v31, %v4166_v27  ;;  %v4165_v60 = vmax.f32 %v4133_v8, 0.0  ;;  %v4097_v37 = vadd.f32 %v4006_v15, %v3759_v5  ;;  %v4138_v1 = vadd.f32 %v7602_v22, %v4099_v53  ;;  %v5819_v5 = vpop.f32.mrf.mxu0  ;;  %v8053_v53 = vld [vmem:[#allocation6_spill] sm:$0xff] }
 0x2c6   : > { %v5855_v40 = vpop.f32.mrf.mxu1  ;;  %v3764_v9 = vadd.f32 %v7624_v50, %v3458_v42  ;;  %v8054_v50 = vld [vmem:[#allocation8_spill] sm:$0xff]  ;;  %v3767_v15 = vadd.f32 %v7644_v21, %v8055_v30 }
 0x2c7   : > { %v4100_v10 = vadd.f32 %v5855_v40, %v3762_v7  ;;  %v4192_v6 = vpack.c.bf16 %v4165_v60, %v4164_v47  ;;  %v4136_v33 = vadd.f32 %v7602_v22, %v4097_v37  ;;  %v4170_v58 = vmax.f32 %v4138_v1, 0.0  ;;  %v8056_v47 = vld [vmem:[#allocation22_spill] sm:$0xff]  ;;  %v3719_v57 = vpop.f32.mrf.mxu0  ;;  %v8062_v42 = vld [vmem:[#allocation12_spill] sm:$0xff] }
 0x2c8   : > { %v4009_v0 = vpop.f32.mrf.mxu1  ;;  %v3124_v7 = vadd.f32 %v8054_v50, %v8053_v53  ;;  %v8065_v53 = vld [vmem:[#allocation13_spill] sm:$0xff]  ;;  %v8066_v50 = vld [vmem:[#allocation15_spill] sm:$0xff] }
 0x2c9   : > { %v4139_v45 = vadd.f32 %v7602_v22, %v4100_v10  ;;  %v4098_v35 = vadd.f32 %v4009_v0, %v3760_v59  ;;  %5896 = vmatprep.mubr.bf16.mxu0 %v4192_v6  ;;  %v4168_v20 = vmax.f32 %v4136_v33, 0.0  ;;  %v8057_v10 = vld [vmem:[#allocation23_spill] sm:$0xff] }
 0x2ca   : > { %v5858_v49 = vpop.f32.mrf.mxu1  ;;  %5897 = vmatmul.mubr.bf16.gmra.mxu0 %v4193_v38  ;;  %v3464_v38 = vadd.f32 %v8056_v47, %v3126_v26  ;;  %v3462_v6 = vadd.f32 %v8057_v10, %v3124_v7  ;;  %v3134_v7 = vadd.f32 %v8066_v50, %v8065_v53  ;;  %v8070_v10 = vld [vmem:[#allocation27_spill] sm:$0xff] }
 0x2cb   : > { %v4171_v25 = vmax.f32 %v4139_v45, 0.0  ;;  %v4137_v54 = vadd.f32 %v7602_v22, %v4098_v35  ;;  %v4103_v14 = vadd.f32 %v5858_v49, %v3765_v4  ;;  %v5822_v49 = vpop.f32.mrf.mxu0  ;;  %v4442_v50 = vld [vmem:[%s6074_s30 + $0x30] sm:$0xff] }
 0x2cc   : > { %v4022_v61 = vpop.f32.mrf.mxu1  ;;  %v3770_v1 = vadd.f32 %v7650_v43, %v3464_v38  ;;  %v3768_v19 = vadd.f32 %v7664_v18, %v3462_v6  ;;  %v3128_v18 = vadd.f32 %v8062_v42, %v8061_v29 }
 0x2cd   : > { %v4195_v48 = vpack.c.bf16 %v4171_v25, %v4170_v58  ;;  %v4169_v51 = vmax.f32 %v4137_v54, 0.0  ;;  %v4101_v63 = vadd.f32 %v4022_v61, %v3763_v52  ;;  %v4142_v44 = vadd.f32 %v7602_v22, %v4103_v14  ;;  %v8058_v52 = vld [vmem:[#allocation9_spill] sm:$0xff]  ;;  %v8060_v58 = vld [vmem:[#allocation24_spill] sm:$0xff]  ;;  %v3732_v36 = vpop.f32.mrf.mxu0 }
 0x2ce   : > { %v5859_v41 = vpop.f32.mrf.mxu1  ;;  %v3130_v3 = vadd.f32 %v8059_v12, %v8058_v52  ;;  %v3773_v25 = vadd.f32 %v5818_v24, %v8060_v58  ;;  %v3771_v61 = vadd.f32 %v3716_v39, %v7569_v2  ;;  %v3775_v6 = vadd.f32 %v3732_v36, %v8070_v10 }
 0x2cf   : > { %v4104_v62 = vadd.f32 %v5859_v41, %v3766_v56  ;;  %v4194_v11 = vpack.c.bf16 %v4169_v51, %v4168_v20  ;;  %v4140_v27 = vadd.f32 %v7602_v22, %v4101_v63  ;;  %v4174_v37 = vmax.f32 %v4142_v44, 0.0  ;;  %v8063_v20 = vld [vmem:[#allocation25_spill] sm:$0xff]  ;;  %v5823_v30 = vpop.f32.mrf.mxu0 }
 0x2d0   : > { %v4025_v23 = vpop.f32.mrf.mxu1 }
 0x2d1   : > { %v4143_v31 = vadd.f32 %v7602_v22, %v4104_v62  ;;  %v4102_v8 = vadd.f32 %v4025_v23, %v3764_v9  ;;  %5900 = vmatprep.mubr.bf16.mxu0 %v4194_v11  ;;  %v4172_v4 = vmax.f32 %v4140_v27, 0.0  ;;  %v8064_v62 = vld [vmem:[#allocation26_spill] sm:$0xff] }
 0x2d2   : > { %v5862_v60 = vpop.f32.mrf.mxu1  ;;  %5901 = vmatmul.mubr.bf16.gmra.mxu0 %v4195_v48  ;;  %v3468_v48 = vadd.f32 %v8063_v20, %v3130_v3  ;;  %v3466_v11 = vadd.f32 %v8064_v62, %v3128_v18 }
 0x2d3   : > { %v4175_v40 = vmax.f32 %v4143_v31, 0.0  ;;  %v4141_v13 = vadd.f32 %v7602_v22, %v4102_v8  ;;  %v4107_v59 = vadd.f32 %v5862_v60, %v3769_v28 }
 0x2d4   : > { %v4038_v0 = vpop.f32.mrf.mxu1  ;;  %v3774_v44 = vadd.f32 %v5819_v5, %v3468_v48  ;;  %v3772_v2 = vadd.f32 %v3719_v57, %v3466_v11  ;;  %v3777_v5 = vadd.f32 %v5822_v49, %v7578_v16 }
 0x2d5   : > { %v4197_v33 = vpack.c.bf16 %v4175_v40, %v4174_v37  ;;  %v4173_v45 = vmax.f32 %v4141_v13, 0.0  ;;  %v4105_v35 = vadd.f32 %v4038_v0, %v3767_v15  ;;  %v4146_v34 = vadd.f32 %v7602_v22, %v4107_v59  ;;  %v8067_v37 = vld [vmem:[#allocation14_spill] sm:$0xff]  ;;  %v8068_v40 = vld [vmem:[#allocation16_spill] sm:$0xff] }
 0x2d6   : > { %v5863_v21 = vpop.f32.mrf.mxu1  ;;  %v3132_v13 = vadd.f32 %v8068_v40, %v8067_v37  ;;  %v8069_v59 = vld [vmem:[#allocation28_spill] sm:$0xff] }
 0x2d7   : > { %v4108_v46 = vadd.f32 %v5863_v21, %v3770_v1  ;;  %v4196_v55 = vpack.c.bf16 %v4173_v45, %v4172_v4  ;;  %v4144_v54 = vadd.f32 %v7602_v22, %v4105_v35  ;;  %v4178_v63 = vmax.f32 %v4146_v34, 0.0  ;;  %v8071_v45 = vld [vmem:[#allocation29_spill] sm:$0xff] }
 0x2d8   : > { %v4041_v43 = vpop.f32.mrf.mxu1  ;;  %v3472_v1 = vadd.f32 %v8069_v59, %v3134_v7  ;;  %v3470_v35 = vadd.f32 %v8071_v45, %v3132_v13  ;;  %v4443_v13 = vld [vmem:[%s6074_s30 + $0x38] sm:$0xff]  ;;  %v4446_v45 = vld [vmem:[%s6074_s30 + $0x50] sm:$0xff] }
 0x2d9   : > { %v4147_v14 = vadd.f32 %v7602_v22, %v4108_v46  ;;  %v4106_v56 = vadd.f32 %v4041_v43, %v3768_v19  ;;  %5904 = vmatprep.mubr.bf16.mxu0 %v4196_v55  ;;  %v4176_v26 = vmax.f32 %v4144_v54, 0.0  ;;  %v3735_v19 = vpop.f32.mrf.mxu0 }
 0x2da   : > { %v5866_v51 = vpop.f32.mrf.mxu1  ;;  %5905 = vmatmul.mubr.bf16.gmra.mxu0 %v4197_v33  ;;  %v3778_v21 = vadd.f32 %v5823_v30, %v3472_v1  ;;  %v3776_v49 = vadd.f32 %v3735_v19, %v3470_v35 }
 0x2db   : > { %v4179_v41 = vmax.f32 %v4147_v14, 0.0  ;;  %v4145_v9 = vadd.f32 %v7602_v22, %v4106_v56  ;;  %v4111_v24 = vadd.f32 %v5866_v51, %v3773_v25 }
 0x2dc   : > { %v4054_v17 = vpop.f32.mrf.mxu1 }
 0x2dd   : > { %v4199_v23 = vpack.c.bf16 %v4179_v41, %v4178_v63  ;;  %v4177_v32 = vmax.f32 %v4145_v9, 0.0  ;;  %v4109_v28 = vadd.f32 %v4054_v17, %v3771_v61  ;;  %v4150_v39 = vadd.f32 %v7602_v22, %v4111_v24  ;;  %v7730_v41 = vld [vmem:[%s7869_s6] ss:$0 sm:$0xff]  ;;  %v4438_v24 = vld [vmem:[%s6074_s30 + $0x10] sm:$0xff] }
 0x2de   : > { %v5867_v27 = vpop.f32.mrf.mxu1 }
 0x2df   : > { %v4112_v31 = vadd.f32 %v5867_v27, %v3774_v44  ;;  %v4198_v8 = vpack.c.bf16 %v4177_v32, %v4176_v26  ;;  %v4148_v47 = vadd.f32 %v7602_v22, %v4109_v28  ;;  %v4182_v0 = vmax.f32 %v4150_v39, 0.0  ;;  %v4439_v26 = vld [vmem:[%s6074_s30 + $0x18] sm:$0xff] }
 0x2e0   : > { %v4057_v15 = vpop.f32.mrf.mxu1 }
 0x2e1   : > { %v4151_v38 = vadd.f32 %v7602_v22, %v4112_v31  ;;  %v4110_v60 = vadd.f32 %v4057_v15, %v3772_v2  ;;  %5908 = vmatprep.mubr.bf16.mxu0 %v4198_v8  ;;  %v4180_v46 = vmax.f32 %v4148_v47, 0.0  ;;  %v4437_v2 = vld [vmem:[%s6074_s30 + $0x8] sm:$0xff]  ;;  %v4440_v47 = vld [vmem:[%s6074_s30 + $0x20] sm:$0xff] }
 0x2e2   : > { %v5870_v57 = vpop.f32.mrf.mxu1  ;;  %5909 = vmatmul.mubr.bf16.gmra.mxu0 %v4199_v23 }
 0x2e3   : > { %v4183_v4 = vmax.f32 %v4151_v38, 0.0  ;;  %v4149_v33 = vadd.f32 %v7602_v22, %v4110_v60  ;;  %v4115_v16 = vadd.f32 %v5870_v57, %v3777_v5  ;;  %v4441_v57 = vld [vmem:[%s6074_s30 + $0x28] sm:$0xff] }
 0x2e4   : > { %v4070_v34 = vpop.f32.mrf.mxu1 }
 0x2e5   : > { %v4201_v55 = vpack.c.bf16 %v4183_v4, %v4182_v0  ;;  %v4181_v52 = vmax.f32 %v4149_v33, 0.0  ;;  %v4113_v12 = vadd.f32 %v4070_v34, %v3775_v6  ;;  %v4154_v43 = vadd.f32 %v7602_v22, %v4115_v16 }
 0x2e6   : > { %v5871_v3 = vpop.f32.mrf.mxu1 }
 0x2e7   : > { %v4116_v58 = vadd.f32 %v5871_v3, %v3778_v21  ;;  %v4200_v25 = vpack.c.bf16 %v4181_v52, %v4180_v46  ;;  %v4152_v14 = vadd.f32 %v7602_v22, %v4113_v12  ;;  %v4186_v42 = vmax.f32 %v4154_v43, 0.0  ;;  %v4444_v46 = vld [vmem:[%s6074_s30 + $0x40] sm:$0xff] }
 0x2e8   : > { %v4073_v54 = vpop.f32.mrf.mxu1 }
 0x2e9   : > { %v4155_v56 = vadd.f32 %v7602_v22, %v4116_v58  ;;  %v4114_v29 = vadd.f32 %v4073_v54, %v3776_v49  ;;  %5912 = vmatprep.mubr.bf16.mxu0 %v4200_v25  ;;  %v4184_v20 = vmax.f32 %v4152_v14, 0.0  ;;  %v4447_v49 = vld [vmem:[%s6074_s30 + $0x58] sm:$0xff]  ;;  %v4445_v14 = vld [vmem:[%s6074_s30 + $0x48] sm:$0xff] }
 0x2ea   : > { %5913 = vmatmul.mubr.bf16.gmra.mxu0 %v4201_v55 }
 0x2eb   : > { %v4187_v18 = vmax.f32 %v4155_v56, 0.0  ;;  %v4153_v61 = vadd.f32 %v7602_v22, %v4114_v29  ;;  %v4436_v22 = vld [vmem:[%s6074_s30] sm:$0xff] }
 0x2ed   : > { %v4203_v48 = vpack.c.bf16 %v4187_v18, %v4186_v42  ;;  %v4185_v51 = vmax.f32 %v4153_v61, 0.0  ;;  %v4450_v61 = vld [vmem:[%s6074_s30 + $0x70] sm:$0xff] }
 0x2ef   : > { %v4202_v63 = vpack.c.bf16 %v4185_v51, %v4184_v20 }
 0x2f1   : > { %5916 = vmatprep.mubr.bf16.mxu0 %v4202_v63 }
 0x2f2   : > { %5917 = vmatmul.mubr.bf16.gmra.mxu0 %v4203_v48 }
 0x37a   : > { %v5890_v9 = vpop.f32.mrf.mxu0 }
 0x37b   : > { %v4318_v44 = vadd.f32 %v5890_v9, %v7730_v41  ;;  %v4448_v9 = vld [vmem:[%s6074_s30 + $0x60] sm:$0xff] }
 0x37c   : > { %v4309_v62 = vpop.f32.mrf.mxu0 }
 0x37d   : > { %v4470_v11 = vadd.f32 %v4438_v24, %v4318_v44  ;;  %v4310_v36 = vadd.f32 %v7730_v41, %v4309_v62 }
 0x37e   : > { %v5891_v17 = vpop.f32.mrf.mxu0 }
 0x37f   : > { %v4502_v23 = vmax.f32 %v4470_v11, 0.0  ;;  %v4468_v32 = vadd.f32 %v4436_v22, %v4310_v36  ;;  %v4321_v28 = vadd.f32 %v5891_v17, %v7730_v41  ;;  %v4451_v11 = vld [vmem:[%s6074_s30 + $0x78] sm:$0xff] }
 0x380   : > { %v4312_v27 = vpop.f32.mrf.mxu0 }
 0x381   : > { %4534 = vst.msk [vmem:[%s6079_s10 + $0x10] sm:$0xff] %vm8072_vm11, %v4502_v23  ;;  %v4500_v39 = vmax.f32 %v4468_v32, 0.0  ;;  %v4471_v31 = vadd.f32 %v4439_v26, %v4321_v28  ;;  %v4313_v8 = vadd.f32 %v7730_v41, %v4312_v27  ;;  %v4449_v32 = vld [vmem:[%s6074_s30 + $0x68] sm:$0xff]  ;;  %vm8088_vm11 = vmmov %vm8083_vm0 }
 0x382   : > { %v5894_v53 = vpop.f32.mrf.mxu0 }
 0x383   : > { %4532 = vst.msk [vmem:[%s6079_s10] sm:$0xff] %vm8073_vm15, %v4500_v39  ;;  %v4503_v7 = vmax.f32 %v4471_v31, 0.0  ;;  %v4469_v30 = vadd.f32 %v4437_v2, %v4313_v8  ;;  %v4334_v15 = vadd.f32 %v5894_v53, %v7730_v41  ;;  %v4454_v31 = vld [vmem:[%s6074_s30 + $0x90] sm:$0xff]  ;;  %vm8089_vm15 = vmmov %vm8083_vm0 }
 0x384   : > { %v4325_v5 = vpop.f32.mrf.mxu0 }
 0x385   : > { %4535 = vst.msk [vmem:[%s6079_s10 + $0x18] sm:$0xff] %vm8074_vm5, %v4503_v7  ;;  %v4501_v38 = vmax.f32 %v4469_v30, 0.0  ;;  %v4474_v60 = vadd.f32 %v4442_v50, %v4334_v15  ;;  %v4326_v37 = vadd.f32 %v7730_v41, %v4325_v5  ;;  %v4452_v30 = vld [vmem:[%s6074_s30 + $0x80] sm:$0xff]  ;;  %vm8090_vm5 = vmmov %vm8083_vm0 }
 0x386   : > { %v5895_v40 = vpop.f32.mrf.mxu0 }
 0x387   : > { %4533 = vst.msk [vmem:[%s6079_s10 + $0x8] sm:$0xff] %vm8075_vm1, %v4501_v38  ;;  %v4506_v59 = vmax.f32 %v4474_v60, 0.0  ;;  %v4472_v1 = vadd.f32 %v4440_v47, %v4326_v37  ;;  %v4337_v10 = vadd.f32 %v5895_v40, %v7730_v41  ;;  %v4455_v60 = vld [vmem:[%s6074_s30 + $0x98] sm:$0xff]  ;;  %vm8091_vm1 = vmmov %vm8083_vm0 }
 0x388   : > { %v4328_v6 = vpop.f32.mrf.mxu0 }
 0x389   : > { %4538 = vst.msk [vmem:[%s6079_s10 + $0x30] sm:$0xff] %vm8076_vm4, %v4506_v59  ;;  %v4504_v0 = vmax.f32 %v4472_v1, 0.0  ;;  %v4475_v4 = vadd.f32 %v4443_v13, %v4337_v10  ;;  %v4329_v33 = vadd.f32 %v7730_v41, %v4328_v6  ;;  %v4453_v1 = vld [vmem:[%s6074_s30 + $0x88] sm:$0xff]  ;;  %vm8092_vm4 = vmmov %vm8083_vm0 }
 0x38a   : > { %v5898_v16 = vpop.f32.mrf.mxu0 }
 0x38b   : > { %4536 = vst.msk [vmem:[%s6079_s10 + $0x20] sm:$0xff] %vm8077_vm2, %v4504_v0  ;;  %v4507_v35 = vmax.f32 %v4475_v4, 0.0  ;;  %v4473_v21 = vadd.f32 %v4441_v57, %v4329_v33  ;;  %v4350_v19 = vadd.f32 %v5898_v16, %v7730_v41  ;;  %v4458_v4 = vld [vmem:[%s6074_s30 + $0xb0] sm:$0xff]  ;;  %vm8093_vm2 = vmmov %vm8083_vm0 }
 0x38c   : > { %v4341_v34 = vpop.f32.mrf.mxu0 }
 0x38d   : > { %4539 = vst.msk [vmem:[%s6079_s10 + $0x38] sm:$0xff] %vm8078_vm13, %v4507_v35  ;;  %v4505_v55 = vmax.f32 %v4473_v21, 0.0  ;;  %v4478_v52 = vadd.f32 %v4446_v45, %v4350_v19  ;;  %v4342_v12 = vadd.f32 %v7730_v41, %v4341_v34  ;;  %v4456_v21 = vld [vmem:[%s6074_s30 + $0xa0] sm:$0xff]  ;;  %vm8094_vm13 = vmmov %vm8083_vm0 }
 0x38e   : > { %v5899_v3 = vpop.f32.mrf.mxu0 }
 0x38f   : > { %4537 = vst.msk [vmem:[%s6079_s10 + $0x28] sm:$0xff] %vm8079_vm9, %v4505_v55  ;;  %v4510_v43 = vmax.f32 %v4478_v52, 0.0  ;;  %v4476_v58 = vadd.f32 %v4444_v46, %v4342_v12  ;;  %v4353_v25 = vadd.f32 %v5899_v3, %v7730_v41  ;;  %v4459_v52 = vld [vmem:[%s6074_s30 + $0xb8] sm:$0xff]  ;;  %vm8095_vm9 = vmmov %vm8083_vm0 }
 0x390   : > { %v4344_v54 = vpop.f32.mrf.mxu0 }
 0x391   : > { %4542 = vst.msk [vmem:[%s6079_s10 + $0x50] sm:$0xff] %vm8080_vm12, %v4510_v43  ;;  %v4508_v56 = vmax.f32 %v4476_v58, 0.0  ;;  %v4479_v29 = vadd.f32 %v4447_v49, %v4353_v25  ;;  %v4345_v42 = vadd.f32 %v7730_v41, %v4344_v54  ;;  %v4457_v58 = vld [vmem:[%s6074_s30 + $0xa8] sm:$0xff]  ;;  %vm8096_vm12 = vmmov %vm8083_vm0 }
 0x392   : > { %v5902_v18 = vpop.f32.mrf.mxu0 }
 0x393   : > { %4540 = vst.msk [vmem:[%s6079_s10 + $0x40] sm:$0xff] %vm8081_vm8, %v4508_v56  ;;  %v4511_v20 = vmax.f32 %v4479_v29, 0.0  ;;  %v4477_v48 = vadd.f32 %v4445_v14, %v4345_v42  ;;  %v4366_v51 = vadd.f32 %v5902_v18, %v7730_v41  ;;  %v4462_v29 = vld [vmem:[%s6074_s30 + $0xd0] sm:$0xff]  ;;  %vm8097_vm8 = vmmov %vm8083_vm0 }
 0x394   : > { %v4357_v63 = vpop.f32.mrf.mxu0 }
 0x395   : > { %4543 = vst.msk [vmem:[%s6079_s10 + $0x58] sm:$0xff] %vm8082_vm14, %v4511_v20  ;;  %v4509_v24 = vmax.f32 %v4477_v48, 0.0  ;;  %v4482_v44 = vadd.f32 %v4450_v61, %v4366_v51  ;;  %v4358_v62 = vadd.f32 %v7730_v41, %v4357_v63  ;;  %v4460_v48 = vld [vmem:[%s6074_s30 + $0xc0] sm:$0xff]  ;;  %vm8098_vm14 = vmmov %vm8083_vm0 }
 0x396   : > { %v5903_v22 = vpop.f32.mrf.mxu0 }
 0x397   : > { %4541 = vst.msk [vmem:[%s6079_s10 + $0x48] sm:$0xff] %vm8083_vm0, %v4509_v24  ;;  %v4514_v36 = vmax.f32 %v4482_v44, 0.0  ;;  %v4480_v17 = vadd.f32 %v4448_v9, %v4358_v62  ;;  %v4369_v26 = vadd.f32 %v5903_v22, %v7730_v41  ;;  %v4463_v44 = vld [vmem:[%s6074_s30 + $0xd8] sm:$0xff] }
 0x398   : > { %v4360_v23 = vpop.f32.mrf.mxu0 }
 0x399   : > { %4546 = vst.msk [vmem:[%s6079_s10 + $0x70] sm:$0xff] %vm8084_vm3, %v4514_v36  ;;  %v4512_v28 = vmax.f32 %v4480_v17, 0.0  ;;  %v4483_v27 = vadd.f32 %v4451_v11, %v4369_v26  ;;  %v4361_v2 = vadd.f32 %v7730_v41, %v4360_v23  ;;  %v4461_v17 = vld [vmem:[%s6074_s30 + $0xc8] sm:$0xff]  ;;  %vm8099_vm3 = vmmov %vm8083_vm0 }
 0x39a   : > { %v5906_v39 = vpop.f32.mrf.mxu0 }
 0x39b   : > { %4544 = vst.msk [vmem:[%s6079_s10 + $0x60] sm:$0xff] %vm8085_vm6, %v4512_v28  ;;  %v4515_v8 = vmax.f32 %v4483_v27, 0.0  ;;  %v4481_v53 = vadd.f32 %v4449_v32, %v4361_v2  ;;  %v4382_v50 = vadd.f32 %v5906_v39, %v7730_v41  ;;  %v4466_v27 = vld [vmem:[%s6074_s30 + $0xf0] sm:$0xff]  ;;  %vm8100_vm6 = vmmov %vm8083_vm0 }
 0x39c   : > { %v4373_v7 = vpop.f32.mrf.mxu0 }
 0x39d   : > { %4547 = vst.msk [vmem:[%s6079_s10 + $0x78] sm:$0xff] %vm8086_vm7, %v4515_v8  ;;  %v4513_v15 = vmax.f32 %v4481_v53, 0.0  ;;  %v4486_v5 = vadd.f32 %v4454_v31, %v4382_v50  ;;  %v4374_v47 = vadd.f32 %v7730_v41, %v4373_v7  ;;  %v4464_v53 = vld [vmem:[%s6074_s30 + $0xe0] sm:$0xff]  ;;  %vm8101_vm7 = vmmov %vm8083_vm0 }
 0x39e   : > { %v5907_v38 = vpop.f32.mrf.mxu0 }
 0x39f   : > { %4545 = vst.msk [vmem:[%s6079_s10 + $0x68] sm:$0xff] %vm8087_vm10, %v4513_v15  ;;  %v4518_v37 = vmax.f32 %v4486_v5, 0.0  ;;  %v4484_v40 = vadd.f32 %v4452_v30, %v4374_v47  ;;  %v4385_v13 = vadd.f32 %v5907_v38, %v7730_v41  ;;  %v4467_v5 = vld [vmem:[%s6074_s30 + $0xf8] sm:$0xff]  ;;  %vm8102_vm10 = vmmov %vm8083_vm0 }
 0x3a0   : > { %v4376_v59 = vpop.f32.mrf.mxu0 }
 0x3a1   : > { %4550 = vst.msk [vmem:[%s6079_s10 + $0x90] sm:$0xff] %vm8088_vm11, %v4518_v37  ;;  %v4516_v10 = vmax.f32 %v4484_v40, 0.0  ;;  %v4487_v6 = vadd.f32 %v4455_v60, %v4385_v13  ;;  %v4377_v57 = vadd.f32 %v7730_v41, %v4376_v59  ;;  %v4465_v40 = vld [vmem:[%s6074_s30 + $0xe8] sm:$0xff] }
 0x3a2   : > { %v5910_v0 = vpop.f32.mrf.mxu0 }
 0x3a3   : > { %4548 = vst.msk [vmem:[%s6079_s10 + $0x80] sm:$0xff] %vm8089_vm15, %v4516_v10  ;;  %v4519_v33 = vmax.f32 %v4487_v6, 0.0  ;;  %v4485_v16 = vadd.f32 %v4453_v1, %v4377_v57  ;;  %v4398_v45 = vadd.f32 %v5910_v0, %v7730_v41 }
 0x3a4   : > { %v4389_v35 = vpop.f32.mrf.mxu0 }
 0x3a5   : > { %4551 = vst.msk [vmem:[%s6079_s10 + $0x98] sm:$0xff] %vm8090_vm5, %v4519_v33  ;;  %v4517_v19 = vmax.f32 %v4485_v16, 0.0  ;;  %v4490_v34 = vadd.f32 %v4458_v4, %v4398_v45  ;;  %v4390_v46 = vadd.f32 %v7730_v41, %v4389_v35 }
 0x3a6   : > { %v5911_v55 = vpop.f32.mrf.mxu0 }
 0x3a7   : > { %4549 = vst.msk [vmem:[%s6079_s10 + $0x88] sm:$0xff] %vm8091_vm1, %v4517_v19  ;;  %v4522_v12 = vmax.f32 %v4490_v34, 0.0  ;;  %v4488_v3 = vadd.f32 %v4456_v21, %v4390_v46  ;;  %v4401_v49 = vadd.f32 %v5911_v55, %v7730_v41 }
 0x3a8   : > { %v4392_v43 = vpop.f32.mrf.mxu0 }
 0x3a9   : > { %4554 = vst.msk [vmem:[%s6079_s10 + $0xb0] sm:$0xff] %vm8092_vm4, %v4522_v12  ;;  %v4520_v25 = vmax.f32 %v4488_v3, 0.0  ;;  %v4491_v54 = vadd.f32 %v4459_v52, %v4401_v49  ;;  %v4393_v14 = vadd.f32 %v7730_v41, %v4392_v43 }
 0x3aa   : > { %v5914_v56 = vpop.f32.mrf.mxu0 }
 0x3ab   : > { %4552 = vst.msk [vmem:[%s6079_s10 + $0xa0] sm:$0xff] %vm8093_vm2, %v4520_v25  ;;  %v4523_v42 = vmax.f32 %v4491_v54, 0.0  ;;  %v4489_v18 = vadd.f32 %v4457_v58, %v4393_v14  ;;  %v4414_v61 = vadd.f32 %v5914_v56, %v7730_v41 }
 0x3ac   : > { %v4405_v20 = vpop.f32.mrf.mxu0 }
 0x3ad   : > { %4555 = vst.msk [vmem:[%s6079_s10 + $0xb8] sm:$0xff] %vm8094_vm13, %v4523_v42  ;;  %v4521_v51 = vmax.f32 %v4489_v18, 0.0  ;;  %v4494_v63 = vadd.f32 %v4462_v29, %v4414_v61  ;;  %v4406_v9 = vadd.f32 %v7730_v41, %v4405_v20 }
 0x3ae   : > { %v5915_v24 = vpop.f32.mrf.mxu0 }
 0x3af   : > { %4553 = vst.msk [vmem:[%s6079_s10 + $0xa8] sm:$0xff] %vm8095_vm9, %v4521_v51  ;;  %v4526_v62 = vmax.f32 %v4494_v63, 0.0  ;;  %v4492_v22 = vadd.f32 %v4460_v48, %v4406_v9  ;;  %v4417_v11 = vadd.f32 %v5915_v24, %v7730_v41 }
 0x3b0   : > { %v4408_v36 = vpop.f32.mrf.mxu0 }
 0x3b1   : > { %4558 = vst.msk [vmem:[%s6079_s10 + $0xd0] sm:$0xff] %vm8096_vm12, %v4526_v62  ;;  %v4524_v26 = vmax.f32 %v4492_v22, 0.0  ;;  %v4495_v23 = vadd.f32 %v4463_v44, %v4417_v11  ;;  %v4409_v32 = vadd.f32 %v7730_v41, %v4408_v36 }
 0x3b2   : > { %v5918_v28 = vpop.f32.mrf.mxu0 }
 0x3b3   : > { %4556 = vst.msk [vmem:[%s6079_s10 + $0xc0] sm:$0xff] %vm8097_vm8, %v4524_v26  ;;  %v4527_v2 = vmax.f32 %v4495_v23, 0.0  ;;  %v4493_v39 = vadd.f32 %v4461_v17, %v4409_v32  ;;  %v4430_v31 = vadd.f32 %v5918_v28, %v7730_v41 }
 0x3b4   : > { %v4421_v8 = vpop.f32.mrf.mxu0 }
 0x3b5   : > { %4559 = vst.msk [vmem:[%s6079_s10 + $0xd8] sm:$0xff] %vm8098_vm14, %v4527_v2  ;;  %v4525_v50 = vmax.f32 %v4493_v39, 0.0  ;;  %v4498_v7 = vadd.f32 %v4466_v27, %v4430_v31  ;;  %v4422_v30 = vadd.f32 %v7730_v41, %v4421_v8 }
 0x3b6   : > { %v5919_v15 = vpop.f32.mrf.mxu0 }
 0x3b7   : > { %4557 = vst.msk [vmem:[%s6079_s10 + $0xc8] sm:$0xff] %vm8083_vm0, %v4525_v50  ;;  %v4530_v47 = vmax.f32 %v4498_v7, 0.0  ;;  %v4496_v38 = vadd.f32 %v4464_v53, %v4422_v30  ;;  %v4433_v60 = vadd.f32 %v5919_v15, %v7730_v41 }
 0x3b8   : > { %v4424_v37 = vpop.f32.mrf.mxu0 }
 0x3b9   : > { %4562 = vst.msk [vmem:[%s6079_s10 + $0xf0] sm:$0xff] %vm8099_vm3, %v4530_v47  ;;  %v4528_v13 = vmax.f32 %v4496_v38, 0.0  ;;  %v4499_v59 = vadd.f32 %v4467_v5, %v4433_v60  ;;  %v4425_v1 = vadd.f32 %v7730_v41, %v4424_v37 }
 0x3bb   : > { %4560 = vst.msk [vmem:[%s6079_s10 + $0xe0] sm:$0xff] %vm8100_vm6, %v4528_v13  ;;  %v4531_v10 = vmax.f32 %v4499_v59, 0.0  ;;  %v4497_v6 = vadd.f32 %v4465_v40, %v4425_v1 }
 0x3bd   : > { %4563 = vst.msk [vmem:[%s6079_s10 + $0xf8] sm:$0xff] %vm8101_vm7, %v4531_v10  ;;  %v4529_v57 = vmax.f32 %v4497_v6, 0.0 }
 0x3bf   : > { %4561 = vst.msk [vmem:[%s6079_s10 + $0xe8] sm:$0xff] %vm8102_vm10, %v4529_v57 }
 0x3c0 PF: > { %s17_s24 = sadd.s32 1, %s6019_s24  }
 0x3c1   : > { %p14_p5 = scmp.ge.s32.totalorder %s17_s24, 4  }
 0x3c3   :  { %16 = sbr.rel (!%p14_p5) target bundleno = 1 (0x1), region = 90 }

</bundles_post_ra>
